<compile_context>
chip_gen: v7x
topology: tpu7x:2x2x1
jax: 0.10.0
libtpu: 0.0.40
codegen_flags: <defaults>
</compile_context>

<pallas_src>
import jax
import jax.numpy as jnp
from jax import lax
from jax.experimental import pallas as pl
from jax.experimental.pallas import tpu as pltpu


def _ceil_to(x, m):
    return -(-x // m) * m


# ----------------------------------------------------------------------------
# conv + relu + 2x2 maxpool kernel (one MXU matmul per grid step, in-register pool)
# ----------------------------------------------------------------------------
def _conv_relu_pool_kernel(x_ref, w_ref, b_ref, o_ref):
    # x_ref: (Bn, 4, S, kkc) bf16 im2col slab; rows ordered (b, quadrant, ho, wo),
    #        quadrant q = 2*hp + wp is the offset inside the 2x2 pool window.
    # w_ref: (kkc, Cp) bf16   (Cout zero-padded to a multiple of 128 lanes)
    # b_ref: (1, Cp)   f32
    # o_ref: (Bn, S, Cp) bf16 pooled output, rows ordered (b, ho, wo)
    Bn, Q, S, kkc = x_ref.shape
    Cp = w_ref.shape[-1]

    # Single MXU matmul for the whole conv of this batch block.
    x = x_ref[...].reshape(Bn * Q * S, kkc)               # free leading-dim merge
    y = jnp.dot(x, w_ref[...], preferred_element_type=jnp.float32)
    y = jnp.maximum(y + b_ref[...], 0.0)                   # bias + ReLU in f32
    y = y.reshape(Bn, Q, S, Cp)                            # free leading-dim split

    # 2x2 max-pool: the 4 pool-window offsets are 4 contiguous row blocks per
    # image -> 3 bulk elementwise maxes (no scratch, no strided/masked access).
    pooled = jnp.maximum(jnp.maximum(y[:, 0], y[:, 1]),
                         jnp.maximum(y[:, 2], y[:, 3]))    # (Bn, S, Cp)
    o_ref[...] = pooled.astype(o_ref.dtype)                # lane-dense bf16 store


def conv_relu_pool(x, w, b, *, block_n=4):
    """SAME conv + ReLU + 2x2/2 maxpool.

    x: (N, H, W, Cin) NHWC (f32 or bf16)
    w: (K, K, Cin_w, Cout) with Cin_w <= Cin (extra input channels treated as 0)
    b: (Cout,)
    Returns (N, H//2, W//2, Cp) bf16 with Cp = Cout zero-padded to a multiple of
    128; the padded channels are exactly zero.
    """
    N, H, W, Cin = x.shape
    K, _, Cin_w, Cout = w.shape
    assert K % 2 == 1, "SAME-padding path assumes odd kernel_size"
    assert H % 2 == 0 and W % 2 == 0
    Ho, Wo = H // 2, W // 2
    S = Ho * Wo
    p = (K - 1) // 2
    Cp = _ceil_to(max(Cout, 128), 128)
    kkc = K * K * Cin

    # Weights/bias: pad input channels up to Cin, output channels up to Cp.
    if Cin_w != Cin:
        w = jnp.pad(w, ((0, 0), (0, 0), (0, Cin - Cin_w), (0, 0)))
    w_flat = jnp.pad(w, ((0, 0), (0, 0), (0, 0), (0, Cp - Cout)))
    w_flat = w_flat.reshape(kkc, Cp).astype(jnp.bfloat16)       # rows = (kh, kw, cin)
    b2 = jnp.pad(b, (0, Cp - Cout)).reshape(1, Cp).astype(jnp.float32)

    # Glue im2col: one slab with rows ordered (n, pool-quadrant, ho, wo).
    xb = x.astype(jnp.bfloat16)
    xp = jnp.pad(xb, ((0, 0), (p, p), (p, p), (0, 0)))
    taps = [xp[:, kh:kh + H, kw:kw + W, :] for kh in range(K) for kw in range(K)]
    cols = jnp.concatenate(taps, axis=-1)                        # (N, H, W, kkc)
    cols = cols.reshape(N, Ho, 2, Wo, 2, kkc)
    cols = cols.transpose(0, 2, 4, 1, 3, 5).reshape(N, 4, S, kkc)

    # block_n=4 keeps the grid >= 2 steps at batch=8 (v7x dual TensorCore).
    # NOTE: per-step VMEM ~ 2 * Bn*4*S*ceil_to(kkc,128)*2 bytes; for much larger
    # input_size/filters shrink block_n or add a spatial grid axis (v7x = 64 MiB).
    Bn = block_n if N >= block_n else N
    Npad = _ceil_to(N, Bn)
    if Npad != N:
        cols = jnp.pad(cols, ((0, Npad - N), (0, 0), (0, 0), (0, 0)))

    out = pl.pallas_call(
        _conv_relu_pool_kernel,
        out_shape=jax.ShapeDtypeStruct((Npad, S, Cp), jnp.bfloat16),
        grid_spec=pltpu.PrefetchScalarGridSpec(
            num_scalar_prefetch=0,
            grid=(Npad // Bn,),
            in_specs=[
                pl.BlockSpec((Bn, 4, S, kkc), lambda n: (n, 0, 0, 0)),
                pl.BlockSpec((kkc, Cp), lambda n: (0, 0)),
                pl.BlockSpec((1, Cp), lambda n: (0, 0)),
            ],
            out_specs=pl.BlockSpec((Bn, S, Cp), lambda n: (n, 0, 0)),
        ),
        compiler_params=pltpu.CompilerParams(dimension_semantics=("parallel",)),
    )(cols, w_flat, b2)
    return out[:N].reshape(N, Ho, Wo, Cp)


# ----------------------------------------------------------------------------
# fc1 -> relu -> fc2 kernel (row-tiled, hidden and classes padded to 128 lanes)
# ----------------------------------------------------------------------------
def _mlp_kernel(x_ref, w1_ref, b1_ref, w2_ref, b2_ref, o_ref):
    h = jnp.dot(x_ref[...], w1_ref[...], preferred_element_type=jnp.float32) + b1_ref[...]
    h = jnp.maximum(h, 0.0).astype(w2_ref.dtype)          # back to bf16 for the MXU
    o_ref[...] = (jnp.dot(h, w2_ref[...], preferred_element_type=jnp.float32)
                  + b2_ref[...])


def mlp(x, w1, b1, w2, b2, *, block_m=128):
    N, D = x.shape
    F = w1.shape[1]
    C = w2.shape[1]
    Fp = _ceil_to(max(F, 128), 128)     # lane-dense hidden + full 128-row fc2 contraction
    Cp = _ceil_to(max(C, 128), 128)     # lane-dense output store
    Np = _ceil_to(N, 8)
    Bm = min(block_m, Np)
    Np = _ceil_to(Np, Bm)

    xp = jnp.pad(x, ((0, Np - N), (0, 0))).astype(jnp.bfloat16)
    w1p = jnp.pad(w1, ((0, 0), (0, Fp - F))).astype(jnp.bfloat16)
    b1p = jnp.pad(b1, (0, Fp - F)).reshape(1, Fp).astype(jnp.float32)
    w2p = jnp.pad(w2, ((0, Fp - F), (0, Cp - C))).astype(jnp.bfloat16)
    b2p = jnp.pad(b2, (0, Cp - C)).reshape(1, Cp).astype(jnp.float32)

    out = pl.pallas_call(
        _mlp_kernel,
        out_shape=jax.ShapeDtypeStruct((Np, Cp), jnp.float32),
        grid_spec=pltpu.PrefetchScalarGridSpec(
            num_scalar_prefetch=0,
            grid=(Np // Bm,),
            in_specs=[
                pl.BlockSpec((Bm, D), lambda m: (m, 0)),
                pl.BlockSpec((D, Fp), lambda m: (0, 0)),
                pl.BlockSpec((1, Fp), lambda m: (0, 0)),
                pl.BlockSpec((Fp, Cp), lambda m: (0, 0)),
                pl.BlockSpec((1, Cp), lambda m: (0, 0)),
            ],
            out_specs=pl.BlockSpec((Bm, Cp), lambda m: (m, 0)),
        ),
        compiler_params=pltpu.CompilerParams(dimension_semantics=("parallel",)),
    )(xp, w1p, b1p, w2p, b2p)
    return out[:N, :C]


# ----------------------------------------------------------------------------
# full forward, matching torch ConvNet.forward semantics
# ----------------------------------------------------------------------------
def convnet_forward(x_nchw, params):
    x = jnp.transpose(x_nchw, (0, 2, 3, 1))              # NCHW -> NHWC (glue, once)
    x = conv_relu_pool(x, params["w1"], params["b1"])    # (N, H/2, W/2, 128) bf16
    x = conv_relu_pool(x, params["w2"], params["b2"])    # (N, H/4, W/4, 128) bf16
    N, Ho2, Wo2, C2p = x.shape
    x = x.reshape(N, Ho2 * Wo2 * C2p)                    # NHWC flatten (free)

    # Fold torch's NCHW .view() flatten order AND the conv channel zero-padding
    # into fc1's weight rows (tiny one-time weight permute; no per-forward
    # activation transpose or channel slice).
    C2 = params["w2"].shape[-1]
    F = params["fc1_w"].shape[1]
    fc1_w = params["fc1_w"].reshape(C2, Ho2, Wo2, F).transpose(1, 2, 0, 3)
    fc1_w = jnp.pad(fc1_w, ((0, 0), (0, 0), (0, C2p - C2), (0, 0)))
    fc1_w = fc1_w.reshape(Ho2 * Wo2 * C2p, F)

    return mlp(x, fc1_w, params["fc1_b"],
               params["fc2_w"], params["fc2_b"])         # fc2(relu(fc1(x)))


def init_params(key, *, input_channel, kernel_size, filters1, filters2,
                input_size, fc_size, classes):
    ks = jax.random.split(key, 8)

    def unif(k, shape, fan_in):
        bound = 1.0 / jnp.sqrt(jnp.float32(fan_in))
        return jax.random.uniform(k, shape, jnp.float32, -bound, bound)

    K = kernel_size
    D = filters2 * input_size * input_size // 16
    return {
        "w1": unif(ks[0], (K, K, input_channel, filters1), input_channel * K * K),
        "b1": unif(ks[1], (filters1,), input_channel * K * K),
        "w2": unif(ks[2], (K, K, filters1, filters2), filters1 * K * K),
        "b2": unif(ks[3], (filters2,), filters1 * K * K),
        "fc1_w": unif(ks[4], (D, fc_size), D),     # rows in torch NCHW-flatten order
        "fc1_b": unif(ks[5], (fc_size,), D),
        "fc2_w": unif(ks[6], (fc_size, classes), fc_size),
        "fc2_b": unif(ks[7], (classes,), fc_size),
    }


# pure-JAX reference (same math as the torch module, no Pallas) for a sanity check
def reference_forward(x_nchw, params):
    x = jnp.transpose(x_nchw, (0, 2, 3, 1))

    def layer(x, w, b):
        y = lax.conv_general_dilated(
            x, w, (1, 1), "SAME",
            dimension_numbers=("NHWC", "HWIO", "NHWC")) + b
        y = jnp.maximum(y, 0.0)
        return lax.reduce_window(y, -jnp.inf, lax.max,
                                 (1, 2, 2, 1), (1, 2, 2, 1), "VALID")

    x = layer(x, params["w1"], params["b1"])
    x = layer(x, params["w2"], params["b2"])
    N = x.shape[0]
    x = jnp.transpose(x, (0, 3, 1, 2)).reshape(N, -1)    # torch .view order
    h = jnp.maximum(x @ params["fc1_w"] + params["fc1_b"], 0.0)
    return h @ params["fc2_w"] + params["fc2_b"]


if __name__ == "__main__":
    # Small shapes consistent with the module: batch=8, channels=3, spatial=16,
    # kernel=3, filters1=filters2=8, fc=32, classes=10.
    cfg = dict(input_channel=3, kernel_size=3, filters1=8, filters2=8,
               input_size=16, fc_size=32, classes=10)
    batch = 8
    key = jax.random.PRNGKey(0)
    kx, kp = jax.random.split(key)
    params = init_params(kp, **cfg)
    x = jax.random.normal(
        kx, (batch, cfg["input_channel"], cfg["input_size"], cfg["input_size"]),
        jnp.float32)

    fwd = jax.jit(convnet_forward)
    out = jax.block_until_ready(fwd(x, params))
    assert out.shape == (batch, cfg["classes"]), out.shape

    ref = reference_forward(x, params)
    err = float(jnp.max(jnp.abs(out - ref)))
    assert jnp.allclose(out, ref, rtol=2e-2, atol=2e-2), f"max abs diff {err}"

    print("KERNEL_OK")
</pallas_src>

<mosaic_0001>
module attributes {stable_mosaic.version = 11 : i64} {
  func.func @_conv_relu_pool_kernel(%arg0: i32, %arg1: memref<4x4x64x27xbf16, #tpu.memory_space<vmem>>, %arg2: memref<27x128xbf16, #tpu.memory_space<vmem>>, %arg3: memref<1x128xf32, #tpu.memory_space<vmem>>, %arg4: memref<4x64x128xbf16, #tpu.memory_space<vmem>>) attributes {dimension_semantics = [#tpu.dimension_semantics<parallel>], iteration_bounds = array<i64: 2>, scalar_prefetch = 0 : i64, scratch_operands = 0 : i64, tpu.core_type = #tpu.core_type<tc>, window_params = [{transform_indices = @transform_0, window_bounds = array<i64: 4, 4, 64, 27>}, {pipeline_mode = #tpu.pipeline_mode<synchronous>, transform_indices = @transform_1, window_bounds = array<i64: 27, 128>}, {pipeline_mode = #tpu.pipeline_mode<synchronous>, transform_indices = @transform_2, window_bounds = array<i64: 1, 128>}, {transform_indices = @transform_3, window_bounds = array<i64: 4, 64, 128>}]} {
    %c0 = arith.constant 0 : index
    %c0_0 = arith.constant 0 : index
    %c0_1 = arith.constant 0 : index
    %c0_2 = arith.constant 0 : index
    %0 = vector.load %arg1[%c0, %c0_0, %c0_1, %c0_2] : memref<4x4x64x27xbf16, #tpu.memory_space<vmem>>, vector<4x4x64x27xbf16>
    %1 = vector.shape_cast %0 : vector<4x4x64x27xbf16> to vector<1024x27xbf16>
    %c0_3 = arith.constant 0 : index
    %c0_4 = arith.constant 0 : index
    %2 = vector.load %arg2[%c0_3, %c0_4] : memref<27x128xbf16, #tpu.memory_space<vmem>>, vector<27x128xbf16>
    %cst = arith.constant dense<0.000000e+00> : vector<1024x128xf32>
    %3 = tpu.matmul %1, %2, %cst {dimension_numbers = #tpu.dot_dimension_numbers<[1], [0], [0], [1], [0, 0, 1, 1], [], []>} : vector<1024x27xbf16>, vector<27x128xbf16>, vector<1024x128xf32> -> vector<1024x128xf32>
    %c0_5 = arith.constant 0 : index
    %c0_6 = arith.constant 0 : index
    %4 = vector.load %arg3[%c0_5, %c0_6] : memref<1x128xf32, #tpu.memory_space<vmem>>, vector<1x128xf32>
    %5 = vector.broadcast %4 : vector<1x128xf32> to vector<1024x128xf32>
    %6 = arith.addf %3, %5 : vector<1024x128xf32>
    %cst_7 = arith.constant 0.000000e+00 : f32
    %7 = vector.broadcast %cst_7 : f32 to vector<1024x128xf32>
    %8 = arith.maximumf %6, %7 : vector<1024x128xf32>
    %9 = vector.shape_cast %8 : vector<1024x128xf32> to vector<4x4x64x128xf32>
    %10 = vector.extract_strided_slice %9 {offsets = [0, 0, 0, 0], sizes = [4, 1, 64, 128], strides = [1, 1, 1, 1]} : vector<4x4x64x128xf32> to vector<4x1x64x128xf32>
    %11 = vector.shape_cast %10 : vector<4x1x64x128xf32> to vector<4x64x128xf32>
    %12 = vector.extract_strided_slice %9 {offsets = [0, 1, 0, 0], sizes = [4, 1, 64, 128], strides = [1, 1, 1, 1]} : vector<4x4x64x128xf32> to vector<4x1x64x128xf32>
    %13 = vector.shape_cast %12 : vector<4x1x64x128xf32> to vector<4x64x128xf32>
    %14 = arith.maximumf %11, %13 : vector<4x64x128xf32>
    %15 = vector.extract_strided_slice %9 {offsets = [0, 2, 0, 0], sizes = [4, 1, 64, 128], strides = [1, 1, 1, 1]} : vector<4x4x64x128xf32> to vector<4x1x64x128xf32>
    %16 = vector.shape_cast %15 : vector<4x1x64x128xf32> to vector<4x64x128xf32>
    %17 = vector.extract_strided_slice %9 {offsets = [0, 3, 0, 0], sizes = [4, 1, 64, 128], strides = [1, 1, 1, 1]} : vector<4x4x64x128xf32> to vector<4x1x64x128xf32>
    %18 = vector.shape_cast %17 : vector<4x1x64x128xf32> to vector<4x64x128xf32>
    %19 = arith.maximumf %16, %18 : vector<4x64x128xf32>
    %20 = arith.maximumf %14, %19 : vector<4x64x128xf32>
    %21 = arith.truncf %20 : vector<4x64x128xf32> to vector<4x64x128xbf16>
    %c0_8 = arith.constant 0 : index
    %c0_9 = arith.constant 0 : index
    %c0_10 = arith.constant 0 : index
    %22 = vector.load %arg4[%c0_8, %c0_9, %c0_10] : memref<4x64x128xbf16, #tpu.memory_space<vmem>>, vector<4x64x128xbf16>
    tpu.vector_store %arg4[%c0_8, %c0_9, %c0_10], %21 {strides = array<i32>} : memref<4x64x128xbf16, #tpu.memory_space<vmem>>, vector<4x64x128xbf16>,
    return
  }
  func.func @transform_0(%arg0: i32) -> (i32, i32, i32, i32) {
    %c0_i32 = arith.constant 0 : i32
    %c0_i32_0 = arith.constant 0 : i32
    %c0_i32_1 = arith.constant 0 : i32
    %c0_i32_2 = arith.constant 0 : i32
    return %arg0, %c0_i32, %c0_i32_0, %c0_i32_1 : i32, i32, i32, i32
  }
  func.func @transform_1(%arg0: i32) -> (i32, i32) {
    %c0_i32 = arith.constant 0 : i32
    %c0_i32_0 = arith.constant 0 : i32
    %c0_i32_1 = arith.constant 0 : i32
    return %c0_i32, %c0_i32_0 : i32, i32
  }
  func.func @transform_2(%arg0: i32) -> (i32, i32) {
    %c0_i32 = arith.constant 0 : i32
    %c0_i32_0 = arith.constant 0 : i32
    %c0_i32_1 = arith.constant 0 : i32
    return %c0_i32, %c0_i32_0 : i32, i32
  }
  func.func @transform_3(%arg0: i32) -> (i32, i32, i32) {
    %c0_i32 = arith.constant 0 : i32
    %c0_i32_0 = arith.constant 0 : i32
    %c0_i32_1 = arith.constant 0 : i32
    return %arg0, %c0_i32, %c0_i32_0 : i32, i32, i32
  }
}

module attributes {stable_mosaic.version = 11 : i64} {
  func.func @_conv_relu_pool_kernel(%arg0: i32, %arg1: memref<4x4x16x1152xbf16, #tpu.memory_space<vmem>>, %arg2: memref<1152x128xbf16, #tpu.memory_space<vmem>>, %arg3: memref<1x128xf32, #tpu.memory_space<vmem>>, %arg4: memref<4x16x128xbf16, #tpu.memory_space<vmem>>) attributes {dimension_semantics = [#tpu.dimension_semantics<parallel>], iteration_bounds = array<i64: 2>, scalar_prefetch = 0 : i64, scratch_operands = 0 : i64, tpu.core_type = #tpu.core_type<tc>, window_params = [{transform_indices = @transform_0, window_bounds = array<i64: 4, 4, 16, 1152>}, {pipeline_mode = #tpu.pipeline_mode<synchronous>, transform_indices = @transform_1, window_bounds = array<i64: 1152, 128>}, {pipeline_mode = #tpu.pipeline_mode<synchronous>, transform_indices = @transform_2, window_bounds = array<i64: 1, 128>}, {transform_indices = @transform_3, window_bounds = array<i64: 4, 16, 128>}]} {
    %c0 = arith.constant 0 : index
    %c0_0 = arith.constant 0 : index
    %c0_1 = arith.constant 0 : index
    %c0_2 = arith.constant 0 : index
    %0 = vector.load %arg1[%c0, %c0_0, %c0_1, %c0_2] : memref<4x4x16x1152xbf16, #tpu.memory_space<vmem>>, vector<4x4x16x1152xbf16>
    %1 = vector.shape_cast %0 : vector<4x4x16x1152xbf16> to vector<256x1152xbf16>
    %c0_3 = arith.constant 0 : index
    %c0_4 = arith.constant 0 : index
    %2 = vector.load %arg2[%c0_3, %c0_4] : memref<1152x128xbf16, #tpu.memory_space<vmem>>, vector<1152x128xbf16>
    %cst = arith.constant dense<0.000000e+00> : vector<256x128xf32>
    %3 = tpu.matmul %1, %2, %cst {dimension_numbers = #tpu.dot_dimension_numbers<[1], [0], [0], [1], [0, 0, 1, 1], [], []>} : vector<256x1152xbf16>, vector<1152x128xbf16>, vector<256x128xf32> -> vector<256x128xf32>
    %c0_5 = arith.constant 0 : index
    %c0_6 = arith.constant 0 : index
    %4 = vector.load %arg3[%c0_5, %c0_6] : memref<1x128xf32, #tpu.memory_space<vmem>>, vector<1x128xf32>
    %5 = vector.broadcast %4 : vector<1x128xf32> to vector<256x128xf32>
    %6 = arith.addf %3, %5 : vector<256x128xf32>
    %cst_7 = arith.constant 0.000000e+00 : f32
    %7 = vector.broadcast %cst_7 : f32 to vector<256x128xf32>
    %8 = arith.maximumf %6, %7 : vector<256x128xf32>
    %9 = vector.shape_cast %8 : vector<256x128xf32> to vector<4x4x16x128xf32>
    %10 = vector.extract_strided_slice %9 {offsets = [0, 0, 0, 0], sizes = [4, 1, 16, 128], strides = [1, 1, 1, 1]} : vector<4x4x16x128xf32> to vector<4x1x16x128xf32>
    %11 = vector.shape_cast %10 : vector<4x1x16x128xf32> to vector<4x16x128xf32>
    %12 = vector.extract_strided_slice %9 {offsets = [0, 1, 0, 0], sizes = [4, 1, 16, 128], strides = [1, 1, 1, 1]} : vector<4x4x16x128xf32> to vector<4x1x16x128xf32>
    %13 = vector.shape_cast %12 : vector<4x1x16x128xf32> to vector<4x16x128xf32>
    %14 = arith.maximumf %11, %13 : vector<4x16x128xf32>
    %15 = vector.extract_strided_slice %9 {offsets = [0, 2, 0, 0], sizes = [4, 1, 16, 128], strides = [1, 1, 1, 1]} : vector<4x4x16x128xf32> to vector<4x1x16x128xf32>
    %16 = vector.shape_cast %15 : vector<4x1x16x128xf32> to vector<4x16x128xf32>
    %17 = vector.extract_strided_slice %9 {offsets = [0, 3, 0, 0], sizes = [4, 1, 16, 128], strides = [1, 1, 1, 1]} : vector<4x4x16x128xf32> to vector<4x1x16x128xf32>
    %18 = vector.shape_cast %17 : vector<4x1x16x128xf32> to vector<4x16x128xf32>
    %19 = arith.maximumf %16, %18 : vector<4x16x128xf32>
    %20 = arith.maximumf %14, %19 : vector<4x16x128xf32>
    %21 = arith.truncf %20 : vector<4x16x128xf32> to vector<4x16x128xbf16>
    %c0_8 = arith.constant 0 : index
    %c0_9 = arith.constant 0 : index
    %c0_10 = arith.constant 0 : index
    %22 = vector.load %arg4[%c0_8, %c0_9, %c0_10] : memref<4x16x128xbf16, #tpu.memory_space<vmem>>, vector<4x16x128xbf16>
    tpu.vector_store %arg4[%c0_8, %c0_9, %c0_10], %21 {strides = array<i32>} : memref<4x16x128xbf16, #tpu.memory_space<vmem>>, vector<4x16x128xbf16>,
    return
  }
  func.func @transform_0(%arg0: i32) -> (i32, i32, i32, i32) {
    %c0_i32 = arith.constant 0 : i32
    %c0_i32_0 = arith.constant 0 : i32
    %c0_i32_1 = arith.constant 0 : i32
    %c0_i32_2 = arith.constant 0 : i32
    return %arg0, %c0_i32, %c0_i32_0, %c0_i32_1 : i32, i32, i32, i32
  }
  func.func @transform_1(%arg0: i32) -> (i32, i32) {
    %c0_i32 = arith.constant 0 : i32
    %c0_i32_0 = arith.constant 0 : i32
    %c0_i32_1 = arith.constant 0 : i32
    return %c0_i32, %c0_i32_0 : i32, i32
  }
  func.func @transform_2(%arg0: i32) -> (i32, i32) {
    %c0_i32 = arith.constant 0 : i32
    %c0_i32_0 = arith.constant 0 : i32
    %c0_i32_1 = arith.constant 0 : i32
    return %c0_i32, %c0_i32_0 : i32, i32
  }
  func.func @transform_3(%arg0: i32) -> (i32, i32, i32) {
    %c0_i32 = arith.constant 0 : i32
    %c0_i32_0 = arith.constant 0 : i32
    %c0_i32_1 = arith.constant 0 : i32
    return %arg0, %c0_i32, %c0_i32_0 : i32, i32, i32
  }
}

module attributes {stable_mosaic.version = 11 : i64} {
  func.func @_mlp_kernel(%arg0: i32, %arg1: memref<8x2048xbf16, #tpu.memory_space<vmem>>, %arg2: memref<2048x128xbf16, #tpu.memory_space<vmem>>, %arg3: memref<1x128xf32, #tpu.memory_space<vmem>>, %arg4: memref<128x128xbf16, #tpu.memory_space<vmem>>, %arg5: memref<1x128xf32, #tpu.memory_space<vmem>>, %arg6: memref<8x128xf32, #tpu.memory_space<vmem>>) attributes {dimension_semantics = [#tpu.dimension_semantics<parallel>], iteration_bounds = array<i64: 1>, scalar_prefetch = 0 : i64, scratch_operands = 0 : i64, tpu.core_type = #tpu.core_type<tc>, window_params = [{transform_indices = @transform_0, window_bounds = array<i64: 8, 2048>}, {pipeline_mode = #tpu.pipeline_mode<synchronous>, transform_indices = @transform_1, window_bounds = array<i64: 2048, 128>}, {pipeline_mode = #tpu.pipeline_mode<synchronous>, transform_indices = @transform_2, window_bounds = array<i64: 1, 128>}, {pipeline_mode = #tpu.pipeline_mode<synchronous>, transform_indices = @transform_3, window_bounds = array<i64: 128, 128>}, {pipeline_mode = #tpu.pipeline_mode<synchronous>, transform_indices = @transform_4, window_bounds = array<i64: 1, 128>}, {transform_indices = @transform_5, window_bounds = array<i64: 8, 128>}]} {
    %c0 = arith.constant 0 : index
    %c0_0 = arith.constant 0 : index
    %0 = vector.load %arg1[%c0, %c0_0] : memref<8x2048xbf16, #tpu.memory_space<vmem>>, vector<8x2048xbf16>
    %c0_1 = arith.constant 0 : index
    %c0_2 = arith.constant 0 : index
    %1 = vector.load %arg2[%c0_1, %c0_2] : memref<2048x128xbf16, #tpu.memory_space<vmem>>, vector<2048x128xbf16>
    %cst = arith.constant dense<0.000000e+00> : vector<8x128xf32>
    %2 = tpu.matmul %0, %1, %cst {dimension_numbers = #tpu.dot_dimension_numbers<[1], [0], [0], [1], [0, 0, 1, 1], [], []>} : vector<8x2048xbf16>, vector<2048x128xbf16>, vector<8x128xf32> -> vector<8x128xf32>
    %c0_3 = arith.constant 0 : index
    %c0_4 = arith.constant 0 : index
    %3 = vector.load %arg3[%c0_3, %c0_4] : memref<1x128xf32, #tpu.memory_space<vmem>>, vector<1x128xf32>
    %4 = vector.broadcast %3 : vector<1x128xf32> to vector<8x128xf32>
    %5 = arith.addf %2, %4 : vector<8x128xf32>
    %cst_5 = arith.constant 0.000000e+00 : f32
    %6 = vector.broadcast %cst_5 : f32 to vector<8x128xf32>
    %7 = arith.maximumf %5, %6 : vector<8x128xf32>
    %8 = arith.truncf %7 : vector<8x128xf32> to vector<8x128xbf16>
    %c0_6 = arith.constant 0 : index
    %c0_7 = arith.constant 0 : index
    %9 = vector.load %arg4[%c0_6, %c0_7] : memref<128x128xbf16, #tpu.memory_space<vmem>>, vector<128x128xbf16>
    %cst_8 = arith.constant dense<0.000000e+00> : vector<8x128xf32>
    %10 = tpu.matmul %8, %9, %cst_8 {dimension_numbers = #tpu.dot_dimension_numbers<[1], [0], [0], [1], [0, 0, 1, 1], [], []>} : vector<8x128xbf16>, vector<128x128xbf16>, vector<8x128xf32> -> vector<8x128xf32>
    %c0_9 = arith.constant 0 : index
    %c0_10 = arith.constant 0 : index
    %11 = vector.load %arg5[%c0_9, %c0_10] : memref<1x128xf32, #tpu.memory_space<vmem>>, vector<1x128xf32>
    %12 = vector.broadcast %11 : vector<1x128xf32> to vector<8x128xf32>
    %13 = arith.addf %10, %12 : vector<8x128xf32>
    %c0_11 = arith.constant 0 : index
    %c0_12 = arith.constant 0 : index
    %14 = vector.load %arg6[%c0_11, %c0_12] : memref<8x128xf32, #tpu.memory_space<vmem>>, vector<8x128xf32>
    tpu.vector_store %arg6[%c0_11, %c0_12], %13 {strides = array<i32>} : memref<8x128xf32, #tpu.memory_space<vmem>>, vector<8x128xf32>,
    return
  }
  func.func @transform_0(%arg0: i32) -> (i32, i32) {
    %c0_i32 = arith.constant 0 : i32
    %c0_i32_0 = arith.constant 0 : i32
    return %arg0, %c0_i32 : i32, i32
  }
  func.func @transform_1(%arg0: i32) -> (i32, i32) {
    %c0_i32 = arith.constant 0 : i32
    %c0_i32_0 = arith.constant 0 : i32
    %c0_i32_1 = arith.constant 0 : i32
    return %c0_i32, %c0_i32_0 : i32, i32
  }
  func.func @transform_2(%arg0: i32) -> (i32, i32) {
    %c0_i32 = arith.constant 0 : i32
    %c0_i32_0 = arith.constant 0 : i32
    %c0_i32_1 = arith.constant 0 : i32
    return %c0_i32, %c0_i32_0 : i32, i32
  }
  func.func @transform_3(%arg0: i32) -> (i32, i32) {
    %c0_i32 = arith.constant 0 : i32
    %c0_i32_0 = arith.constant 0 : i32
    %c0_i32_1 = arith.constant 0 : i32
    return %c0_i32, %c0_i32_0 : i32, i32
  }
  func.func @transform_4(%arg0: i32) -> (i32, i32) {
    %c0_i32 = arith.constant 0 : i32
    %c0_i32_0 = arith.constant 0 : i32
    %c0_i32_1 = arith.constant 0 : i32
    return %c0_i32, %c0_i32_0 : i32, i32
  }
  func.func @transform_5(%arg0: i32) -> (i32, i32) {
    %c0_i32 = arith.constant 0 : i32
    %c0_i32_0 = arith.constant 0 : i32
    return %arg0, %c0_i32 : i32, i32
  }
}

</mosaic_0001>

<bundles_post_ra>
// kernel: convnet_forward.3
= control target key start
LH: loop header
LB: loop body
LE: loop exit
PB: predicated region body
PF: predicated region fallthrough
CT: control target
= control target key end

     0   :  { %s2448_s12 = smov 0   ;;  %s2989_s0 = inlined_call_operand.vmem [shape: bf16[8,4,64,27], index: 0, kind: input, shape index: {}]   ;;  %s2990_s1 = inlined_call_operand.vmem [shape: bf16[27,128], index: 1, kind: input, shape index: {}]   ;;  %s2991_s2 = inlined_call_operand.vmem [shape: f32[1,128], index: 2, kind: input, shape index: {}]   ;;  %s2992_s3 = inlined_call_operand.vmem [shape: bf16[8,64,128], index: 3, kind: output, shape index: {}]  }
   0x1 LB: > { %s1837_s13 = sadd.s32 4294967295, %s2425_s12   ;;  %p1841_p0 = scmp.ge.s32.totalorder %s2425_s12, 1  ;;  %s2425_s12 = sphi %s2448_s12, %s13_s12  }
   0x2   : > { %p139_p1 = scmp.lt.s32.totalorder %s2425_s12, 3 }
   0x4   : > { %p140_p2 = pnand %p1841_p0, %p139_p1 }
   0x5   : > { %v2353_v0 = vld [vmem:[%s2990_s1] sm:$0xff] (!%p140_p2)   ;;  %vm843_vm0 = vcmask (!%p140_p2), 1044480   ;;  %v2354_v1 = vld [vmem:[%s2990_s1 + $0x8] sm:$0x3f] (!%p140_p2)   ;;  %vm844_vm1 = vcmask (!%p140_p2), 1045504   ;;  %s1842_s18 = sshll.u32 (!%p140_p2), %s1837_s13, 2 }
   0x6   : > { %143 = sbr.rel (%p140_p2) target bundleno = 368 (0x170), region = 32  ;;  %2208 = vmatprep.subr.bf16.mxu0 (!%p140_p2), %v2353_v0  ;;  %2340 = vmatprep.subr.bf16.mxu1 (!%p140_p2), %v2353_v0  ;;  %v2427_v2 = vmov (!%p140_p2), 65535   ;;  %p166_p3 = scmp.lt.s32.totalorder (!%p140_p2), %s1842_s18, 7  ;;  %vm650_vm2 = vcmask (!%p140_p2), 220160  }
   0x7   : > { %2209 = vmatpush3.bf16.msra.mxu0 (!%p140_p2), %v2353_v0  ;;  %2342 = vmatpush3.bf16.msra.mxu1 (!%p140_p2), %v2353_v0  ;;  %v845_v3 = vsel (!%p140_p2), %vm843_vm0, 4294967295, %v2427_v2 }
   0x8   : > { %v846_v4 = vsel (!%p140_p2), %vm844_vm1, %v845_v3, 0 }
   0x9   : > { %v848_v5 = vand.u32 (!%p140_p2), %v2354_v1, %v846_v4 }
   0xb   : > { %2210 = vmatprep.subr.bf16.mxu0 (!%p140_p2), %v848_v5  ;;  %2341 = vmatprep.subr.bf16.mxu1 (!%p140_p2), %v848_v5 }
   0xc   : > { %2211 = vmatpush3.bf16.msra.mxu0 (!%p140_p2), %v848_v5  ;;  %2343 = vmatpush3.bf16.msra.mxu1 (!%p140_p2), %v848_v5 }
   0xd   : > { %s2998_s18 = smov (!%p166_p3, %s1842_s18), 7 }
   0xe   : > { %s2013_s19 = sshll.u32 %s2998_s18, 7  ;;  %s2014_s25 = sshll.u32 %s2998_s18, 5 }
   0xf   : > { %s2468_s22 = scalar_lea.vmem %s2989_s0, %s2013_s19  ;;  %s2750_s28 = scalar_lea.vmem %s2992_s3, %s2014_s25 }
  0x10   : > { %v2355_v6 = vld [vmem:[%s2468_s22] sm:$0xff]   ;;  %v2357_v8 = vld [vmem:[%s2468_s22 + $0x8] sm:$0xff]   ;;  %v2359_v10 = vld [vmem:[%s2468_s22 + $0x10] sm:$0xff]  }
  0x11   : > { %v2356_v7 = vld [vmem:[%s2468_s22 + $0x100] sm:$0xff]   ;;  %2212 = vmatprep.mubr.msk.bf16.mxu0 %vm650_vm2, %v2355_v6  ;;  %v2358_v9 = vld [vmem:[%s2468_s22 + $0x108] sm:$0xff]   ;;  %v2360_v11 = vld [vmem:[%s2468_s22 + $0x110] sm:$0xff]  }
  0x12   : > { %2276 = vmatprep.mubr.msk.bf16.mxu1 %vm650_vm2, %v2356_v7  ;;  %2213 = vmatmul.mubr.msk.bf16.vlgmr.msra.gmra.mrb[0].mxu0 %vm650_vm2, %v2357_v8  ;;  %v2361_v12 = vld [vmem:[%s2468_s22 + $0x18] sm:$0xff]   ;;  %v2363_v14 = vld [vmem:[%s2468_s22 + $0x20] sm:$0xff]   ;;  %v2365_v16 = vld [vmem:[%s2468_s22 + $0x28] sm:$0xff]  }
  0x13   : > { %2277 = vmatmul.mubr.msk.bf16.vlgmr.msra.gmra.mrb[0].mxu1 %vm650_vm2, %v2358_v9  ;;  %2216 = vmatprep.mubr.msk.bf16.mxu0 %vm650_vm2, %v2359_v10  ;;  %v2362_v13 = vld [vmem:[%s2468_s22 + $0x118] sm:$0xff]   ;;  %v2364_v15 = vld [vmem:[%s2468_s22 + $0x120] sm:$0xff]   ;;  %v2366_v17 = vld [vmem:[%s2468_s22 + $0x128] sm:$0xff]  }
  0x14   : > { %2280 = vmatprep.mubr.msk.bf16.mxu1 %vm650_vm2, %v2360_v11  ;;  %v2367_v18 = vld [vmem:[%s2468_s22 + $0x30] sm:$0xff]   ;;  %v2369_v20 = vld [vmem:[%s2468_s22 + $0x38] sm:$0xff]   ;;  %v2371_v22 = vld [vmem:[%s2468_s22 + $0x40] sm:$0xff]  }
  0x15   : > { %v2368_v19 = vld [vmem:[%s2468_s22 + $0x130] sm:$0xff]   ;;  %v2370_v21 = vld [vmem:[%s2468_s22 + $0x138] sm:$0xff]   ;;  %v2372_v23 = vld [vmem:[%s2468_s22 + $0x140] sm:$0xff]  }
  0x16   : > { %v2373_v24 = vld [vmem:[%s2468_s22 + $0x48] sm:$0xff]   ;;  %v2375_v26 = vld [vmem:[%s2468_s22 + $0x50] sm:$0xff]   ;;  %v2377_v28 = vld [vmem:[%s2468_s22 + $0x58] sm:$0xff]  }
  0x17   : > { %v2374_v25 = vld [vmem:[%s2468_s22 + $0x148] sm:$0xff]   ;;  %v2376_v27 = vld [vmem:[%s2468_s22 + $0x150] sm:$0xff]   ;;  %v2378_v29 = vld [vmem:[%s2468_s22 + $0x158] sm:$0xff]  }
  0x18   : > { %v2379_v30 = vld [vmem:[%s2468_s22 + $0x60] sm:$0xff]   ;;  %v2381_v32 = vld [vmem:[%s2468_s22 + $0x68] sm:$0xff]   ;;  %v2383_v34 = vld [vmem:[%s2468_s22 + $0x70] sm:$0xff]  }
  0x19   : > { %v2380_v31 = vld [vmem:[%s2468_s22 + $0x160] sm:$0xff]   ;;  %v2382_v33 = vld [vmem:[%s2468_s22 + $0x168] sm:$0xff]   ;;  %v2384_v35 = vld [vmem:[%s2468_s22 + $0x170] sm:$0xff]  }
  0x1a   : > { %2217 = vmatmul.mubr.msk.bf16.gmra.mrb[4].mxu0 %vm650_vm2, %v2361_v12  ;;  %v2385_v36 = vld [vmem:[%s2468_s22 + $0x78] sm:$0xff]   ;;  %v2387_v38 = vld [vmem:[%s2468_s22 + $0x80] sm:$0xff]   ;;  %v2389_v40 = vld [vmem:[%s2468_s22 + $0x88] sm:$0xff]  }
  0x1b   : > { %2281 = vmatmul.mubr.msk.bf16.gmra.mrb[4].mxu1 %vm650_vm2, %v2362_v13  ;;  %2220 = vmatprep.mubr.msk.bf16.mxu0 %vm650_vm2, %v2363_v14  ;;  %v2386_v37 = vld [vmem:[%s2468_s22 + $0x178] sm:$0xff]   ;;  %v2388_v39 = vld [vmem:[%s2468_s22 + $0x180] sm:$0xff]   ;;  %v2390_v41 = vld [vmem:[%s2468_s22 + $0x188] sm:$0xff]  }
  0x1c   : > { %2284 = vmatprep.mubr.msk.bf16.mxu1 %vm650_vm2, %v2364_v15  ;;  %v2391_v42 = vld [vmem:[%s2468_s22 + $0x90] sm:$0xff]   ;;  %v2393_v44 = vld [vmem:[%s2468_s22 + $0x98] sm:$0xff]   ;;  %v2395_v46 = vld [vmem:[%s2468_s22 + $0xa0] sm:$0xff]  }
  0x1d   : > { %v2392_v43 = vld [vmem:[%s2468_s22 + $0x190] sm:$0xff]   ;;  %v2394_v45 = vld [vmem:[%s2468_s22 + $0x198] sm:$0xff]   ;;  %v2396_v47 = vld [vmem:[%s2468_s22 + $0x1a0] sm:$0xff]  }
  0x1e   : > { %v2397_v48 = vld [vmem:[%s2468_s22 + $0xa8] sm:$0xff]   ;;  %v2399_v50 = vld [vmem:[%s2468_s22 + $0xb0] sm:$0xff]   ;;  %v2401_v52 = vld [vmem:[%s2468_s22 + $0xb8] sm:$0xff]  }
  0x1f   : > { %v2398_v49 = vld [vmem:[%s2468_s22 + $0x1a8] sm:$0xff]   ;;  %v2400_v51 = vld [vmem:[%s2468_s22 + $0x1b0] sm:$0xff]   ;;  %v2402_v53 = vld [vmem:[%s2468_s22 + $0x1b8] sm:$0xff]  }
  0x20   : > { %v2403_v54 = vld [vmem:[%s2468_s22 + $0xc0] sm:$0xff]   ;;  %v2405_v56 = vld [vmem:[%s2468_s22 + $0xc8] sm:$0xff]   ;;  %v2407_v58 = vld [vmem:[%s2468_s22 + $0xd0] sm:$0xff]  }
  0x21   : > { %v2404_v55 = vld [vmem:[%s2468_s22 + $0x1c0] sm:$0xff]   ;;  %v2406_v57 = vld [vmem:[%s2468_s22 + $0x1c8] sm:$0xff]   ;;  %v2408_v59 = vld [vmem:[%s2468_s22 + $0x1d0] sm:$0xff]  }
  0x22   : > { %2221 = vmatmul.mubr.msk.bf16.gmra.mrb[8].mxu0 %vm650_vm2, %v2365_v16  ;;  %v2409_v60 = vld [vmem:[%s2468_s22 + $0xd8] sm:$0xff]   ;;  %v2411_v62 = vld [vmem:[%s2468_s22 + $0xe0] sm:$0xff]   ;;  %v2413_v0 = vld [vmem:[%s2468_s22 + $0xe8] sm:$0xff]  }
  0x23   : > { %2285 = vmatmul.mubr.msk.bf16.gmra.mrb[8].mxu1 %vm650_vm2, %v2366_v17  ;;  %2224 = vmatprep.mubr.msk.bf16.mxu0 %vm650_vm2, %v2367_v18  ;;  %v2410_v61 = vld [vmem:[%s2468_s22 + $0x1d8] sm:$0xff]   ;;  %v2412_v63 = vld [vmem:[%s2468_s22 + $0x1e0] sm:$0xff]   ;;  %v2414_v1 = vld [vmem:[%s2468_s22 + $0x1e8] sm:$0xff]  }
  0x24   : > { %2288 = vmatprep.mubr.msk.bf16.mxu1 %vm650_vm2, %v2368_v19  ;;  %v2415_v2 = vld [vmem:[%s2468_s22 + $0xf0] sm:$0xff]   ;;  %v2417_v4 = vld [vmem:[%s2468_s22 + $0xf8] sm:$0xff]   ;;  %v2601_v14 = vld [vmem:[%s2991_s2] ss:$0 sm:$0xff] }
  0x25   : > { %v2416_v3 = vld [vmem:[%s2468_s22 + $0x1f0] sm:$0xff]   ;;  %v2418_v5 = vld [vmem:[%s2468_s22 + $0x1f8] sm:$0xff]  }
  0x2a   : > { %2225 = vmatmul.mubr.msk.bf16.gmra.mrb[12].mxu0 %vm650_vm2, %v2369_v20 }
  0x2b   : > { %2289 = vmatmul.mubr.msk.bf16.gmra.mrb[12].mxu1 %vm650_vm2, %v2370_v21  ;;  %2228 = vmatprep.mubr.msk.bf16.mxu0 %vm650_vm2, %v2371_v22 }
  0x2c   : > { %2292 = vmatprep.mubr.msk.bf16.mxu1 %vm650_vm2, %v2372_v23 }
  0x32   : > { %2229 = vmatmul.mubr.msk.bf16.gmra.mrb[16].mxu0 %vm650_vm2, %v2373_v24 }
  0x33   : > { %2293 = vmatmul.mubr.msk.bf16.gmra.mrb[16].mxu1 %vm650_vm2, %v2374_v25  ;;  %2232 = vmatprep.mubr.msk.bf16.mxu0 %vm650_vm2, %v2375_v26 }
  0x34   : > { %2296 = vmatprep.mubr.msk.bf16.mxu1 %vm650_vm2, %v2376_v27 }
  0x3a   : > { %2233 = vmatmul.mubr.msk.bf16.gmra.mrb[20].mxu0 %vm650_vm2, %v2377_v28 }
  0x3b   : > { %2297 = vmatmul.mubr.msk.bf16.gmra.mrb[20].mxu1 %vm650_vm2, %v2378_v29  ;;  %2236 = vmatprep.mubr.msk.bf16.mxu0 %vm650_vm2, %v2379_v30 }
  0x3c   : > { %2300 = vmatprep.mubr.msk.bf16.mxu1 %vm650_vm2, %v2380_v31 }
  0x42   : > { %2237 = vmatmul.mubr.msk.bf16.gmra.mrb[24].mxu0 %vm650_vm2, %v2381_v32 }
  0x43   : > { %2301 = vmatmul.mubr.msk.bf16.gmra.mrb[24].mxu1 %vm650_vm2, %v2382_v33  ;;  %2240 = vmatprep.mubr.msk.bf16.mxu0 %vm650_vm2, %v2383_v34 }
  0x44   : > { %2304 = vmatprep.mubr.msk.bf16.mxu1 %vm650_vm2, %v2384_v35 }
  0x4a   : > { %2241 = vmatmul.mubr.msk.bf16.gmra.mrb[28].mxu0 %vm650_vm2, %v2385_v36 }
  0x4b   : > { %2305 = vmatmul.mubr.msk.bf16.gmra.mrb[28].mxu1 %vm650_vm2, %v2386_v37  ;;  %2244 = vmatprep.mubr.msk.bf16.mxu0 %vm650_vm2, %v2387_v38 }
  0x4c   : > { %2308 = vmatprep.mubr.msk.bf16.mxu1 %vm650_vm2, %v2388_v39 }
  0x52   : > { %2245 = vmatmul.mubr.msk.bf16.gmra.mrb[32].mxu0 %vm650_vm2, %v2389_v40 }
  0x53   : > { %2309 = vmatmul.mubr.msk.bf16.gmra.mrb[32].mxu1 %vm650_vm2, %v2390_v41  ;;  %2248 = vmatprep.mubr.msk.bf16.mxu0 %vm650_vm2, %v2391_v42 }
  0x54   : > { %2312 = vmatprep.mubr.msk.bf16.mxu1 %vm650_vm2, %v2392_v43 }
  0x5a   : > { %2249 = vmatmul.mubr.msk.bf16.gmra.mrb[36].mxu0 %vm650_vm2, %v2393_v44 }
  0x5b   : > { %2313 = vmatmul.mubr.msk.bf16.gmra.mrb[36].mxu1 %vm650_vm2, %v2394_v45  ;;  %2252 = vmatprep.mubr.msk.bf16.mxu0 %vm650_vm2, %v2395_v46 }
  0x5c   : > { %2316 = vmatprep.mubr.msk.bf16.mxu1 %vm650_vm2, %v2396_v47 }
  0x62   : > { %2253 = vmatmul.mubr.msk.bf16.gmra.mrb[40].mxu0 %vm650_vm2, %v2397_v48 }
  0x63   : > { %2317 = vmatmul.mubr.msk.bf16.gmra.mrb[40].mxu1 %vm650_vm2, %v2398_v49  ;;  %2256 = vmatprep.mubr.msk.bf16.mxu0 %vm650_vm2, %v2399_v50 }
  0x64   : > { %2320 = vmatprep.mubr.msk.bf16.mxu1 %vm650_vm2, %v2400_v51 }
  0x6a   : > { %2257 = vmatmul.mubr.msk.bf16.gmra.mrb[44].mxu0 %vm650_vm2, %v2401_v52 }
  0x6b   : > { %2321 = vmatmul.mubr.msk.bf16.gmra.mrb[44].mxu1 %vm650_vm2, %v2402_v53  ;;  %2260 = vmatprep.mubr.msk.bf16.mxu0 %vm650_vm2, %v2403_v54 }
  0x6c   : > { %2324 = vmatprep.mubr.msk.bf16.mxu1 %vm650_vm2, %v2404_v55 }
  0x72   : > { %2261 = vmatmul.mubr.msk.bf16.gmra.mrb[48].mxu0 %vm650_vm2, %v2405_v56 }
  0x73   : > { %2325 = vmatmul.mubr.msk.bf16.gmra.mrb[48].mxu1 %vm650_vm2, %v2406_v57  ;;  %2264 = vmatprep.mubr.msk.bf16.mxu0 %vm650_vm2, %v2407_v58 }
  0x74   : > { %2328 = vmatprep.mubr.msk.bf16.mxu1 %vm650_vm2, %v2408_v59 }
  0x7a   : > { %2265 = vmatmul.mubr.msk.bf16.gmra.mrb[52].mxu0 %vm650_vm2, %v2409_v60 }
  0x7b   : > { %2329 = vmatmul.mubr.msk.bf16.gmra.mrb[52].mxu1 %vm650_vm2, %v2410_v61  ;;  %2268 = vmatprep.mubr.msk.bf16.mxu0 %vm650_vm2, %v2411_v62 }
  0x7c   : > { %2332 = vmatprep.mubr.msk.bf16.mxu1 %vm650_vm2, %v2412_v63 }
  0x82   : > { %2269 = vmatmul.mubr.msk.bf16.gmra.mrb[56].mxu0 %vm650_vm2, %v2413_v0 }
  0x83   : > { %2333 = vmatmul.mubr.msk.bf16.gmra.mrb[56].mxu1 %vm650_vm2, %v2414_v1  ;;  %2272 = vmatprep.mubr.msk.bf16.mxu0 %vm650_vm2, %v2415_v2 }
  0x84   : > { %2336 = vmatprep.mubr.msk.bf16.mxu1 %vm650_vm2, %v2416_v3 }
  0x8a   : > { %2273 = vmatmul.mubr.msk.bf16.gmra.mrb[60].mxu0 %vm650_vm2, %v2417_v4 }
  0x8b   : > { %2337 = vmatmul.mubr.msk.bf16.gmra.mrb[60].mxu1 %vm650_vm2, %v2418_v5 }
  0xe5   : > { %v2214_v6 = vpop.f32.mrb[0].mxu0 }
  0xe6   : > { %v2278_v7 = vpop.f32.mrb[0].mxu1  ;;  %v884_v8 = vpop.f32.mrb[1].mxu0  ;;  %v893_v20 = vadd.f32 %v2214_v6, %v2601_v14 }
  0xe7   : > { %v1140_v9 = vpop.f32.mrb[1].mxu1  ;;  %v2215_v10 = vpop.f32.mrb[2].mxu0  ;;  %v1149_v21 = vadd.f32 %v2278_v7, %v2601_v14  ;;  %v885_v22 = vadd.f32 %v2601_v14, %v884_v8 }
  0xe8   : > { %v2279_v11 = vpop.f32.mrb[2].mxu1  ;;  %v887_v12 = vpop.f32.mrb[3].mxu0  ;;  %v1141_v23 = vadd.f32 %v2601_v14, %v1140_v9  ;;  %v896_v26 = vadd.f32 %v2215_v10, %v2601_v14  ;;  %v1397_v32 = vmax.f32 %v893_v20, 0.0 }
  0xe9   : > { %v1143_v13 = vpop.f32.mrb[3].mxu1  ;;  %v1152_v27 = vadd.f32 %v2279_v11, %v2601_v14  ;;  %v888_v28 = vadd.f32 %v2601_v14, %v887_v12  ;;  %v1461_v33 = vmax.f32 %v1149_v21, 0.0  ;;  %v1395_v34 = vmax.f32 %v885_v22, 0.0 }
  0xea   : > { %v1144_v29 = vadd.f32 %v2601_v14, %v1143_v13  ;;  %v1459_v35 = vmax.f32 %v1141_v23, 0.0  ;;  %v1398_v36 = vmax.f32 %v896_v26, 0.0 }
  0xeb   : > { %v1462_v37 = vmax.f32 %v1152_v27, 0.0  ;;  %v1396_v38 = vmax.f32 %v888_v28, 0.0 }
  0xec   : > { %v1460_v39 = vmax.f32 %v1144_v29, 0.0 }
  0xed   : > { %v2218_v15 = vpop.f32.mrb[4].mxu0 }
  0xee   : > { %v2282_v16 = vpop.f32.mrb[4].mxu1  ;;  %v900_v17 = vpop.f32.mrb[5].mxu0  ;;  %v2612_v31 = vadd.f32 %v2218_v15, %v2601_v14 }
  0xef   : > { %v1156_v18 = vpop.f32.mrb[5].mxu1  ;;  %v2219_v19 = vpop.f32.mrb[6].mxu0  ;;  %v2616_v42 = vadd.f32 %v2282_v16, %v2601_v14  ;;  %v2619_v43 = vadd.f32 %v2601_v14, %v900_v17 }
  0xf0   : > { %v2283_v24 = vpop.f32.mrb[6].mxu1  ;;  %v903_v25 = vpop.f32.mrb[7].mxu0  ;;  %v1401_v41 = vmax.f32 %v2612_v31, 0.0  ;;  %v2623_v47 = vadd.f32 %v2601_v14, %v1156_v18  ;;  %v2626_v48 = vadd.f32 %v2219_v19, %v2601_v14 }
  0xf1   : > { %v1159_v30 = vpop.f32.mrb[7].mxu1  ;;  %v2631_v53 = vadd.f32 %v2283_v24, %v2601_v14  ;;  %v904_v8 = vadd.f32 %v2601_v14, %v903_v25  ;;  %v1465_v12 = vmax.f32 %v2616_v42, 0.0  ;;  %v1399_v13 = vmax.f32 %v2619_v43, 0.0 }
  0xf2   : > { %v1463_v18 = vmax.f32 %v2623_v47, 0.0  ;;  %v1402_v19 = vmax.f32 %v2626_v48, 0.0  ;;  %v1160_v25 = vadd.f32 %v2601_v14, %v1159_v30 }
  0xf3   : > { %v1466_v24 = vmax.f32 %v2631_v53, 0.0 }
  0xf5   : > { %v2222_v40 = vpop.f32.mrb[8].mxu0 }
  0xf6   : > { %v925_v44 = vadd.f32 %v2222_v40, %v2601_v14  ;;  %v2286_v45 = vpop.f32.mrb[8].mxu1  ;;  %v916_v46 = vpop.f32.mrb[9].mxu0 }
  0xf7   : > { %v1181_v49 = vadd.f32 %v2286_v45, %v2601_v14  ;;  %v917_v50 = vadd.f32 %v2601_v14, %v916_v46  ;;  %v1172_v51 = vpop.f32.mrb[9].mxu1  ;;  %v2223_v52 = vpop.f32.mrb[10].mxu0 }
  0xf8   : > { %v1405_v54 = vmax.f32 %v925_v44, 0.0  ;;  %v1173_v55 = vadd.f32 %v2601_v14, %v1172_v51  ;;  %v928_v56 = vadd.f32 %v2223_v52, %v2601_v14  ;;  %v2287_v57 = vpop.f32.mrb[10].mxu1  ;;  %v919_v58 = vpop.f32.mrb[11].mxu0  ;;  %v1464_v51 = vmax.f32 %v1160_v25, 0.0 }
  0xf9   : > { %v1469_v59 = vmax.f32 %v1181_v49, 0.0  ;;  %v1403_v60 = vmax.f32 %v917_v50, 0.0  ;;  %v1184_v61 = vadd.f32 %v2287_v57, %v2601_v14  ;;  %v920_v62 = vadd.f32 %v2601_v14, %v919_v58  ;;  %v1175_v63 = vpop.f32.mrb[11].mxu1 }
  0xfa   : > { %v2637_v0 = vmax.f32 %v1397_v32, %v1405_v54  ;;  %v1467_v1 = vmax.f32 %v1173_v55, 0.0  ;;  %v1406_v2 = vmax.f32 %v928_v56, 0.0  ;;  %v1176_v3 = vadd.f32 %v2601_v14, %v1175_v63 }
  0xfb   : > { %v2640_v4 = vmax.f32 %v1461_v33, %v1469_v59  ;;  %v2642_v5 = vmax.f32 %v1395_v34, %v1403_v60  ;;  %v1470_v6 = vmax.f32 %v1184_v61, 0.0  ;;  %v1404_v7 = vmax.f32 %v920_v62, 0.0 }
  0xfc   : > { %v2645_v9 = vmax.f32 %v1459_v35, %v1467_v1  ;;  %v2647_v10 = vmax.f32 %v1398_v36, %v1406_v2  ;;  %v1468_v11 = vmax.f32 %v1176_v3, 0.0  ;;  %v1400_v32 = vmax.f32 %v904_v8, 0.0 }
  0xfd   : > { %v2651_v15 = vmax.f32 %v1462_v37, %v1470_v6  ;;  %v2653_v16 = vmax.f32 %v1396_v38, %v1404_v7  ;;  %v2226_v17 = vpop.f32.mrb[12].mxu0 }
  0xfe   : > { %v2657_v20 = vmax.f32 %v1460_v39, %v1468_v11  ;;  %v941_v21 = vadd.f32 %v2226_v17, %v2601_v14  ;;  %v2290_v22 = vpop.f32.mrb[12].mxu1  ;;  %v932_v23 = vpop.f32.mrb[13].mxu0 }
  0xff   : > { %v1197_v26 = vadd.f32 %v2290_v22, %v2601_v14  ;;  %v933_v27 = vadd.f32 %v2601_v14, %v932_v23  ;;  %v1188_v28 = vpop.f32.mrb[13].mxu1  ;;  %v2227_v29 = vpop.f32.mrb[14].mxu0 }
 0x100   : > { %v1409_v33 = vmax.f32 %v941_v21, 0.0  ;;  %v1189_v34 = vadd.f32 %v2601_v14, %v1188_v28  ;;  %v944_v35 = vadd.f32 %v2227_v29, %v2601_v14  ;;  %v2291_v36 = vpop.f32.mrb[14].mxu1  ;;  %v935_v37 = vpop.f32.mrb[15].mxu0 }
 0x101   : > { %v1473_v38 = vmax.f32 %v1197_v26, 0.0  ;;  %v1407_v39 = vmax.f32 %v933_v27, 0.0  ;;  %v1200_v40 = vadd.f32 %v2291_v36, %v2601_v14  ;;  %v936_v30 = vadd.f32 %v2601_v14, %v935_v37  ;;  %v1191_v42 = vpop.f32.mrb[15].mxu1 }
 0x102   : > { %v2670_v43 = vmax.f32 %v1401_v41, %v1409_v33  ;;  %v1471_v44 = vmax.f32 %v1189_v34, 0.0  ;;  %v1410_v45 = vmax.f32 %v944_v35, 0.0  ;;  %v1192_v46 = vadd.f32 %v2601_v14, %v1191_v42 }
 0x103   : > { %v2673_v47 = vmax.f32 %v1465_v12, %v1473_v38  ;;  %v2675_v48 = vmax.f32 %v1399_v13, %v1407_v39  ;;  %v1474_v49 = vmax.f32 %v1200_v40, 0.0  ;;  %v1408_v50 = vmax.f32 %v936_v30, 0.0 }
 0x104   : > { %v2677_v52 = vmax.f32 %v1463_v18, %v1471_v44  ;;  %v2679_v53 = vmax.f32 %v1402_v19, %v1410_v45  ;;  %v1472_v54 = vmax.f32 %v1192_v46, 0.0 }
 0x105   : > { %v2681_v55 = vmax.f32 %v1466_v24, %v1474_v49  ;;  %v2683_v31 = vmax.f32 %v1400_v32, %v1408_v50  ;;  %v2230_v41 = vpop.f32.mrb[16].mxu0 }
 0x106   : > { %v2685_v56 = vmax.f32 %v1464_v51, %v1472_v54  ;;  %v2294_v57 = vpop.f32.mrb[16].mxu1  ;;  %v948_v58 = vpop.f32.mrb[17].mxu0  ;;  %v957_v6 = vadd.f32 %v2230_v41, %v2601_v14 }
 0x107   : > { %v1204_v59 = vpop.f32.mrb[17].mxu1  ;;  %v2231_v60 = vpop.f32.mrb[18].mxu0  ;;  %v1213_v7 = vadd.f32 %v2294_v57, %v2601_v14  ;;  %v949_v8 = vadd.f32 %v2601_v14, %v948_v58 }
 0x108   : > { %v2295_v61 = vpop.f32.mrb[18].mxu1  ;;  %v951_v62 = vpop.f32.mrb[19].mxu0  ;;  %v1205_v13 = vadd.f32 %v2601_v14, %v1204_v59  ;;  %v960_v17 = vadd.f32 %v2231_v60, %v2601_v14  ;;  %v1413_v32 = vmax.f32 %v957_v6, 0.0 }
 0x109   : > { %v1207_v63 = vpop.f32.mrb[19].mxu1  ;;  %v2693_v18 = vadd.f32 %v2295_v61, %v2601_v14  ;;  %v952_v22 = vadd.f32 %v2601_v14, %v951_v62  ;;  %v1477_v33 = vmax.f32 %v1213_v7, 0.0  ;;  %v1411_v34 = vmax.f32 %v949_v8, 0.0 }
 0x10a   : > { %v2697_v23 = vadd.f32 %v2601_v14, %v1207_v63  ;;  %v1475_v36 = vmax.f32 %v1205_v13, 0.0  ;;  %v1414_v37 = vmax.f32 %v960_v17, 0.0 }
 0x10b   : > { %v1478_v38 = vmax.f32 %v2693_v18, 0.0  ;;  %v1412_v40 = vmax.f32 %v952_v22, 0.0 }
 0x10c   : > { %v1476_v30 = vmax.f32 %v2697_v23, 0.0 }
 0x10d   : > { %v2234_v1 = vpop.f32.mrb[20].mxu0 }
 0x10e   : > { %v2298_v2 = vpop.f32.mrb[20].mxu1  ;;  %v964_v3 = vpop.f32.mrb[21].mxu0  ;;  %v2700_v24 = vadd.f32 %v2234_v1, %v2601_v14 }
 0x10f   : > { %v1220_v11 = vpop.f32.mrb[21].mxu1  ;;  %v2235_v12 = vpop.f32.mrb[22].mxu0  ;;  %v2703_v25 = vadd.f32 %v2298_v2, %v2601_v14  ;;  %v2706_v27 = vadd.f32 %v2601_v14, %v964_v3 }
 0x110   : > { %v2299_v19 = vpop.f32.mrb[22].mxu1  ;;  %v967_v21 = vpop.f32.mrb[23].mxu0  ;;  %v2709_v28 = vadd.f32 %v2601_v14, %v1220_v11  ;;  %v2712_v29 = vadd.f32 %v2235_v12, %v2601_v14  ;;  %v1417_v42 = vmax.f32 %v2700_v24, 0.0 }
 0x111   : > { %v1223_v26 = vpop.f32.mrb[23].mxu1  ;;  %v2715_v35 = vadd.f32 %v2299_v19, %v2601_v14  ;;  %v2719_v39 = vadd.f32 %v2601_v14, %v967_v21  ;;  %v1481_v44 = vmax.f32 %v2703_v25, 0.0  ;;  %v1415_v46 = vmax.f32 %v2706_v27, 0.0 }
 0x112   : > { %v1479_v49 = vmax.f32 %v2709_v28, 0.0  ;;  %v1418_v50 = vmax.f32 %v2712_v29, 0.0  ;;  %v2730_v58 = vadd.f32 %v2601_v14, %v1223_v26 }
 0x113   : > { %v1482_v57 = vmax.f32 %v2715_v35, 0.0  ;;  %v1416_v63 = vmax.f32 %v2719_v39, 0.0 }
 0x115   : > { %v2238_v45 = vpop.f32.mrb[24].mxu0 }
 0x116   : > { %v989_v51 = vadd.f32 %v2238_v45, %v2601_v14  ;;  %v2302_v54 = vpop.f32.mrb[24].mxu1  ;;  %v980_v41 = vpop.f32.mrb[25].mxu0 }
 0x117   : > { %v1245_v59 = vadd.f32 %v2302_v54, %v2601_v14  ;;  %v981_v60 = vadd.f32 %v2601_v14, %v980_v41  ;;  %v1236_v61 = vpop.f32.mrb[25].mxu1  ;;  %v2239_v62 = vpop.f32.mrb[26].mxu0 }
 0x118   : > { %v1421_v1 = vmax.f32 %v989_v51, 0.0  ;;  %v1237_v2 = vadd.f32 %v2601_v14, %v1236_v61  ;;  %v992_v3 = vadd.f32 %v2239_v62, %v2601_v14  ;;  %v2303_v6 = vpop.f32.mrb[26].mxu1  ;;  %v983_v7 = vpop.f32.mrb[27].mxu0 }
 0x119   : > { %v1485_v8 = vmax.f32 %v1245_v59, 0.0  ;;  %v1419_v11 = vmax.f32 %v981_v60, 0.0  ;;  %v1248_v12 = vadd.f32 %v2303_v6, %v2601_v14  ;;  %v984_v13 = vadd.f32 %v2601_v14, %v983_v7  ;;  %v1239_v17 = vpop.f32.mrb[27].mxu1 }
 0x11a   : > { %v1557_v18 = vmax.f32 %v1413_v32, %v1421_v1  ;;  %v1483_v19 = vmax.f32 %v1237_v2, 0.0  ;;  %v1422_v21 = vmax.f32 %v992_v3, 0.0  ;;  %v1240_v22 = vadd.f32 %v2601_v14, %v1239_v17 }
 0x11b   : > { %v1573_v23 = vmax.f32 %v1477_v33, %v1485_v8  ;;  %v1555_v26 = vmax.f32 %v1411_v34, %v1419_v11  ;;  %v1486_v45 = vmax.f32 %v1248_v12, 0.0  ;;  %v1420_v51 = vmax.f32 %v984_v13, 0.0 }
 0x11c   : > { %v1589_v54 = vmax.f32 %v2637_v0, %v1557_v18  ;;  %v1571_v41 = vmax.f32 %v1475_v36, %v1483_v19  ;;  %v1558_v59 = vmax.f32 %v1414_v37, %v1422_v21  ;;  %v1484_v60 = vmax.f32 %v1240_v22, 0.0 }
 0x11d   : > { %v1605_v61 = vmax.f32 %v2640_v4, %v1573_v23  ;;  %v1587_v62 = vmax.f32 %v2642_v5, %v1555_v26  ;;  %v1574_v6 = vmax.f32 %v1478_v38, %v1486_v45  ;;  %v1556_v32 = vmax.f32 %v1412_v40, %v1420_v51  ;;  %v2242_v1 = vpop.f32.mrb[28].mxu0 }
 0x11e   : > { %v1603_v2 = vmax.f32 %v2645_v9, %v1571_v41  ;;  %v1590_v33 = vmax.f32 %v2647_v10, %v1558_v59  ;;  %v1572_v34 = vmax.f32 %v1476_v30, %v1484_v60  ;;  %v1005_v3 = vadd.f32 %v2242_v1, %v2601_v14  ;;  %v2306_v7 = vpop.f32.mrb[28].mxu1  ;;  %v996_v0 = vpop.f32.mrb[29].mxu0 }
 0x11f   : > { %v1606_v4 = vmax.f32 %v2651_v15, %v1574_v6  ;;  %v1588_v5 = vmax.f32 %v2653_v16, %v1556_v32  ;;  %v1261_v36 = vadd.f32 %v2306_v7, %v2601_v14  ;;  %v997_v9 = vadd.f32 %v2601_v14, %v996_v0  ;;  %v1252_v10 = vpop.f32.mrb[29].mxu1  ;;  %v2243_v37 = vpop.f32.mrb[30].mxu0 }
 0x120   : > { %v2055_v38 = vpack.c.bf16 %v1590_v33, %v1589_v54  ;;  %v1604_v40 = vmax.f32 %v2657_v20, %v1572_v34  ;;  %v1425_v30 = vmax.f32 %v1005_v3, 0.0  ;;  %v1253_v8 = vadd.f32 %v2601_v14, %v1252_v10  ;;  %v2307_v11 = vpop.f32.mrb[30].mxu1  ;;  %v999_v12 = vpop.f32.mrb[31].mxu0 }
 0x121   : > { %v2758_v13 = vpack.c.bf16 %v1606_v4, %v1605_v61  ;;  %v2050_v15 = vpack.c.bf16 %v1588_v5, %v1587_v62  ;;  %v1489_v16 = vmax.f32 %v1261_v36, 0.0  ;;  %v1423_v17 = vmax.f32 %v997_v9, 0.0  ;;  %v1255_v18 = vpop.f32.mrb[31].mxu1 }
 0x122   : > { %2127 = vst [vmem:[%s2750_s28 + $0x8] sm:$0xff] %v2055_v38   ;;  %v2761_v19 = vpack.c.bf16 %v1604_v40, %v1603_v2  ;;  %v1561_v21 = vmax.f32 %v1417_v42, %v1425_v30  ;;  %v1487_v22 = vmax.f32 %v1253_v8, 0.0  ;;  %v1008_v20 = vadd.f32 %v2243_v37, %v2601_v14 }
 0x123   : > { %2051 = vst [vmem:[%s2750_s28] sm:$0xff] %v2050_v15   ;;  %v1577_v23 = vmax.f32 %v1481_v44, %v1489_v16  ;;  %v1559_v26 = vmax.f32 %v1415_v46, %v1423_v17  ;;  %v1264_v45 = vadd.f32 %v2307_v11, %v2601_v14  ;;  %v1000_v51 = vadd.f32 %v2601_v14, %v999_v12 }
 0x124   : > { %v1593_v54 = vmax.f32 %v2670_v43, %v1561_v21  ;;  %v1575_v24 = vmax.f32 %v1479_v49, %v1487_v22  ;;  %v1426_v42 = vmax.f32 %v1008_v20, 0.0  ;;  %v1256_v41 = vadd.f32 %v2601_v14, %v1255_v18  ;;  %2135 = vst [vmem:[%s2750_s28 + $0x48] sm:$0xff] %v2758_v13   ;;  %2134 = vst [vmem:[%s2750_s28 + $0x40] sm:$0xff] %v2761_v19  }
 0x125   : > { %v1609_v59 = vmax.f32 %v2673_v47, %v1577_v23  ;;  %v1591_v25 = vmax.f32 %v2675_v48, %v1559_v26  ;;  %v1490_v44 = vmax.f32 %v1264_v45, 0.0  ;;  %v1424_v60 = vmax.f32 %v1000_v51, 0.0  ;;  %v2246_v27 = vpop.f32.mrb[32].mxu0 }
 0x126   : > { %v1480_v46 = vmax.f32 %v2730_v58, 0.0  ;;  %v1607_v61 = vmax.f32 %v2677_v52, %v1575_v24  ;;  %v1562_v43 = vmax.f32 %v1418_v50, %v1426_v42  ;;  %v1488_v62 = vmax.f32 %v1256_v41, 0.0  ;;  %v2310_v28 = vpop.f32.mrb[32].mxu1  ;;  %v1012_v49 = vpop.f32.mrb[33].mxu0 }
 0x127   : > { %v1578_v6 = vmax.f32 %v1482_v57, %v1490_v44  ;;  %v1560_v47 = vmax.f32 %v1416_v63, %v1424_v60  ;;  %v1268_v48 = vpop.f32.mrb[33].mxu1  ;;  %v2247_v32 = vpop.f32.mrb[34].mxu0  ;;  %v1013_v5 = vadd.f32 %v2601_v14, %v1012_v49 }
 0x128   : > { %v1594_v58 = vmax.f32 %v2679_v53, %v1562_v43  ;;  %v1576_v1 = vmax.f32 %v1480_v46, %v1488_v62  ;;  %v2311_v52 = vpop.f32.mrb[34].mxu1  ;;  %v1015_v2 = vpop.f32.mrb[35].mxu0  ;;  %v1024_v10 = vadd.f32 %v2247_v32, %v2601_v14 }
 0x129   : > { %v1610_v29 = vmax.f32 %v2681_v55, %v1578_v6  ;;  %v1592_v50 = vmax.f32 %v2683_v31, %v1560_v47  ;;  %v1271_v33 = vpop.f32.mrb[35].mxu1  ;;  %v1021_v55 = vadd.f32 %v2246_v27, %v2601_v14  ;;  %v1277_v31 = vadd.f32 %v2310_v28, %v2601_v14 }
 0x12a   : > { %v2065_v34 = vpack.c.bf16 %v1594_v58, %v1593_v54  ;;  %v1608_v35 = vmax.f32 %v2685_v56, %v1576_v1  ;;  %v1269_v56 = vadd.f32 %v2601_v14, %v1268_v48  ;;  %v1280_v37 = vadd.f32 %v2311_v52, %v2601_v14 }
 0x12b   : > { %v2791_v57 = vpack.c.bf16 %v1610_v29, %v1609_v59  ;;  %v2060_v39 = vpack.c.bf16 %v1592_v50, %v1591_v25  ;;  %v1016_v38 = vadd.f32 %v2601_v14, %v1015_v2  ;;  %v1272_v40 = vadd.f32 %v2601_v14, %v1271_v33 }
 0x12c   : > { %2129 = vst [vmem:[%s2750_s28 + $0x18] sm:$0xff] %v2065_v34   ;;  %v2794_v63 = vpack.c.bf16 %v1608_v35, %v1607_v61  ;;  %v1429_v11 = vmax.f32 %v1021_v55, 0.0  ;;  %v1493_v12 = vmax.f32 %v1277_v31, 0.0  ;;  %v1427_v15 = vmax.f32 %v1013_v5, 0.0 }
 0x12d   : > { %2128 = vst [vmem:[%s2750_s28 + $0x10] sm:$0xff] %v2060_v39   ;;  %v2250_v3 = vpop.f32.mrb[36].mxu0  ;;  %v1491_v16 = vmax.f32 %v1269_v56, 0.0  ;;  %v1430_v17 = vmax.f32 %v1024_v10, 0.0  ;;  %v1494_v18 = vmax.f32 %v1280_v37, 0.0  ;;  %v1428_v21 = vmax.f32 %v1016_v38, 0.0 }
 0x12e   : > { %v2314_v53 = vpop.f32.mrb[36].mxu1  ;;  %v1028_v7 = vpop.f32.mrb[37].mxu0  ;;  %v2806_v8 = vadd.f32 %v2250_v3, %v2601_v14  ;;  %v1492_v22 = vmax.f32 %v1272_v40, 0.0  ;;  %2137 = vst [vmem:[%s2750_s28 + $0x58] sm:$0xff] %v2791_v57   ;;  %2136 = vst [vmem:[%s2750_s28 + $0x50] sm:$0xff] %v2794_v63  }
 0x12f   : > { %v1284_v0 = vpop.f32.mrb[37].mxu1  ;;  %v2251_v4 = vpop.f32.mrb[38].mxu0  ;;  %v2810_v26 = vadd.f32 %v2314_v53, %v2601_v14  ;;  %v2813_v45 = vadd.f32 %v2601_v14, %v1028_v7 }
 0x130   : > { %v2315_v36 = vpop.f32.mrb[38].mxu1  ;;  %v1031_v9 = vpop.f32.mrb[39].mxu0  ;;  %v1433_v23 = vmax.f32 %v2806_v8, 0.0  ;;  %v2817_v42 = vadd.f32 %v2601_v14, %v1284_v0  ;;  %v2820_v41 = vadd.f32 %v2251_v4, %v2601_v14 }
 0x131   : > { %v1287_v30 = vpop.f32.mrb[39].mxu1  ;;  %v2825_v27 = vadd.f32 %v2315_v36, %v2601_v14  ;;  %v1032_v35 = vadd.f32 %v2601_v14, %v1031_v9  ;;  %v1497_v7 = vmax.f32 %v2810_v26, 0.0  ;;  %v1431_v0 = vmax.f32 %v2813_v45, 0.0 }
 0x132   : > { %v1495_v5 = vmax.f32 %v2817_v42, 0.0  ;;  %v1434_v56 = vmax.f32 %v2820_v41, 0.0  ;;  %v1288_v40 = vadd.f32 %v2601_v14, %v1287_v30 }
 0x133   : > { %v1498_v38 = vmax.f32 %v2825_v27, 0.0 }
 0x135   : > { %v2254_v20 = vpop.f32.mrb[40].mxu0 }
 0x136   : > { %v1053_v51 = vadd.f32 %v2254_v20, %v2601_v14  ;;  %v2318_v54 = vpop.f32.mrb[40].mxu1  ;;  %v1044_v24 = vpop.f32.mrb[41].mxu0 }
 0x137   : > { %v1309_v59 = vadd.f32 %v2318_v54, %v2601_v14  ;;  %v1045_v25 = vadd.f32 %v2601_v14, %v1044_v24  ;;  %v1300_v44 = vpop.f32.mrb[41].mxu1  ;;  %v2255_v60 = vpop.f32.mrb[42].mxu0 }
 0x138   : > { %v1437_v46 = vmax.f32 %v1053_v51, 0.0  ;;  %v1301_v61 = vadd.f32 %v2601_v14, %v1300_v44  ;;  %v1056_v43 = vadd.f32 %v2255_v60, %v2601_v14  ;;  %v2319_v62 = vpop.f32.mrb[42].mxu1  ;;  %v1047_v28 = vpop.f32.mrb[43].mxu0 }
 0x139   : > { %v1501_v49 = vmax.f32 %v1309_v59, 0.0  ;;  %v1435_v6 = vmax.f32 %v1045_v25, 0.0  ;;  %v1312_v47 = vadd.f32 %v2319_v62, %v2601_v14  ;;  %v1048_v48 = vadd.f32 %v2601_v14, %v1047_v28  ;;  %v1303_v32 = vpop.f32.mrb[43].mxu1 }
 0x13a   : > { %v2831_v58 = vmax.f32 %v1429_v11, %v1437_v46  ;;  %v1499_v1 = vmax.f32 %v1301_v61, 0.0  ;;  %v1438_v52 = vmax.f32 %v1056_v43, 0.0  ;;  %v1304_v2 = vadd.f32 %v2601_v14, %v1303_v32 }
 0x13b   : > { %v2834_v29 = vmax.f32 %v1493_v12, %v1501_v49  ;;  %v2836_v50 = vmax.f32 %v1427_v15, %v1435_v6  ;;  %v1502_v33 = vmax.f32 %v1312_v47, 0.0  ;;  %v1436_v34 = vmax.f32 %v1048_v48, 0.0 }
 0x13c   : > { %v2839_v39 = vmax.f32 %v1491_v16, %v1499_v1  ;;  %v2841_v3 = vmax.f32 %v1430_v17, %v1438_v52  ;;  %v1500_v53 = vmax.f32 %v1304_v2, 0.0  ;;  %v1432_v17 = vmax.f32 %v1032_v35, 0.0 }
 0x13d   : > { %v2845_v4 = vmax.f32 %v1494_v18, %v1502_v33  ;;  %v2847_v55 = vmax.f32 %v1428_v21, %v1436_v34  ;;  %v2258_v31 = vpop.f32.mrb[44].mxu0  ;;  %v1496_v61 = vmax.f32 %v1288_v40, 0.0 }
 0x13e   : > { %v2851_v36 = vmax.f32 %v1492_v22, %v1500_v53  ;;  %v1069_v9 = vadd.f32 %v2258_v31, %v2601_v14  ;;  %v2322_v10 = vpop.f32.mrb[44].mxu1  ;;  %v1060_v37 = vpop.f32.mrb[45].mxu0 }
 0x13f   : > { %v1325_v11 = vadd.f32 %v2322_v10, %v2601_v14  ;;  %v1061_v12 = vadd.f32 %v2601_v14, %v1060_v37  ;;  %v1316_v15 = vpop.f32.mrb[45].mxu1  ;;  %v2259_v16 = vpop.f32.mrb[46].mxu0 }
 0x140   : > { %v1441_v18 = vmax.f32 %v1069_v9, 0.0  ;;  %v1317_v21 = vadd.f32 %v2601_v14, %v1316_v15  ;;  %v1072_v22 = vadd.f32 %v2259_v16, %v2601_v14  ;;  %v2323_v20 = vpop.f32.mrb[46].mxu1  ;;  %v1063_v26 = vpop.f32.mrb[47].mxu0 }
 0x141   : > { %v1505_v45 = vmax.f32 %v1325_v11, 0.0  ;;  %v1439_v51 = vmax.f32 %v1061_v12, 0.0  ;;  %v1328_v54 = vadd.f32 %v2323_v20, %v2601_v14  ;;  %v1064_v30 = vadd.f32 %v2601_v14, %v1063_v26  ;;  %v1319_v24 = vpop.f32.mrb[47].mxu1 }
 0x142   : > { %v2864_v42 = vmax.f32 %v1433_v23, %v1441_v18  ;;  %v1503_v41 = vmax.f32 %v1317_v21, 0.0  ;;  %v1442_v59 = vmax.f32 %v1072_v22, 0.0  ;;  %v1320_v25 = vadd.f32 %v2601_v14, %v1319_v24 }
 0x143   : > { %v2867_v44 = vmax.f32 %v1497_v7, %v1505_v45  ;;  %v2869_v60 = vmax.f32 %v1431_v0, %v1439_v51  ;;  %v1506_v27 = vmax.f32 %v1328_v54, 0.0  ;;  %v1440_v46 = vmax.f32 %v1064_v30, 0.0 }
 0x144   : > { %v2871_v43 = vmax.f32 %v1495_v5, %v1503_v41  ;;  %v2873_v62 = vmax.f32 %v1434_v56, %v1442_v59  ;;  %v1504_v28 = vmax.f32 %v1320_v25, 0.0 }
 0x145   : > { %v2875_v49 = vmax.f32 %v1498_v38, %v1506_v27  ;;  %v2877_v8 = vmax.f32 %v1432_v17, %v1440_v46  ;;  %v2262_v23 = vpop.f32.mrb[48].mxu0 }
 0x146   : > { %v2879_v6 = vmax.f32 %v1496_v61, %v1504_v28  ;;  %v2326_v47 = vpop.f32.mrb[48].mxu1  ;;  %v1076_v48 = vpop.f32.mrb[49].mxu0  ;;  %v1085_v7 = vadd.f32 %v2262_v23, %v2601_v14 }
 0x147   : > { %v1332_v32 = vpop.f32.mrb[49].mxu1  ;;  %v2263_v1 = vpop.f32.mrb[50].mxu0  ;;  %v1341_v0 = vadd.f32 %v2326_v47, %v2601_v14  ;;  %v1077_v31 = vadd.f32 %v2601_v14, %v1076_v48 }
 0x148   : > { %v2327_v52 = vpop.f32.mrb[50].mxu1  ;;  %v1079_v2 = vpop.f32.mrb[51].mxu0  ;;  %v1333_v9 = vadd.f32 %v2601_v14, %v1332_v32  ;;  %v1088_v10 = vadd.f32 %v2263_v1, %v2601_v14  ;;  %v1445_v20 = vmax.f32 %v1085_v7, 0.0 }
 0x149   : > { %v1335_v33 = vpop.f32.mrb[51].mxu1  ;;  %v1344_v37 = vadd.f32 %v2327_v52, %v2601_v14  ;;  %v1080_v11 = vadd.f32 %v2601_v14, %v1079_v2  ;;  %v1509_v26 = vmax.f32 %v1341_v0, 0.0  ;;  %v1443_v45 = vmax.f32 %v1077_v31, 0.0 }
 0x14a   : > { %v2889_v12 = vadd.f32 %v2601_v14, %v1335_v33  ;;  %v1507_v54 = vmax.f32 %v1333_v9, 0.0  ;;  %v1446_v30 = vmax.f32 %v1088_v10, 0.0 }
 0x14b   : > { %v1510_v24 = vmax.f32 %v1344_v37, 0.0  ;;  %v1444_v59 = vmax.f32 %v1080_v11, 0.0 }
 0x14c   : > { %v1508_v25 = vmax.f32 %v2889_v12, 0.0 }
 0x14d   : > { %v2266_v34 = vpop.f32.mrb[52].mxu0 }
 0x14e   : > { %v2330_v35 = vpop.f32.mrb[52].mxu1  ;;  %v1092_v53 = vpop.f32.mrb[53].mxu0  ;;  %v2892_v15 = vadd.f32 %v2266_v34, %v2601_v14 }
 0x14f   : > { %v1348_v5 = vpop.f32.mrb[53].mxu1  ;;  %v2267_v56 = vpop.f32.mrb[54].mxu0  ;;  %v2895_v16 = vadd.f32 %v2330_v35, %v2601_v14  ;;  %v2898_v18 = vadd.f32 %v2601_v14, %v1092_v53 }
 0x150   : > { %v2331_v38 = vpop.f32.mrb[54].mxu1  ;;  %v1095_v40 = vpop.f32.mrb[55].mxu0  ;;  %v2901_v21 = vadd.f32 %v2601_v14, %v1348_v5  ;;  %v2904_v22 = vadd.f32 %v2267_v56, %v2601_v14  ;;  %v1449_v27 = vmax.f32 %v2892_v15, 0.0 }
 0x151   : > { %v1351_v17 = vpop.f32.mrb[55].mxu1  ;;  %v2907_v51 = vadd.f32 %v2331_v38, %v2601_v14  ;;  %v2910_v41 = vadd.f32 %v2601_v14, %v1095_v40  ;;  %v1513_v46 = vmax.f32 %v2895_v16, 0.0  ;;  %v1447_v28 = vmax.f32 %v2898_v18, 0.0 }
 0x152   : > { %v2921_v2 = vadd.f32 %v2601_v14, %v1351_v17 }
 0x155   : > { %v2270_v61 = vpop.f32.mrb[56].mxu0 }
 0x156   : > { %v1117_v48 = vadd.f32 %v2270_v61, %v2601_v14  ;;  %v2334_v32 = vpop.f32.mrb[56].mxu1  ;;  %v1108_v1 = vpop.f32.mrb[57].mxu0 }
 0x157   : > { %v1373_v33 = vadd.f32 %v2334_v32, %v2601_v14  ;;  %v1109_v34 = vadd.f32 %v2601_v14, %v1108_v1  ;;  %v1364_v35 = vpop.f32.mrb[57].mxu1  ;;  %v2271_v53 = vpop.f32.mrb[58].mxu0 }
 0x158   : > { %v1453_v0 = vmax.f32 %v1117_v48, 0.0  ;;  %v1365_v31 = vadd.f32 %v2601_v14, %v1364_v35  ;;  %v1120_v5 = vadd.f32 %v2271_v53, %v2601_v14  ;;  %v2335_v56 = vpop.f32.mrb[58].mxu1  ;;  %v1111_v9 = vpop.f32.mrb[59].mxu0 }
 0x159   : > { %v1517_v10 = vmax.f32 %v1373_v33, 0.0  ;;  %v1451_v37 = vmax.f32 %v1109_v34, 0.0  ;;  %v1376_v38 = vadd.f32 %v2335_v56, %v2601_v14  ;;  %v1112_v40 = vadd.f32 %v2601_v14, %v1111_v9  ;;  %v1367_v11 = vpop.f32.mrb[59].mxu1 }
 0x15a   : > { %v1565_v12 = vmax.f32 %v1445_v20, %v1453_v0  ;;  %v1515_v17 = vmax.f32 %v1365_v31, 0.0  ;;  %v1454_v61 = vmax.f32 %v1120_v5, 0.0  ;;  %v1368_v32 = vadd.f32 %v2601_v14, %v1367_v11 }
 0x15b   : > { %v1581_v1 = vmax.f32 %v1509_v26, %v1517_v10  ;;  %v1563_v48 = vmax.f32 %v1443_v45, %v1451_v37  ;;  %v1518_v7 = vmax.f32 %v1376_v38, 0.0  ;;  %v1452_v35 = vmax.f32 %v1112_v40, 0.0 }
 0x15c   : > { %v1597_v53 = vmax.f32 %v2831_v58, %v1565_v12  ;;  %v1579_v52 = vmax.f32 %v1507_v54, %v1515_v17  ;;  %v1566_v47 = vmax.f32 %v1446_v30, %v1454_v61  ;;  %v1516_v33 = vmax.f32 %v1368_v32, 0.0 }
 0x15d   : > { %v1613_v34 = vmax.f32 %v2834_v29, %v1581_v1  ;;  %v1595_v56 = vmax.f32 %v2836_v50, %v1563_v48  ;;  %v1582_v9 = vmax.f32 %v1510_v24, %v1518_v7  ;;  %v1564_v23 = vmax.f32 %v1444_v59, %v1452_v35  ;;  %v2274_v20 = vpop.f32.mrb[60].mxu0 }
 0x15e   : > { %v1611_v0 = vmax.f32 %v2839_v39, %v1579_v52  ;;  %v1598_v31 = vmax.f32 %v2841_v3, %v1566_v47  ;;  %v1580_v26 = vmax.f32 %v1508_v25, %v1516_v33  ;;  %v1133_v45 = vadd.f32 %v2274_v20, %v2601_v14  ;;  %v2338_v5 = vpop.f32.mrb[60].mxu1  ;;  %v1124_v10 = vpop.f32.mrb[61].mxu0 }
 0x15f   : > { %v1614_v58 = vmax.f32 %v2845_v4, %v1582_v9  ;;  %v1596_v54 = vmax.f32 %v2847_v55, %v1564_v23  ;;  %v1389_v29 = vadd.f32 %v2338_v5, %v2601_v14  ;;  %v1125_v50 = vadd.f32 %v2601_v14, %v1124_v10  ;;  %v1380_v30 = vpop.f32.mrb[61].mxu1  ;;  %v2275_v24 = vpop.f32.mrb[62].mxu0 }
 0x160   : > { %v2075_v59 = vpack.c.bf16 %v1598_v31, %v1597_v53  ;;  %v1612_v39 = vmax.f32 %v2851_v36, %v1580_v26  ;;  %v1457_v3 = vmax.f32 %v1133_v45, 0.0  ;;  %v1381_v25 = vadd.f32 %v2601_v14, %v1380_v30  ;;  %v2339_v47 = vpop.f32.mrb[62].mxu1  ;;  %v1127_v52 = vpop.f32.mrb[63].mxu0 }
 0x161   : > { %v2115_v4 = vpack.c.bf16 %v1614_v58, %v1613_v34  ;;  %v2070_v55 = vpack.c.bf16 %v1596_v54, %v1595_v56  ;;  %v1521_v23 = vmax.f32 %v1389_v29, 0.0  ;;  %v1455_v7 = vmax.f32 %v1125_v50, 0.0  ;;  %v1383_v37 = vpop.f32.mrb[63].mxu1 }
 0x162   : > { %2131 = vst [vmem:[%s2750_s28 + $0x28] sm:$0xff] %v2075_v59   ;;  %v2110_v38 = vpack.c.bf16 %v1612_v39, %v1611_v0  ;;  %v1569_v40 = vmax.f32 %v1449_v27, %v1457_v3  ;;  %v1519_v36 = vmax.f32 %v1381_v25, 0.0  ;;  %v1136_v11 = vadd.f32 %v2275_v24, %v2601_v14 }
 0x163   : > { %2130 = vst [vmem:[%s2750_s28 + $0x20] sm:$0xff] %v2070_v55   ;;  %v1585_v12 = vmax.f32 %v1513_v46, %v1521_v23  ;;  %v1567_v17 = vmax.f32 %v1447_v28, %v1455_v7  ;;  %v1392_v61 = vadd.f32 %v2339_v47, %v2601_v14  ;;  %v1128_v32 = vadd.f32 %v2601_v14, %v1127_v52 }
 0x164   : > { %2139 = vst [vmem:[%s2750_s28 + $0x68] sm:$0xff] %v2115_v4   ;;  %v1601_v15 = vmax.f32 %v2864_v42, %v1569_v40  ;;  %v2993_v27 = vmax.f32 %v2901_v21, 0.0  ;;  %v1458_v13 = vmax.f32 %v1136_v11, 0.0  ;;  %v1384_v48 = vadd.f32 %v2601_v14, %v1383_v37  ;;  %2138 = vst [vmem:[%s2750_s28 + $0x60] sm:$0xff] %v2110_v38  }
 0x165   : > { %v1617_v16 = vmax.f32 %v2867_v44, %v1585_v12  ;;  %v1599_v18 = vmax.f32 %v2869_v60, %v1567_v17  ;;  %v1522_v46 = vmax.f32 %v1392_v61, 0.0  ;;  %v1456_v28 = vmax.f32 %v1128_v32, 0.0 }
 0x166   : > { %v1583_v1 = vmax.f32 %v2993_v27, %v1519_v36  ;;  %v1512_v35 = vmax.f32 %v2921_v2, 0.0  ;;  %v2994_v42 = vmax.f32 %v2904_v22, 0.0  ;;  %v1520_v53 = vmax.f32 %v1384_v48, 0.0 }
 0x167   : > { %v2995_v14 = vmax.f32 %v2907_v51, 0.0  ;;  %v2996_v60 = vmax.f32 %v2910_v41, 0.0 }
 0x168   : > { %v1615_v19 = vmax.f32 %v2871_v43, %v1583_v1  ;;  %v1570_v21 = vmax.f32 %v2994_v42, %v1458_v13  ;;  %v1584_v2 = vmax.f32 %v1512_v35, %v1520_v53 }
 0x169   : > { %v1586_v44 = vmax.f32 %v2995_v14, %v1522_v46  ;;  %v1568_v33 = vmax.f32 %v2996_v60, %v1456_v28 }
 0x16a   : > { %v1602_v34 = vmax.f32 %v2873_v62, %v1570_v21  ;;  %v1616_v9 = vmax.f32 %v2879_v6, %v1584_v2 }
 0x16b   : > { %v1618_v56 = vmax.f32 %v2875_v49, %v1586_v44  ;;  %v1600_v43 = vmax.f32 %v2877_v8, %v1568_v33 }
 0x16c   : > { %v2085_v22 = vpack.c.bf16 %v1602_v34, %v1601_v15  ;;  %v2120_v51 = vpack.c.bf16 %v1616_v9, %v1615_v19 }
 0x16d   : > { %v2125_v20 = vpack.c.bf16 %v1618_v56, %v1617_v16  ;;  %v2080_v0 = vpack.c.bf16 %v1600_v43, %v1599_v18 }
 0x16e   : > { %2133 = vst [vmem:[%s2750_s28 + $0x38] sm:$0xff] %v2085_v22   ;;  %2140 = vst [vmem:[%s2750_s28 + $0x70] sm:$0xff] %v2120_v51  }
 0x16f   : > { %2132 = vst [vmem:[%s2750_s28 + $0x30] sm:$0xff] %v2080_v0   ;;  %2141 = vst [vmem:[%s2750_s28 + $0x78] sm:$0xff] %v2125_v20  }
 0x170 PF: > { %s13_s12 = sadd.s32 1, %s2425_s12  }
 0x171   : > { %p10_p4 = scmp.ge.s32.totalorder %s13_s12, 4  }
 0x173   :  { %12 = sbr.rel (!%p10_p4) target bundleno = 1 (0x1), region = 62 }

// kernel: convnet_forward.4
= control target key start
LH: loop header
LB: loop body
LE: loop exit
PB: predicated region body
PF: predicated region fallthrough
CT: control target
= control target key end

     0   :  { %s3740_s12 = smov 0   ;;  %s4508_s0 = inlined_call_operand.vmem [shape: bf16[8,4,16,1152], index: 0, kind: input, shape index: {}]   ;;  %s4509_s1 = inlined_call_operand.vmem [shape: bf16[1152,128], index: 1, kind: input, shape index: {}]   ;;  %s4510_s2 = inlined_call_operand.vmem [shape: f32[1,128], index: 2, kind: input, shape index: {}]   ;;  %s4511_s3 = inlined_call_operand.vmem [shape: bf16[8,16,128], index: 3, kind: output, shape index: {}]  }
   0x1 LB: > { %s2618_s13 = sadd.s32 4294967295, %s3718_s12   ;;  %p2622_p0 = scmp.ge.s32.totalorder %s3718_s12, 1  ;;  %s3718_s12 = sphi %s3740_s12, %s13_s12  }
   0x2   : > { %p139_p1 = scmp.lt.s32.totalorder %s3718_s12, 3 }
   0x4   : > { %p140_p2 = pnand %p2622_p0, %p139_p1 }
   0x5   : > { %v3432_v0 = vld [vmem:[%s4509_s1 + $0x40] sm:$0xff] (!%p140_p2)   ;;  %s2623_s16 = sshll.u32 (!%p140_p2), %s2618_s13, 2  ;;  %v3434_v2 = vld [vmem:[%s4509_s1 + $0x48] sm:$0xff] (!%p140_p2)   ;;  %v3436_v4 = vld [vmem:[%s4509_s1 + $0x50] sm:$0xff] (!%p140_p2)  }
   0x6   : > { %143 = sbr.rel (%p140_p2) target bundleno = 548 (0x224), region = 32  ;;  %v3433_v1 = vld [vmem:[%s4509_s1] sm:$0xff] (!%p140_p2)   ;;  %2887 = vmatprep.subr.bf16.mxu0 (!%p140_p2), %v3432_v0  ;;  %3407 = vmatprep.subr.bf16.mxu1 (!%p140_p2), %v3432_v0  ;;  %p166_p3 = scmp.lt.s32.totalorder (!%p140_p2), %s2623_s16, 7  ;;  %v3435_v3 = vld [vmem:[%s4509_s1 + $0x8] sm:$0xff] (!%p140_p2)   ;;  %v3437_v5 = vld [vmem:[%s4509_s1 + $0x10] sm:$0xff] (!%p140_p2)  }
   0x7   : > { %2888 = vmatpush3.bf16.msra.mxu0 (!%p140_p2), %v3433_v1  ;;  %3415 = vmatpush3.bf16.msra.mxu1 (!%p140_p2), %v3433_v1  ;;  %v3438_v6 = vld [vmem:[%s4509_s1 + $0x58] sm:$0xff] (!%p140_p2)   ;;  %v3440_v8 = vld [vmem:[%s4509_s1 + $0x60] sm:$0xff] (!%p140_p2)   ;;  %v3442_v10 = vld [vmem:[%s4509_s1 + $0x68] sm:$0xff] (!%p140_p2)  }
   0x8   : > { %2889 = vmatprep.subr.bf16.mxu0 (!%p140_p2), %v3434_v2  ;;  %3408 = vmatprep.subr.bf16.mxu1 (!%p140_p2), %v3434_v2  ;;  %v3439_v7 = vld [vmem:[%s4509_s1 + $0x18] sm:$0xff] (!%p140_p2)   ;;  %v3441_v9 = vld [vmem:[%s4509_s1 + $0x20] sm:$0xff] (!%p140_p2)   ;;  %v3443_v13 = vld [vmem:[%s4509_s1 + $0x28] sm:$0xff] (!%p140_p2)  }
   0x9   : > { %v3444_v14 = vld [vmem:[%s4509_s1 + $0x70] sm:$0xff] (!%p140_p2)   ;;  %v3446_v16 = vld [vmem:[%s4509_s1 + $0x78] sm:$0xff] (!%p140_p2)   ;;  %v3454_v18 = vld [vmem:[%s4509_s1 + $0xc0] sm:$0xff] (!%p140_p2)  }
   0xa   : > { %v3445_v15 = vld [vmem:[%s4509_s1 + $0x30] sm:$0xff] (!%p140_p2)   ;;  %v3447_v17 = vld [vmem:[%s4509_s1 + $0x38] sm:$0xff] (!%p140_p2)   ;;  %v3457_v21 = vld [vmem:[%s4509_s1 + $0x140] sm:$0xff] (!%p140_p2)  }
   0xb   : > { %2890 = vmatpush3.bf16.msra.mxu0 (!%p140_p2), %v3435_v3  ;;  %3416 = vmatpush3.bf16.msra.mxu1 (!%p140_p2), %v3435_v3  ;;  %v3455_v22 = vld [vmem:[%s4509_s1 + $0x80] sm:$0xff] (!%p140_p2)   ;;  %v3456_v23 = vld [vmem:[%s4509_s1 + $0xc8] sm:$0xff] (!%p140_p2)   ;;  %v3466_v31 = vld [vmem:[%s4509_s1 + $0xd0] sm:$0xff] (!%p140_p2)  }
   0xc   : > { %2891 = vmatprep.subr.bf16.mxu0 (!%p140_p2), %v3436_v4  ;;  %3409 = vmatprep.subr.bf16.mxu1 (!%p140_p2), %v3436_v4  ;;  %v3459_v24 = vld [vmem:[%s4509_s1 + $0x100] sm:$0xff] (!%p140_p2)   ;;  %v3458_v27 = vld [vmem:[%s4509_s1 + $0x88] sm:$0xff] (!%p140_p2)   ;;  %v3467_v32 = vld [vmem:[%s4509_s1 + $0x90] sm:$0xff] (!%p140_p2)  }
   0xd   : > { %s4513_s16 = smov (!%p166_p3, %s2623_s16), 7  ;;  %v3477_v28 = vld [vmem:[%s4509_s1 + $0x148] sm:$0xff]   ;;  %v3468_v34 = vld [vmem:[%s4509_s1 + $0xd8] sm:$0xff]   ;;  %v3476_v40 = vld [vmem:[%s4509_s1 + $0xe0] sm:$0xff]  }
   0xe   : > { %s3423_s29 = smul.u32 288, %s4513_s16  ;;  %v3479_v33 = vld [vmem:[%s4509_s1 + $0x108] sm:$0xff]   ;;  %v3469_v37 = vld [vmem:[%s4509_s1 + $0x98] sm:$0xff]   ;;  %v3478_v41 = vld [vmem:[%s4509_s1 + $0xa0] sm:$0xff]  }
   0xf   : > { %2892 = vmatpush3.bf16.msra.mxu0 %v3437_v5  ;;  %3417 = vmatpush3.bf16.msra.mxu1 %v3437_v5  ;;  %v3480_v42 = vld [vmem:[%s4509_s1 + $0xe8] sm:$0xff]   ;;  %v3491_v43 = vld [vmem:[%s4509_s1 + $0x150] sm:$0xff]   ;;  %v3490_v52 = vld [vmem:[%s4509_s1 + $0xf8] sm:$0xff]  }
  0x10   : > { %2893 = vmatprep.subr.bf16.mxu0 %v3438_v6  ;;  %3410 = vmatprep.subr.bf16.mxu1 %v3438_v6  ;;  %s3781_s9 = scalar_lea.vmem %s4508_s0, %s3423_s29  ;;  %v3493_v46 = vld [vmem:[%s4509_s1 + $0x110] sm:$0xff]   ;;  %v3481_v47 = vld [vmem:[%s4509_s1 + $0xa8] sm:$0xff]   ;;  %v3508_v55 = vld [vmem:[%s4509_s1 + $0x158] sm:$0xff]  }
  0x11   : > { %v3450_v11 = vld [vmem:[%s3781_s9 + $0x4] ss:$36 sps:$4 sm:$0xff]   ;;  %v3460_v25 = vld [vmem:[%s3781_s9 + $0x4c] ss:$36 sps:$4 sm:$0xff]   ;;  %v3470_v35 = vld [vmem:[%s3781_s9 + $0x94] ss:$36 sps:$4 sm:$0xff]  }
  0x12   : > { %v3453_v12 = vld [vmem:[%s3781_s9 + $0x364] ss:$36 sps:$4 sm:$0xff]   ;;  %1691 = vmatprep.mubr.bf16.mxu0 %v3450_v11  ;;  %v3462_v26 = vld [vmem:[%s3781_s9 + $0x3ac] ss:$36 sps:$4 sm:$0xff]   ;;  %v3472_v36 = vld [vmem:[%s3781_s9 + $0x3f4] ss:$36 sps:$4 sm:$0xff]  }
  0x13   : > { %2894 = vmatpush3.bf16.msra.mxu0 %v3439_v7  ;;  %3418 = vmatpush3.bf16.msra.mxu1 %v3439_v7  ;;  %v3448_v19 = vld [vmem:[%s3781_s9] ss:$36 sps:$4 sm:$0xff]   ;;  %v3464_v29 = vld [vmem:[%s3781_s9 + $0x48] ss:$36 sps:$4 sm:$0xff]   ;;  %v3474_v38 = vld [vmem:[%s3781_s9 + $0x90] ss:$36 sps:$4 sm:$0xff]  }
  0x14   : > { %2895 = vmatprep.subr.bf16.mxu0 %v3440_v8  ;;  %3411 = vmatprep.subr.bf16.mxu1 %v3440_v8  ;;  %v3451_v20 = vld [vmem:[%s3781_s9 + $0x360] ss:$36 sps:$4 sm:$0xff]   ;;  %v3465_v30 = vld [vmem:[%s3781_s9 + $0x3a8] ss:$36 sps:$4 sm:$0xff]   ;;  %v3475_v39 = vld [vmem:[%s3781_s9 + $0x3f0] ss:$36 sps:$4 sm:$0xff]  }
  0x15   : > { %1787 = vmatprep.mubr.bf16.mxu1 %v3453_v12  ;;  %v3482_v44 = vld [vmem:[%s3781_s9 + $0xdc] ss:$36 sps:$4 sm:$0xff]   ;;  %v3488_v48 = vld [vmem:[%s4509_s1 + $0xf0] sm:$0xff]   ;;  %v3494_v53 = vld [vmem:[%s3781_s9 + $0x124] ss:$36 sps:$4 sm:$0xff]  }
  0x16   : > { %v3484_v45 = vld [vmem:[%s3781_s9 + $0x43c] ss:$36 sps:$4 sm:$0xff]   ;;  %v3489_v51 = vld [vmem:[%s4509_s1 + $0xb0] sm:$0xff]   ;;  %v3496_v58 = vld [vmem:[%s3781_s9 + $0x8] ss:$36 sps:$4 sm:$0xff]  }
  0x17   : > { %2896 = vmatpush3.bf16.msra.mxu0 %v3441_v9  ;;  %3419 = vmatpush3.bf16.msra.mxu1 %v3441_v9  ;;  %v3486_v49 = vld [vmem:[%s3781_s9 + $0xd8] ss:$36 sps:$4 sm:$0xff]   ;;  %v3498_v54 = vld [vmem:[%s3781_s9 + $0xc] ss:$36 sps:$4 sm:$0xff]   ;;  %v3499_v59 = vld [vmem:[%s3781_s9 + $0x120] ss:$36 sps:$4 sm:$0xff]  }
  0x18   : > { %2897 = vmatprep.subr.bf16.mxu0 %v3442_v10  ;;  %3412 = vmatprep.subr.bf16.mxu1 %v3442_v10  ;;  %v3487_v50 = vld [vmem:[%s3781_s9 + $0x438] ss:$36 sps:$4 sm:$0xff]   ;;  %v3500_v60 = vld [vmem:[%s4509_s1 + $0x1c0] sm:$0xff]   ;;  %v3502_v62 = vld [vmem:[%s3781_s9 + $0x16c] ss:$36 sps:$4 sm:$0xff]  }
  0x19   : > { %v3509_v56 = vld [vmem:[%s4509_s1 + $0x118] sm:$0xff]   ;;  %v3501_v61 = vld [vmem:[%s4509_s1 + $0x180] sm:$0xff]   ;;  %v3516_v1 = vld [vmem:[%s4509_s1 + $0x1c8] sm:$0xff]  }
  0x1a   : > { %v3492_v57 = vld [vmem:[%s4509_s1 + $0xb8] sm:$0xff]   ;;  %v3518_v0 = vld [vmem:[%s4509_s1 + $0x160] sm:$0xff]   ;;  %v3517_v3 = vld [vmem:[%s4509_s1 + $0x188] sm:$0xff]  }
  0x1b   : > { %2898 = vmatpush3.bf16.msra.mxu0 %v3443_v13  ;;  %3420 = vmatpush3.bf16.msra.mxu1 %v3443_v13  ;;  %v3504_v63 = vld [vmem:[%s3781_s9 + $0x54] ss:$36 sps:$4 sm:$0xff]   ;;  %v3519_v2 = vld [vmem:[%s4509_s1 + $0x120] sm:$0xff]   ;;  %v3506_v4 = vld [vmem:[%s3781_s9 + $0x168] ss:$36 sps:$4 sm:$0xff]  }
  0x1c   : > { %2899 = vmatprep.subr.bf16.mxu0 %v3444_v14  ;;  %3413 = vmatprep.subr.bf16.mxu1 %v3444_v14  ;;  %v3507_v5 = vld [vmem:[%s3781_s9 + $0x50] ss:$36 sps:$4 sm:$0xff]   ;;  %v3512_v7 = vld [vmem:[%s3781_s9 + $0x9c] ss:$36 sps:$4 sm:$0xff]   ;;  %v3532_v8 = vld [vmem:[%s4509_s1 + $0x168] sm:$0xff]  }
  0x1d   : > { %v3510_v6 = vld [vmem:[%s3781_s9 + $0x1b4] ss:$36 sps:$4 sm:$0xff]   ;;  %v3534_v10 = vld [vmem:[%s4509_s1 + $0x128] sm:$0xff]   ;;  %v3520_v14 = vld [vmem:[%s3781_s9 + $0x1fc] ss:$36 sps:$4 sm:$0xff]  }
  0x1e   : > { %v3533_v9 = vld [vmem:[%s4509_s1 + $0x1d0] sm:$0xff]   ;;  %v3515_v13 = vld [vmem:[%s3781_s9 + $0x98] ss:$36 sps:$4 sm:$0xff]  }
  0x1f   : > { %2900 = vmatpush3.bf16.msra.mxu0 %v3445_v15  ;;  %3421 = vmatpush3.bf16.msra.mxu1 %v3445_v15  ;;  %v3535_v11 = vld [vmem:[%s4509_s1 + $0x190] sm:$0xff]  }
  0x20   : > { %2901 = vmatprep.subr.bf16.mxu0 %v3446_v16  ;;  %3414 = vmatprep.subr.bf16.mxu1 %v3446_v16  ;;  %v3514_v12 = vld [vmem:[%s3781_s9 + $0x1b0] ss:$36 sps:$4 sm:$0xff]  }
  0x21   : > { %v3542_v15 = vld [vmem:[%s4509_s1 + $0x170] sm:$0xff]  }
  0x22   : > { %v3543_v16 = vld [vmem:[%s4509_s1 + $0x130] sm:$0xff]  }
  0x23   : > { %2902 = vmatpush3.bf16.msra.mxu0 %v3447_v17  ;;  %3422 = vmatpush3.bf16.msra.mxu1 %v3447_v17  ;;  %v3522_v17 = vld [vmem:[%s3781_s9 + $0xe4] ss:$36 sps:$4 sm:$0xff]  }
  0x24   : > { %2999 = vmatprep.subr.bf16.mxu1 %v3454_v18  ;;  %3111 = vmatprep.subr.bf16.mxu0 %v3457_v21  ;;  %v3550_v18 = vld [vmem:[%s4509_s1 + $0x1d8] sm:$0xff]   ;;  %v3525_v21 = vld [vmem:[%s3781_s9 + $0xe0] ss:$36 sps:$4 sm:$0xff]  }
  0x26   : > { %1692 = vmatmul.mubr.bf16.vlgmr.msra.gmra.mrb[0].mxu0 %v3448_v19  ;;  %1788 = vmatmul.mubr.bf16.vlgmr.msra.gmra.mrb[0].mxu1 %v3451_v20  ;;  %v3551_v19 = vld [vmem:[%s4509_s1 + $0x198] sm:$0xff]  }
  0x27   : > { %3000 = vmatpush3.bf16.msra.mxu1 %v3455_v22  ;;  %3112 = vmatpush3.bf16.msra.mxu0 %v3459_v24  ;;  %v3524_v20 = vld [vmem:[%s3781_s9 + $0x1f8] ss:$36 sps:$4 sm:$0xff]   ;;  %v3526_v22 = vld [vmem:[%s3781_s9 + $0x244] ss:$36 sps:$4 sm:$0xff]  }
  0x28   : > { %3001 = vmatprep.subr.bf16.mxu1 %v3456_v23  ;;  %1699 = vmatprep.mubr.bf16.mxu0 %v3460_v25  ;;  %v3528_v23 = vld [vmem:[%s3781_s9 + $0x12c] ss:$36 sps:$4 sm:$0xff]   ;;  %v3558_v24 = vld [vmem:[%s4509_s1 + $0x178] sm:$0xff]  }
  0x29   : > { %1795 = vmatprep.mubr.bf16.mxu1 %v3462_v26  ;;  %3113 = vmatprep.subr.bf16.mxu0 %v3477_v28  ;;  %v3559_v25 = vld [vmem:[%s4509_s1 + $0x138] sm:$0xff]   ;;  %v3566_v26 = vld [vmem:[%s4509_s1 + $0x1e0] sm:$0xff]  }
  0x2a   : > { %v3567_v28 = vld [vmem:[%s4509_s1 + $0x1a0] sm:$0xff]  }
  0x2b   : > { %3002 = vmatpush3.bf16.msra.mxu1 %v3458_v27  ;;  %3114 = vmatpush3.bf16.msra.mxu0 %v3479_v33  ;;  %v3530_v27 = vld [vmem:[%s3781_s9 + $0x240] ss:$36 sps:$4 sm:$0xff]   ;;  %v3581_v33 = vld [vmem:[%s4509_s1 + $0x1e8] sm:$0xff]  }
  0x2c   : > { %3003 = vmatprep.subr.bf16.mxu1 %v3466_v31  ;;  %3115 = vmatprep.subr.bf16.mxu0 %v3491_v43  ;;  %v3536_v31 = vld [vmem:[%s3781_s9 + $0x28c] ss:$36 sps:$4 sm:$0xff]   ;;  %v3552_v43 = vld [vmem:[%s3781_s9 + $0x31c] ss:$36 sps:$4 sm:$0xff]  }
  0x2e   : > { %1700 = vmatmul.mubr.bf16.gmra.mrb[4].mxu0 %v3464_v29  ;;  %1796 = vmatmul.mubr.bf16.gmra.mrb[4].mxu1 %v3465_v30  ;;  %v3568_v29 = vld [vmem:[%s4509_s1 + $0x200] sm:$0xff]   ;;  %v3531_v30 = vld [vmem:[%s3781_s9 + $0x128] ss:$36 sps:$4 sm:$0xff]  }
  0x2f   : > { %3004 = vmatpush3.bf16.msra.mxu1 %v3467_v32  ;;  %1707 = vmatprep.mubr.bf16.mxu0 %v3470_v35  ;;  %v3538_v32 = vld [vmem:[%s3781_s9 + $0x174] ss:$36 sps:$4 sm:$0xff]   ;;  %v3582_v35 = vld [vmem:[%s4509_s1 + $0x1a8] sm:$0xff]  }
  0x30   : > { %3005 = vmatprep.subr.bf16.mxu1 %v3468_v34  ;;  %1803 = vmatprep.mubr.bf16.mxu1 %v3472_v36  ;;  %v3540_v34 = vld [vmem:[%s3781_s9 + $0x288] ss:$36 sps:$4 sm:$0xff]   ;;  %v3541_v36 = vld [vmem:[%s3781_s9 + $0x170] ss:$36 sps:$4 sm:$0xff]  }
  0x31   : > { %3116 = vmatpush3.bf16.msra.mxu0 %v3493_v46  ;;  %v3557_v46 = vld [vmem:[%s3781_s9 + $0x200] ss:$36 sps:$4 sm:$0xff]  }
  0x32   : > { %3117 = vmatprep.subr.bf16.mxu0 %v3508_v55  ;;  %v3583_v55 = vld [vmem:[%s4509_s1 + $0x208] sm:$0xff]  }
  0x33   : > { %3006 = vmatpush3.bf16.msra.mxu1 %v3469_v37  ;;  %v3544_v37 = vld [vmem:[%s3781_s9 + $0x2d4] ss:$36 sps:$4 sm:$0xff]  }
  0x34   : > { %3007 = vmatprep.subr.bf16.mxu1 %v3476_v40  ;;  %v3549_v40 = vld [vmem:[%s3781_s9 + $0x1b8] ss:$36 sps:$4 sm:$0xff]  }
  0x35   : > { %3118 = vmatpush3.bf16.msra.mxu0 %v3509_v56  ;;  %v3598_v56 = vld [vmem:[%s4509_s1 + $0x210] sm:$0xff]  }
  0x36   : > { %1708 = vmatmul.mubr.bf16.gmra.mrb[8].mxu0 %v3474_v38  ;;  %1804 = vmatmul.mubr.bf16.gmra.mrb[8].mxu1 %v3475_v39  ;;  %v3546_v38 = vld [vmem:[%s3781_s9 + $0x1bc] ss:$36 sps:$4 sm:$0xff]   ;;  %v3548_v39 = vld [vmem:[%s3781_s9 + $0x2d0] ss:$36 sps:$4 sm:$0xff]  }
  0x37   : > { %3008 = vmatpush3.bf16.msra.mxu1 %v3478_v41  ;;  %1715 = vmatprep.mubr.bf16.mxu0 %v3482_v44  ;;  %v3596_v41 = vld [vmem:[%s4509_s1 + $0x1f0] sm:$0xff]   ;;  %v3554_v44 = vld [vmem:[%s3781_s9 + $0x204] ss:$36 sps:$4 sm:$0xff]  }
  0x38   : > { %3009 = vmatprep.subr.bf16.mxu1 %v3480_v42  ;;  %1811 = vmatprep.mubr.bf16.mxu1 %v3484_v45  ;;  %v3597_v42 = vld [vmem:[%s4509_s1 + $0x1b0] sm:$0xff]   ;;  %v3556_v45 = vld [vmem:[%s3781_s9 + $0x318] ss:$36 sps:$4 sm:$0xff]  }
  0x39   : > { %3119 = vmatprep.subr.bf16.mxu0 %v3518_v0  ;;  %v3580_v0 = vld [vmem:[%s3781_s9 + $0xa0] ss:$36 sps:$4 sm:$0xff]  }
  0x3a   : > { %3120 = vmatpush3.bf16.msra.mxu0 %v3519_v2  ;;  %v3586_v2 = vld [vmem:[%s3781_s9 + $0xec] ss:$36 sps:$4 sm:$0xff]  }
  0x3b   : > { %3010 = vmatpush3.bf16.msra.mxu1 %v3481_v47  ;;  %3121 = vmatprep.subr.bf16.mxu0 %v3532_v8  ;;  %v3611_v47 = vld [vmem:[%s4509_s1 + $0x1f8] sm:$0xff]  }
  0x3c   : > { %3011 = vmatprep.subr.bf16.mxu1 %v3488_v48  ;;  %v3612_v48 = vld [vmem:[%s4509_s1 + $0x1b8] sm:$0xff]  }
  0x3d   : > { %v3592_v8 = vld [vmem:[%s3781_s9 + $0x134] ss:$36 sps:$4 sm:$0xff]  }
  0x3e   : > { %1716 = vmatmul.mubr.bf16.gmra.mrb[12].mxu0 %v3486_v49  ;;  %1812 = vmatmul.mubr.bf16.gmra.mrb[12].mxu1 %v3487_v50  ;;  %v3560_v49 = vld [vmem:[%s3781_s9 + $0x24c] ss:$36 sps:$4 sm:$0xff]   ;;  %v3564_v50 = vld [vmem:[%s3781_s9 + $0x14] ss:$36 sps:$4 sm:$0xff]  }
  0x3f   : > { %3012 = vmatpush3.bf16.msra.mxu1 %v3489_v51  ;;  %1723 = vmatprep.mubr.bf16.mxu0 %v3494_v53  ;;  %v3562_v51 = vld [vmem:[%s3781_s9 + $0x10] ss:$36 sps:$4 sm:$0xff]  }
  0x40   : > { %3013 = vmatprep.subr.bf16.mxu1 %v3490_v52  ;;  %1852 = vmatprep.mubr.bf16.mxu1 %v3498_v54  ;;  %v3565_v52 = vld [vmem:[%s3781_s9 + $0x248] ss:$36 sps:$4 sm:$0xff]   ;;  %v3569_v53 = vld [vmem:[%s3781_s9 + $0x294] ss:$36 sps:$4 sm:$0xff]   ;;  %v3571_v54 = vld [vmem:[%s3781_s9 + $0x5c] ss:$36 sps:$4 sm:$0xff]  }
  0x41   : > { %3122 = vmatpush3.bf16.msra.mxu0 %v3534_v10  ;;  %v3594_v10 = vld [vmem:[%s3781_s9 + $0x368] ss:$36 sps:$4 sm:$0xff]  }
  0x42   : > { %3123 = vmatprep.subr.bf16.mxu0 %v3542_v15  ;;  %v3604_v15 = vld [vmem:[%s3781_s9 + $0x178] ss:$36 sps:$4 sm:$0xff]  }
  0x43   : > { %3014 = vmatpush3.bf16.msra.mxu1 %v3492_v57  ;;  %v3573_v57 = vld [vmem:[%s3781_s9 + $0x290] ss:$36 sps:$4 sm:$0xff]  }
  0x44   : > { %3223 = vmatprep.subr.bf16.mxu1 %v3500_v60  ;;  %v3577_v60 = vld [vmem:[%s3781_s9 + $0xa4] ss:$36 sps:$4 sm:$0xff]  }
  0x45   : > { %3124 = vmatpush3.bf16.msra.mxu0 %v3543_v16  ;;  %v3605_v16 = vld [vmem:[%s3781_s9 + $0x3fc] ss:$36 sps:$4 sm:$0xff]  }
  0x46   : > { %1724 = vmatmul.mubr.bf16.gmra.mrb[16].mxu0 %v3499_v59  ;;  %1853 = vmatmul.mubr.bf16.vlgmr.msra.gmra.mrb[16].mxu1 %v3496_v58  ;;  %v3574_v58 = vld [vmem:[%s3781_s9 + $0x58] ss:$36 sps:$4 sm:$0xff]  }
  0x47   : > { %3224 = vmatpush3.bf16.msra.mxu1 %v3501_v61  ;;  %1731 = vmatprep.mubr.bf16.mxu0 %v3502_v62  ;;  %v3575_v59 = vld [vmem:[%s3781_s9 + $0x2dc] ss:$36 sps:$4 sm:$0xff]  }
  0x48   : > { %1860 = vmatprep.mubr.bf16.mxu1 %v3504_v63  ;;  %3225 = vmatprep.subr.bf16.mxu1 %v3516_v1  ;;  %v3613_v61 = vld [vmem:[%s4509_s1 + $0x218] sm:$0xff]   ;;  %v3626_v62 = vld [vmem:[%s4509_s1 + $0x220] sm:$0xff]  }
  0x49   : > { %3125 = vmatprep.subr.bf16.mxu0 %v3558_v24  ;;  %v3579_v63 = vld [vmem:[%s3781_s9 + $0x2d8] ss:$36 sps:$4 sm:$0xff]   ;;  %v3584_v1 = vld [vmem:[%s3781_s9 + $0x324] ss:$36 sps:$4 sm:$0xff]  }
  0x4a   : > { %3126 = vmatpush3.bf16.msra.mxu0 %v3559_v25  ;;  %v3620_v24 = vld [vmem:[%s3781_s9 + $0x254] ss:$36 sps:$4 sm:$0xff]   ;;  %v3624_v25 = vld [vmem:[%s3781_s9 + $0x1c] ss:$36 sps:$4 sm:$0xff]  }
  0x4b   : > { %3226 = vmatpush3.bf16.msra.mxu1 %v3517_v3  ;;  %3359 = vmatprep.subr.bf16.mxu0 %v3568_v29  ;;  %v3639_v3 = vld [vmem:[%s4509_s1 + $0x228] sm:$0xff]  }
  0x4c   : > { %3227 = vmatprep.subr.bf16.mxu1 %v3533_v9  ;;  %v3665_v9 = vld [vmem:[%s4509_s1 + $0x238] sm:$0xff]  }
  0x4e   : > { %1732 = vmatmul.mubr.bf16.gmra.mrb[20].mxu0 %v3506_v4  ;;  %1861 = vmatmul.mubr.bf16.gmra.mrb[20].mxu1 %v3507_v5  ;;  %v3588_v4 = vld [vmem:[%s3781_s9 + $0x320] ss:$36 sps:$4 sm:$0xff]   ;;  %v3589_v5 = vld [vmem:[%s3781_s9 + $0xe8] ss:$36 sps:$4 sm:$0xff]  }
  0x4f   : > { %1739 = vmatprep.mubr.bf16.mxu0 %v3510_v6  ;;  %1868 = vmatprep.mubr.bf16.mxu1 %v3512_v7  ;;  %v3652_v6 = vld [vmem:[%s4509_s1 + $0x230] sm:$0xff]  }
  0x50   : > { %3228 = vmatpush3.bf16.msra.mxu1 %v3535_v11  ;;  %v3590_v7 = vld [vmem:[%s3781_s9 + $0x36c] ss:$36 sps:$4 sm:$0xff]  }
  0x51   : > { %3229 = vmatprep.subr.bf16.mxu1 %v3550_v18  ;;  %v3595_v11 = vld [vmem:[%s3781_s9 + $0x130] ss:$36 sps:$4 sm:$0xff]   ;;  %v3609_v18 = vld [vmem:[%s3781_s9 + $0x3f8] ss:$36 sps:$4 sm:$0xff]  }
  0x54   : > { %3230 = vmatpush3.bf16.msra.mxu1 %v3551_v19  ;;  %v3610_v19 = vld [vmem:[%s3781_s9 + $0x1c0] ss:$36 sps:$4 sm:$0xff]  }
  0x55   : > { %3231 = vmatprep.subr.bf16.mxu1 %v3566_v26  ;;  %v3622_v26 = vld [vmem:[%s3781_s9 + $0x18] ss:$36 sps:$4 sm:$0xff]  }
  0x56   : > { %1740 = vmatmul.mubr.bf16.gmra.mrb[24].mxu0 %v3514_v12  ;;  %1869 = vmatmul.mubr.bf16.gmra.mrb[24].mxu1 %v3515_v13  ;;  %v3599_v12 = vld [vmem:[%s3781_s9 + $0x3b4] ss:$36 sps:$4 sm:$0xff]   ;;  %v3601_v13 = vld [vmem:[%s3781_s9 + $0x17c] ss:$36 sps:$4 sm:$0xff]  }
  0x57   : > { %1747 = vmatprep.mubr.bf16.mxu0 %v3520_v14  ;;  %1876 = vmatprep.mubr.bf16.mxu1 %v3522_v17  ;;  %v3603_v14 = vld [vmem:[%s3781_s9 + $0x3b0] ss:$36 sps:$4 sm:$0xff]   ;;  %v3607_v17 = vld [vmem:[%s3781_s9 + $0x1c4] ss:$36 sps:$4 sm:$0xff]  }
  0x58   : > { %3232 = vmatpush3.bf16.msra.mxu1 %v3567_v28  ;;  %v3627_v28 = vld [vmem:[%s3781_s9 + $0x29c] ss:$36 sps:$4 sm:$0xff]  }
  0x59   : > { %3233 = vmatprep.subr.bf16.mxu1 %v3581_v33  ;;  %v3635_v33 = vld [vmem:[%s3781_s9 + $0xac] ss:$36 sps:$4 sm:$0xff]  }
  0x5c   : > { %3234 = vmatpush3.bf16.msra.mxu1 %v3582_v35  ;;  %v3638_v35 = vld [vmem:[%s3781_s9 + $0xa8] ss:$36 sps:$4 sm:$0xff]  }
  0x5d   : > { %3235 = vmatprep.subr.bf16.mxu1 %v3596_v41  ;;  %v3648_v41 = vld [vmem:[%s3781_s9 + $0x13c] ss:$36 sps:$4 sm:$0xff]  }
  0x5e   : > { %1748 = vmatmul.mubr.bf16.gmra.mrb[28].mxu0 %v3524_v20  ;;  %1877 = vmatmul.mubr.bf16.gmra.mrb[28].mxu1 %v3525_v21  ;;  %v3614_v20 = vld [vmem:[%s3781_s9 + $0x444] ss:$36 sps:$4 sm:$0xff]   ;;  %v3616_v21 = vld [vmem:[%s3781_s9 + $0x20c] ss:$36 sps:$4 sm:$0xff]  }
  0x5f   : > { %1755 = vmatprep.mubr.bf16.mxu0 %v3526_v22  ;;  %1884 = vmatprep.mubr.bf16.mxu1 %v3528_v23  ;;  %v3618_v22 = vld [vmem:[%s3781_s9 + $0x440] ss:$36 sps:$4 sm:$0xff]   ;;  %v3619_v23 = vld [vmem:[%s3781_s9 + $0x208] ss:$36 sps:$4 sm:$0xff]  }
  0x60   : > { %3236 = vmatpush3.bf16.msra.mxu1 %v3597_v42  ;;  %v3650_v42 = vld [vmem:[%s3781_s9 + $0x370] ss:$36 sps:$4 sm:$0xff]  }
  0x61   : > { %3237 = vmatprep.subr.bf16.mxu1 %v3611_v47  ;;  %v3658_v47 = vld [vmem:[%s3781_s9 + $0x180] ss:$36 sps:$4 sm:$0xff]  }
  0x64   : > { %3238 = vmatpush3.bf16.msra.mxu1 %v3612_v48  ;;  %v3659_v48 = vld [vmem:[%s3781_s9 + $0x404] ss:$36 sps:$4 sm:$0xff]  }
  0x66   : > { %1756 = vmatmul.mubr.bf16.gmra.mrb[32].mxu0 %v3530_v27  ;;  %1885 = vmatmul.mubr.bf16.gmra.mrb[32].mxu1 %v3531_v30  ;;  %v3625_v27 = vld [vmem:[%s3781_s9 + $0x250] ss:$36 sps:$4 sm:$0xff]   ;;  %v3631_v30 = vld [vmem:[%s3781_s9 + $0x298] ss:$36 sps:$4 sm:$0xff]  }
  0x67   : > { %1763 = vmatprep.mubr.bf16.mxu0 %v3536_v31  ;;  %1892 = vmatprep.mubr.bf16.mxu1 %v3538_v32  ;;  %v3632_v31 = vld [vmem:[%s3781_s9 + $0x60] ss:$36 sps:$4 sm:$0xff]  }
  0x68   : > { %v3633_v32 = vld [vmem:[%s3781_s9 + $0x2e4] ss:$36 sps:$4 sm:$0xff]  }
  0x6e   : > { %1764 = vmatmul.mubr.bf16.gmra.mrb[36].mxu0 %v3540_v34  ;;  %1893 = vmatmul.mubr.bf16.gmra.mrb[36].mxu1 %v3541_v36  ;;  %v3637_v34 = vld [vmem:[%s3781_s9 + $0x2e0] ss:$36 sps:$4 sm:$0xff]   ;;  %v3640_v36 = vld [vmem:[%s3781_s9 + $0x32c] ss:$36 sps:$4 sm:$0xff]  }
  0x6f   : > { %1771 = vmatprep.mubr.bf16.mxu0 %v3544_v37  ;;  %1900 = vmatprep.mubr.bf16.mxu1 %v3546_v38  ;;  %v3642_v37 = vld [vmem:[%s3781_s9 + $0xf4] ss:$36 sps:$4 sm:$0xff]   ;;  %v3644_v38 = vld [vmem:[%s3781_s9 + $0x328] ss:$36 sps:$4 sm:$0xff]  }
  0x76   : > { %1772 = vmatmul.mubr.bf16.gmra.mrb[40].mxu0 %v3548_v39  ;;  %1901 = vmatmul.mubr.bf16.gmra.mrb[40].mxu1 %v3549_v40  ;;  %v3645_v39 = vld [vmem:[%s3781_s9 + $0xf0] ss:$36 sps:$4 sm:$0xff]  }
  0x77   : > { %1779 = vmatprep.mubr.bf16.mxu0 %v3552_v43  ;;  %1908 = vmatprep.mubr.bf16.mxu1 %v3554_v44  ;;  %v3646_v40 = vld [vmem:[%s3781_s9 + $0x374] ss:$36 sps:$4 sm:$0xff]   ;;  %v3653_v44 = vld [vmem:[%s3781_s9 + $0x3bc] ss:$36 sps:$4 sm:$0xff]  }
  0x78   : > { %v3651_v43 = vld [vmem:[%s3781_s9 + $0x138] ss:$36 sps:$4 sm:$0xff]  }
  0x7e   : > { %1780 = vmatmul.mubr.bf16.gmra.mrb[44].mxu0 %v3556_v45  ;;  %1909 = vmatmul.mubr.bf16.gmra.mrb[44].mxu1 %v3557_v46  ;;  %v3655_v45 = vld [vmem:[%s3781_s9 + $0x184] ss:$36 sps:$4 sm:$0xff]   ;;  %v3657_v46 = vld [vmem:[%s3781_s9 + $0x3b8] ss:$36 sps:$4 sm:$0xff]  }
  0x7f   : > { %1916 = vmatprep.mubr.bf16.mxu1 %v3560_v49  ;;  %2013 = vmatprep.mubr.bf16.mxu0 %v3564_v50  ;;  %v3661_v49 = vld [vmem:[%s3781_s9 + $0x1cc] ss:$36 sps:$4 sm:$0xff]   ;;  %v3663_v50 = vld [vmem:[%s3781_s9 + $0x400] ss:$36 sps:$4 sm:$0xff]  }
  0x86   : > { %1917 = vmatmul.mubr.bf16.gmra.mrb[48].mxu1 %v3565_v52  ;;  %2014 = vmatmul.mubr.bf16.vlgmr.msra.gmra.mrb[48].mxu0 %v3562_v51  ;;  %v3664_v51 = vld [vmem:[%s3781_s9 + $0x1c8] ss:$36 sps:$4 sm:$0xff]  }
  0x87   : > { %3360 = vmatpush3.bf16.msra.mxu0 %v3568_v29  ;;  %1924 = vmatprep.mubr.bf16.mxu1 %v3569_v53  ;;  %v3629_v29 = vld [vmem:[%s3781_s9 + $0x64] ss:$36 sps:$4 sm:$0xff]   ;;  %v3666_v52 = vld [vmem:[%s3781_s9 + $0x44c] ss:$36 sps:$4 sm:$0xff]   ;;  %v3668_v53 = vld [vmem:[%s3781_s9 + $0x214] ss:$36 sps:$4 sm:$0xff]  }
  0x88   : > { %2021 = vmatprep.mubr.bf16.mxu0 %v3571_v54  ;;  %3361 = vmatprep.subr.bf16.mxu0 %v3583_v55 }
  0x8b   : > { %3362 = vmatpush3.bf16.msra.mxu0 %v3583_v55 }
  0x8c   : > { %3363 = vmatprep.subr.bf16.mxu0 %v3598_v56 }
  0x8e   : > { %1925 = vmatmul.mubr.bf16.gmra.mrb[52].mxu1 %v3573_v57  ;;  %2022 = vmatmul.mubr.bf16.gmra.mrb[52].mxu0 %v3574_v58  ;;  %v3670_v58 = vld [vmem:[%s3781_s9 + $0x448] ss:$36 sps:$4 sm:$0xff]  }
  0x8f   : > { %1932 = vmatprep.mubr.bf16.mxu1 %v3575_v59  ;;  %2029 = vmatprep.mubr.bf16.mxu0 %v3577_v60  ;;  %v3671_v59 = vld [vmem:[%s3781_s9 + $0x210] ss:$36 sps:$4 sm:$0xff]  }
  0x90   : > { %3364 = vmatpush3.bf16.msra.mxu0 %v3598_v56 }
  0x91   : > { %3365 = vmatprep.subr.bf16.mxu0 %v3613_v61 }
  0x94   : > { %3366 = vmatpush3.bf16.msra.mxu0 %v3613_v61 }
  0x95   : > { %3367 = vmatprep.subr.bf16.mxu0 %v3626_v62 }
  0x96   : > { %1933 = vmatmul.mubr.bf16.gmra.mrb[56].mxu1 %v3579_v63  ;;  %2030 = vmatmul.mubr.bf16.gmra.mrb[56].mxu0 %v3580_v0  ;;  %v3672_v0 = vld [vmem:[%s3781_s9 + $0x25c] ss:$36 sps:$4 sm:$0xff]  }
  0x97   : > { %1940 = vmatprep.mubr.bf16.mxu1 %v3584_v1  ;;  %2037 = vmatprep.mubr.bf16.mxu0 %v3586_v2  ;;  %v3674_v1 = vld [vmem:[%s3781_s9 + $0x20] ss:$36 sps:$4 sm:$0xff]  }
  0x98   : > { %3368 = vmatpush3.bf16.msra.mxu0 %v3626_v62 }
  0x99   : > { %3369 = vmatprep.subr.bf16.mxu0 %v3639_v3 }
  0x9c   : > { %3370 = vmatpush3.bf16.msra.mxu0 %v3639_v3 }
  0x9d   : > { %3371 = vmatprep.subr.bf16.mxu0 %v3652_v6 }
  0x9e   : > { %1941 = vmatmul.mubr.bf16.gmra.mrb[60].mxu1 %v3588_v4  ;;  %2038 = vmatmul.mubr.bf16.gmra.mrb[60].mxu0 %v3589_v5 }
  0x9f   : > { %1948 = vmatprep.mubr.bf16.mxu1 %v3590_v7  ;;  %2045 = vmatprep.mubr.bf16.mxu0 %v3592_v8 }
  0xa0   : > { %3372 = vmatpush3.bf16.msra.mxu0 %v3652_v6 }
  0xa1   : > { %3373 = vmatprep.subr.bf16.mxu0 %v3665_v9 }
  0xa4   : > { %3374 = vmatpush3.bf16.msra.mxu0 %v3665_v9 }
  0xa6   : > { %1949 = vmatmul.mubr.bf16.gmra.mrb[64].mxu1 %v3594_v10  ;;  %2046 = vmatmul.mubr.bf16.gmra.mrb[64].mxu0 %v3595_v11  ;;  %v3675_v10 = vld [vmem:[%s3781_s9 + $0x258] ss:$36 sps:$4 sm:$0xff]   ;;  %v3676_v11 = vld [vmem:[%s3781_s9 + $0x68] ss:$36 sps:$4 sm:$0xff]  }
  0xa7   : > { %1956 = vmatprep.mubr.bf16.mxu1 %v3599_v12  ;;  %2053 = vmatprep.mubr.bf16.mxu0 %v3601_v13 }
  0xae   : > { %1957 = vmatmul.mubr.bf16.gmra.mrb[68].mxu1 %v3603_v14  ;;  %2054 = vmatmul.mubr.bf16.gmra.mrb[68].mxu0 %v3604_v15 }
  0xaf   : > { %1964 = vmatprep.mubr.bf16.mxu1 %v3605_v16  ;;  %2061 = vmatprep.mubr.bf16.mxu0 %v3607_v17  ;;  %v3677_v16 = vld [vmem:[%s3781_s9 + $0x2a4] ss:$36 sps:$4 sm:$0xff]   ;;  %v3679_v17 = vld [vmem:[%s3781_s9 + $0xb0] ss:$36 sps:$4 sm:$0xff]  }
  0xb6   : > { %1965 = vmatmul.mubr.bf16.gmra.mrb[72].mxu1 %v3609_v18  ;;  %2062 = vmatmul.mubr.bf16.gmra.mrb[72].mxu0 %v3610_v19 }
  0xb7   : > { %1972 = vmatprep.mubr.bf16.mxu1 %v3614_v20  ;;  %2069 = vmatprep.mubr.bf16.mxu0 %v3616_v21 }
  0xbe   : > { %1973 = vmatmul.mubr.bf16.gmra.mrb[76].mxu1 %v3618_v22  ;;  %2070 = vmatmul.mubr.bf16.gmra.mrb[76].mxu0 %v3619_v23 }
  0xbf   : > { %2077 = vmatprep.mubr.bf16.mxu0 %v3620_v24  ;;  %2174 = vmatprep.mubr.bf16.mxu1 %v3624_v25 }
  0xc6   : > { %2078 = vmatmul.mubr.bf16.gmra.mrb[80].mxu0 %v3625_v27  ;;  %2175 = vmatmul.mubr.bf16.vlgmr.msra.gmra.mrb[80].mxu1 %v3622_v26  ;;  %v3680_v26 = vld [vmem:[%s3781_s9 + $0x2a0] ss:$36 sps:$4 sm:$0xff]   ;;  %v3681_v27 = vld [vmem:[%s3781_s9 + $0xf8] ss:$36 sps:$4 sm:$0xff]  }
  0xc7   : > { %2085 = vmatprep.mubr.bf16.mxu0 %v3627_v28  ;;  %2182 = vmatprep.mubr.bf16.mxu1 %v3629_v29 }
  0xce   : > { %2086 = vmatmul.mubr.bf16.gmra.mrb[84].mxu0 %v3631_v30  ;;  %2183 = vmatmul.mubr.bf16.gmra.mrb[84].mxu1 %v3632_v31 }
  0xcf   : > { %2093 = vmatprep.mubr.bf16.mxu0 %v3633_v32  ;;  %2190 = vmatprep.mubr.bf16.mxu1 %v3635_v33  ;;  %v3682_v32 = vld [vmem:[%s3781_s9 + $0x2ec] ss:$36 sps:$4 sm:$0xff]   ;;  %v3684_v33 = vld [vmem:[%s3781_s9 + $0x140] ss:$36 sps:$4 sm:$0xff]  }
  0xd6   : > { %2094 = vmatmul.mubr.bf16.gmra.mrb[88].mxu0 %v3637_v34  ;;  %2191 = vmatmul.mubr.bf16.gmra.mrb[88].mxu1 %v3638_v35 }
  0xd7   : > { %2101 = vmatprep.mubr.bf16.mxu0 %v3640_v36  ;;  %2198 = vmatprep.mubr.bf16.mxu1 %v3642_v37 }
  0xde   : > { %2102 = vmatmul.mubr.bf16.gmra.mrb[92].mxu0 %v3644_v38  ;;  %2199 = vmatmul.mubr.bf16.gmra.mrb[92].mxu1 %v3645_v39 }
  0xdf   : > { %2109 = vmatprep.mubr.bf16.mxu0 %v3646_v40  ;;  %2206 = vmatprep.mubr.bf16.mxu1 %v3648_v41 }
  0xe6   : > { %2110 = vmatmul.mubr.bf16.gmra.mrb[96].mxu0 %v3650_v42  ;;  %2207 = vmatmul.mubr.bf16.gmra.mrb[96].mxu1 %v3651_v43  ;;  %v3685_v42 = vld [vmem:[%s3781_s9 + $0x2e8] ss:$36 sps:$4 sm:$0xff]  }
  0xe7   : > { %2117 = vmatprep.mubr.bf16.mxu0 %v3653_v44  ;;  %2214 = vmatprep.mubr.bf16.mxu1 %v3655_v45  ;;  %v3686_v43 = vld [vmem:[%s3781_s9 + $0x188] ss:$36 sps:$4 sm:$0xff]  }
  0xee   : > { %2118 = vmatmul.mubr.bf16.gmra.mrb[100].mxu0 %v3657_v46  ;;  %2215 = vmatmul.mubr.bf16.gmra.mrb[100].mxu1 %v3658_v47 }
  0xef   : > { %2125 = vmatprep.mubr.bf16.mxu0 %v3659_v48  ;;  %2222 = vmatprep.mubr.bf16.mxu1 %v3661_v49  ;;  %v3687_v48 = vld [vmem:[%s3781_s9 + $0x334] ss:$36 sps:$4 sm:$0xff]  }
  0xf0   : > { %v3689_v49 = vld [vmem:[%s3781_s9 + $0x1d0] ss:$36 sps:$4 sm:$0xff]  }
  0xf6   : > { %2126 = vmatmul.mubr.bf16.gmra.mrb[104].mxu0 %v3663_v50  ;;  %2223 = vmatmul.mubr.bf16.gmra.mrb[104].mxu1 %v3664_v51 }
  0xf7   : > { %2133 = vmatprep.mubr.bf16.mxu0 %v3666_v52  ;;  %2230 = vmatprep.mubr.bf16.mxu1 %v3668_v53 }
  0xf9   : > { %v2975_v54 = vpop.f32.mrb[0].mxu1  ;;  %v2903_v55 = vpop.f32.mrb[0].mxu0 }
  0xfa   : > { %v2976_v56 = vpop.f32.mrb[1].mxu1  ;;  %v2904_v57 = vpop.f32.mrb[1].mxu0 }
  0xfb   : > { %v4084_v60 = vadd.f32 %v2976_v56, %v2975_v54  ;;  %v2978_v61 = vpop.f32.mrb[2].mxu1  ;;  %v4086_v62 = vadd.f32 %v2904_v57, %v2903_v55  ;;  %v2906_v63 = vpop.f32.mrb[2].mxu0  ;;  %v4133_v54 = vld [vmem:[%s4510_s2] ss:$0 sm:$0xff] }
  0xfc   : > { %v2979_v2 = vpop.f32.mrb[3].mxu1  ;;  %v2907_v3 = vpop.f32.mrb[3].mxu0 }
  0xfd   : > { %v4090_v4 = vadd.f32 %v2979_v2, %v2978_v61  ;;  %v4092_v5 = vadd.f32 %v2907_v3, %v2906_v63  ;;  %v3691_v61 = vld [vmem:[%s3781_s9 + $0x218] ss:$36 sps:$4 sm:$0xff]   ;;  %v1694_v63 = vadd.f32 %v4086_v62, %v4133_v54 }
  0xfe   : > { %2134 = vmatmul.mubr.bf16.gmra.mrb[108].mxu0 %v3670_v58  ;;  %2231 = vmatmul.mubr.bf16.gmra.mrb[108].mxu1 %v3671_v59  ;;  %v3690_v59 = vld [vmem:[%s3781_s9 + $0x330] ss:$36 sps:$4 sm:$0xff]  }
  0xff   : > { %2238 = vmatprep.mubr.bf16.mxu1 %v3672_v0  ;;  %3375 = vmatprep.mubr.bf16.mxu0 %v3674_v1 }
 0x101   : > { %v2981_v6 = vpop.f32.mrb[4].mxu1  ;;  %v2909_v7 = vpop.f32.mrb[4].mxu0 }
 0x102   : > { %v2982_v8 = vpop.f32.mrb[5].mxu1  ;;  %v2910_v9 = vpop.f32.mrb[5].mxu0 }
 0x103   : > { %v4096_v12 = vadd.f32 %v2982_v8, %v2981_v6  ;;  %v2984_v13 = vpop.f32.mrb[6].mxu1  ;;  %v4098_v14 = vadd.f32 %v2910_v9, %v2909_v7  ;;  %v2912_v15 = vpop.f32.mrb[6].mxu0  ;;  %v3692_v6 = vld [vmem:[%s3781_s9 + $0x37c] ss:$36 sps:$4 sm:$0xff]  }
 0x104   : > { %v2985_v18 = vpop.f32.mrb[7].mxu1  ;;  %v2913_v19 = vpop.f32.mrb[7].mxu0  ;;  %v3694_v7 = vld [vmem:[%s3781_s9 + $0x260] ss:$36 sps:$4 sm:$0xff]  }
 0x105   : > { %v4102_v20 = vadd.f32 %v2985_v18, %v2984_v13  ;;  %v4104_v21 = vadd.f32 %v2913_v19, %v2912_v15 }
 0x106   : > { %2239 = vmatmul.mubr.bf16.gmra.mrb[112].mxu1 %v3675_v10  ;;  %3376 = vmatmul.mubr.bf16.vlgmr.msra.gmra.mrb[112].mxu0 %v3676_v11  ;;  %v1697_v10 = vadd.f32 %v4092_v5, %v4133_v54  ;;  %v1702_v5 = vadd.f32 %v4098_v14, %v4133_v54 }
 0x107   : > { %2246 = vmatprep.mubr.bf16.mxu1 %v3677_v16  ;;  %3379 = vmatprep.mubr.bf16.mxu0 %v3679_v17 }
 0x109   : > { %v2987_v22 = vpop.f32.mrb[8].mxu1  ;;  %v2915_v23 = vpop.f32.mrb[8].mxu0 }
 0x10a   : > { %v2988_v24 = vpop.f32.mrb[9].mxu1  ;;  %v2916_v25 = vpop.f32.mrb[9].mxu0 }
 0x10b   : > { %v4108_v28 = vadd.f32 %v2988_v24, %v2987_v22  ;;  %v2990_v29 = vpop.f32.mrb[10].mxu1  ;;  %v4110_v30 = vadd.f32 %v2916_v25, %v2915_v23  ;;  %v2918_v31 = vpop.f32.mrb[10].mxu0  ;;  %v3695_v22 = vld [vmem:[%s3781_s9 + $0x378] ss:$36 sps:$4 sm:$0xff]   ;;  %v3696_v23 = vld [vmem:[%s3781_s9 + $0x2a8] ss:$36 sps:$4 sm:$0xff]  }
 0x10c   : > { %v2991_v34 = vpop.f32.mrb[11].mxu1  ;;  %v2919_v35 = vpop.f32.mrb[11].mxu0 }
 0x10d   : > { %v4114_v36 = vadd.f32 %v2991_v34, %v2990_v29  ;;  %v4116_v37 = vadd.f32 %v2919_v35, %v2918_v31  ;;  %v3697_v29 = vld [vmem:[%s3781_s9 + $0x3c4] ss:$36 sps:$4 sm:$0xff]   ;;  %v3699_v31 = vld [vmem:[%s3781_s9 + $0x2f0] ss:$36 sps:$4 sm:$0xff]   ;;  %v1705_v34 = vadd.f32 %v4104_v21, %v4133_v54  ;;  %v1710_v21 = vadd.f32 %v4110_v30, %v4133_v54 }
 0x10e   : > { %2247 = vmatmul.mubr.bf16.gmra.mrb[116].mxu1 %v3680_v26  ;;  %3380 = vmatmul.mubr.bf16.gmra.mrb[116].mxu0 %v3681_v27 }
 0x10f   : > { %2254 = vmatprep.mubr.bf16.mxu1 %v3682_v32  ;;  %3383 = vmatprep.mubr.bf16.mxu0 %v3684_v33 }
 0x111   : > { %v2993_v38 = vpop.f32.mrb[12].mxu1  ;;  %v2921_v39 = vpop.f32.mrb[12].mxu0 }
 0x112   : > { %v2994_v40 = vpop.f32.mrb[13].mxu1  ;;  %v2922_v41 = vpop.f32.mrb[13].mxu0 }
 0x113   : > { %v4120_v44 = vadd.f32 %v2994_v40, %v2993_v38  ;;  %v2996_v45 = vpop.f32.mrb[14].mxu1  ;;  %v4122_v46 = vadd.f32 %v2922_v41, %v2921_v39  ;;  %v2924_v47 = vpop.f32.mrb[14].mxu0 }
 0x114   : > { %v2997_v50 = vpop.f32.mrb[15].mxu1  ;;  %v2925_v51 = vpop.f32.mrb[15].mxu0 }
 0x115   : > { %v4126_v52 = vadd.f32 %v2997_v50, %v2996_v45  ;;  %v4128_v53 = vadd.f32 %v2925_v51, %v2924_v47  ;;  %v3700_v45 = vld [vmem:[%s3781_s9 + $0x3c0] ss:$36 sps:$4 sm:$0xff]   ;;  %v3701_v47 = vld [vmem:[%s3781_s9 + $0x338] ss:$36 sps:$4 sm:$0xff]  }
 0x116   : > { %2255 = vmatmul.mubr.bf16.gmra.mrb[120].mxu1 %v3685_v42  ;;  %3384 = vmatmul.mubr.bf16.gmra.mrb[120].mxu0 %v3686_v43 }
 0x117   : > { %2262 = vmatprep.mubr.bf16.mxu1 %v3687_v48  ;;  %3387 = vmatprep.mubr.bf16.mxu0 %v3689_v49 }
 0x119   : > { %v3015_v55 = vpop.f32.mrb[16].mxu1  ;;  %v2927_v56 = vpop.f32.mrb[16].mxu0 }
 0x11a   : > { %v3016_v57 = vpop.f32.mrb[17].mxu1  ;;  %v2928_v58 = vpop.f32.mrb[17].mxu0 }
 0x11b   : > { %v3017_v0 = vadd.f32 %v3016_v57, %v3015_v55  ;;  %v3018_v1 = vpop.f32.mrb[18].mxu1  ;;  %v4139_v2 = vadd.f32 %v2928_v58, %v2927_v56  ;;  %v2930_v3 = vpop.f32.mrb[18].mxu0  ;;  %v3702_v55 = vld [vmem:[%s3781_s9 + $0x40c] ss:$36 sps:$4 sm:$0xff]   ;;  %v3704_v56 = vld [vmem:[%s3781_s9 + $0x380] ss:$36 sps:$4 sm:$0xff]  }
 0x11c   : > { %v3019_v8 = vpop.f32.mrb[19].mxu1  ;;  %v2931_v9 = vpop.f32.mrb[19].mxu0 }
 0x11d   : > { %v4145_v11 = vadd.f32 %v3017_v0, %v1694_v63  ;;  %v3020_v13 = vadd.f32 %v3019_v8, %v3018_v1  ;;  %v4147_v15 = vadd.f32 %v2931_v9, %v2930_v3  ;;  %v3705_v8 = vld [vmem:[%s3781_s9 + $0x408] ss:$36 sps:$4 sm:$0xff]  }
 0x11e   : > { %2263 = vmatmul.mubr.bf16.gmra.mrb[124].mxu1 %v3690_v59  ;;  %3388 = vmatmul.mubr.bf16.gmra.mrb[124].mxu0 %v3691_v61  ;;  %v1713_v59 = vadd.f32 %v4116_v37, %v4133_v54  ;;  %v3706_v9 = vld [vmem:[%s3781_s9 + $0x3c8] ss:$36 sps:$4 sm:$0xff]   ;;  %v1718_v37 = vadd.f32 %v4122_v46, %v4133_v54 }
 0x11f   : > { %v4149_v62 = vadd.f32 %v3020_v13, %v1697_v10  ;;  %2270 = vmatprep.mubr.bf16.mxu1 %v3692_v6  ;;  %3391 = vmatprep.mubr.bf16.mxu0 %v3694_v7 }
 0x121   : > { %v3021_v16 = vpop.f32.mrb[20].mxu1  ;;  %v2933_v17 = vpop.f32.mrb[20].mxu0 }
 0x122   : > { %v3022_v18 = vpop.f32.mrb[21].mxu1  ;;  %v2934_v19 = vpop.f32.mrb[21].mxu0 }
 0x123   : > { %v3023_v24 = vadd.f32 %v3022_v18, %v3021_v16  ;;  %v3024_v25 = vpop.f32.mrb[22].mxu1  ;;  %v4155_v26 = vadd.f32 %v2934_v19, %v2933_v17  ;;  %v2936_v27 = vpop.f32.mrb[22].mxu0  ;;  %v3707_v18 = vld [vmem:[%s3781_s9 + $0x454] ss:$36 sps:$4 sm:$0xff]  }
 0x124   : > { %v3025_v32 = vpop.f32.mrb[23].mxu1  ;;  %v2937_v33 = vpop.f32.mrb[23].mxu0  ;;  %v3709_v19 = vld [vmem:[%s3781_s9 + $0x410] ss:$36 sps:$4 sm:$0xff]  }
 0x125   : > { %v4161_v35 = vadd.f32 %v3023_v24, %v1702_v5  ;;  %v3026_v38 = vadd.f32 %v3025_v32, %v3024_v25  ;;  %v4163_v39 = vadd.f32 %v2937_v33, %v2936_v27  ;;  %v1721_v5 = vadd.f32 %v4128_v53, %v4133_v54 }
 0x126   : > { %2271 = vmatmul.mubr.bf16.gmra.mrb[128].mxu1 %v3695_v22  ;;  %3392 = vmatmul.mubr.bf16.gmra.mrb[128].mxu0 %v3696_v23  ;;  %v1726_v53 = vadd.f32 %v4139_v2, %v4133_v54 }
 0x127   : > { %v4165_v14 = vadd.f32 %v3026_v38, %v1705_v34  ;;  %2278 = vmatprep.mubr.bf16.mxu1 %v3697_v29  ;;  %3395 = vmatprep.mubr.bf16.mxu0 %v3699_v31  ;;  %v3710_v34 = vld [vmem:[%s3781_s9 + $0x450] ss:$36 sps:$4 sm:$0xff]   ;;  %v3711_v38 = vld [vmem:[%s3781_s9 + $0x458] ss:$36 sps:$4 sm:$0xff]   ;;  %s2855_s9 = sshll.u32 %s4513_s16, 3 }
 0x128   : > { %s4475_s22 = scalar_lea.vmem %s4511_s3, %s2855_s9 }
 0x129   : > { %v3027_v40 = vpop.f32.mrb[24].mxu1  ;;  %v2939_v41 = vpop.f32.mrb[24].mxu0 }
 0x12a   : > { %v3028_v42 = vpop.f32.mrb[25].mxu1  ;;  %v2940_v43 = vpop.f32.mrb[25].mxu0 }
 0x12b   : > { %v3029_v48 = vadd.f32 %v3028_v42, %v3027_v40  ;;  %v3030_v49 = vpop.f32.mrb[26].mxu1  ;;  %v4171_v50 = vadd.f32 %v2940_v43, %v2939_v41  ;;  %v2942_v51 = vpop.f32.mrb[26].mxu0 }
 0x12c   : > { %v3031_v57 = vpop.f32.mrb[27].mxu1  ;;  %v2943_v58 = vpop.f32.mrb[27].mxu0 }
 0x12d   : > { %v4177_v61 = vadd.f32 %v3029_v48, %v1710_v21  ;;  %v3032_v63 = vadd.f32 %v3031_v57, %v3030_v49  ;;  %v4179_v0 = vadd.f32 %v2943_v58, %v2942_v51  ;;  %v1729_v21 = vadd.f32 %v4147_v15, %v4133_v54 }
 0x12e   : > { %2279 = vmatmul.mubr.bf16.gmra.mrb[132].mxu1 %v3700_v45  ;;  %3396 = vmatmul.mubr.bf16.gmra.mrb[132].mxu0 %v3701_v47 }
 0x12f   : > { %v4181_v30 = vadd.f32 %v3032_v63, %v1713_v59  ;;  %2286 = vmatprep.mubr.bf16.mxu1 %v3702_v55  ;;  %3399 = vmatprep.mubr.bf16.mxu0 %v3704_v56  ;;  %v1734_v59 = vadd.f32 %v4155_v26, %v4133_v54 }
 0x131   : > { %v3033_v1 = vpop.f32.mrb[28].mxu1  ;;  %v2945_v3 = vpop.f32.mrb[28].mxu0 }
 0x132   : > { %v3034_v6 = vpop.f32.mrb[29].mxu1  ;;  %v2946_v7 = vpop.f32.mrb[29].mxu0 }
 0x133   : > { %v3035_v10 = vadd.f32 %v3034_v6, %v3033_v1  ;;  %v3036_v13 = vpop.f32.mrb[30].mxu1  ;;  %v4187_v16 = vadd.f32 %v2946_v7, %v2945_v3  ;;  %v2948_v17 = vpop.f32.mrb[30].mxu0 }
 0x134   : > { %v3037_v22 = vpop.f32.mrb[31].mxu1  ;;  %v2949_v23 = vpop.f32.mrb[31].mxu0 }
 0x135   : > { %v4193_v24 = vadd.f32 %v3035_v10, %v1718_v37  ;;  %v3038_v25 = vadd.f32 %v3037_v22, %v3036_v13  ;;  %v4195_v27 = vadd.f32 %v2949_v23, %v2948_v17  ;;  %v1742_v22 = vadd.f32 %v4171_v50, %v4133_v54 }
 0x136   : > { %2287 = vmatmul.mubr.bf16.gmra.mrb[136].mxu1 %v3705_v8  ;;  %3400 = vmatmul.mubr.bf16.gmra.mrb[136].mxu0 %v3706_v9  ;;  %v1737_v8 = vadd.f32 %v4163_v39, %v4133_v54 }
 0x137   : > { %v4197_v46 = vadd.f32 %v3038_v25, %v1721_v5  ;;  %2294 = vmatprep.mubr.bf16.mxu1 %v3707_v18  ;;  %3403 = vmatprep.mubr.bf16.mxu0 %v3709_v19 }
 0x139   : > { %v3039_v29 = vpop.f32.mrb[32].mxu1  ;;  %v2951_v31 = vpop.f32.mrb[32].mxu0 }
 0x13a   : > { %v3040_v32 = vpop.f32.mrb[33].mxu1  ;;  %v2952_v33 = vpop.f32.mrb[33].mxu0 }
 0x13b   : > { %v3041_v40 = vadd.f32 %v3040_v32, %v3039_v29  ;;  %v3042_v41 = vpop.f32.mrb[34].mxu1  ;;  %v4203_v42 = vadd.f32 %v2952_v33, %v2951_v31  ;;  %v2954_v43 = vpop.f32.mrb[34].mxu0  ;;  %v1745_v32 = vadd.f32 %v4179_v0, %v4133_v54 }
 0x13c   : > { %v3043_v45 = vpop.f32.mrb[35].mxu1  ;;  %v2955_v47 = vpop.f32.mrb[35].mxu0 }
 0x13d   : > { %v4207_v48 = vadd.f32 %v3041_v40, %v1726_v53  ;;  %v3044_v49 = vadd.f32 %v3043_v45, %v3042_v41  ;;  %v2956_v51 = vadd.f32 %v2955_v47, %v2954_v43  ;;  %v1750_v45 = vadd.f32 %v4187_v16, %v4133_v54 }
 0x13e   : > { %2295 = vmatmul.mubr.bf16.gmra.mrb[140].mxu1 %v3710_v34  ;;  %3404 = vmatmul.mubr.bf16.gmra.mrb[140].mxu0 %v3711_v38 }
 0x13f   : > { %v4209_v55 = vadd.f32 %v3044_v49, %v1729_v21 }
 0x141   : > { %v3045_v56 = vpop.f32.mrb[36].mxu1  ;;  %v2957_v2 = vpop.f32.mrb[36].mxu0 }
 0x142   : > { %v3046_v57 = vpop.f32.mrb[37].mxu1  ;;  %v2958_v58 = vpop.f32.mrb[37].mxu0 }
 0x143   : > { %v3047_v63 = vadd.f32 %v3046_v57, %v3045_v56  ;;  %v3048_v1 = vpop.f32.mrb[38].mxu1  ;;  %v4213_v3 = vadd.f32 %v2958_v58, %v2957_v2  ;;  %v2960_v15 = vpop.f32.mrb[38].mxu0  ;;  %v1753_v57 = vadd.f32 %v4195_v27, %v4133_v54  ;;  %v1761_v27 = vadd.f32 %v2956_v51, %v4133_v54 }
 0x144   : > { %v3049_v6 = vpop.f32.mrb[39].mxu1  ;;  %v2961_v7 = vpop.f32.mrb[39].mxu0 }
 0x145   : > { %v4217_v9 = vadd.f32 %v3047_v63, %v1734_v59  ;;  %v3050_v37 = vadd.f32 %v3049_v6, %v3048_v1  ;;  %v2962_v10 = vadd.f32 %v2961_v7, %v2960_v15  ;;  %v1766_v51 = vadd.f32 %v4213_v3, %v4133_v54 }
 0x147   : > { %v4219_v13 = vadd.f32 %v3050_v37, %v1737_v8  ;;  %v1758_v8 = vadd.f32 %v4203_v42, %v4133_v54 }
 0x149   : > { %v3051_v17 = vpop.f32.mrb[40].mxu1  ;;  %v2963_v18 = vpop.f32.mrb[40].mxu0 }
 0x14a   : > { %v3052_v19 = vpop.f32.mrb[41].mxu1  ;;  %v2964_v26 = vpop.f32.mrb[41].mxu0 }
 0x14b   : > { %v3053_v23 = vadd.f32 %v3052_v19, %v3051_v17  ;;  %v3054_v5 = vpop.f32.mrb[42].mxu1  ;;  %v4223_v25 = vadd.f32 %v2964_v26, %v2963_v18  ;;  %v2966_v29 = vpop.f32.mrb[42].mxu0 }
 0x14c   : > { %v3055_v31 = vpop.f32.mrb[43].mxu1  ;;  %v2967_v39 = vpop.f32.mrb[43].mxu0 }
 0x14d   : > { %v4227_v33 = vadd.f32 %v3053_v23, %v1742_v22  ;;  %v3056_v34 = vadd.f32 %v3055_v31, %v3054_v5  ;;  %v4229_v38 = vadd.f32 %v2967_v39, %v2966_v29 }
 0x14f   : > { %v4231_v53 = vadd.f32 %v3056_v34, %v1745_v32 }
 0x151   : > { %v3057_v40 = vpop.f32.mrb[44].mxu1  ;;  %v2969_v41 = vpop.f32.mrb[44].mxu0 }
 0x152   : > { %v3058_v50 = vpop.f32.mrb[45].mxu1  ;;  %v2970_v43 = vpop.f32.mrb[45].mxu0 }
 0x153   : > { %v3059_v47 = vadd.f32 %v3058_v50, %v3057_v40  ;;  %v3060_v21 = vpop.f32.mrb[46].mxu1  ;;  %v4235_v49 = vadd.f32 %v2970_v43, %v2969_v41  ;;  %v2972_v56 = vpop.f32.mrb[46].mxu0 }
 0x154   : > { %v3061_v0 = vpop.f32.mrb[47].mxu1  ;;  %v2973_v2 = vpop.f32.mrb[47].mxu0 }
 0x155   : > { %v4239_v58 = vadd.f32 %v3059_v47, %v1750_v45  ;;  %v3062_v59 = vadd.f32 %v3061_v0, %v3060_v21  ;;  %v4241_v63 = vadd.f32 %v2973_v2, %v2972_v56 }
 0x157   : > { %v4243_v1 = vadd.f32 %v3062_v59, %v1753_v57 }
 0x159   : > { %v3063_v15 = vpop.f32.mrb[48].mxu1  ;;  %v3127_v6 = vpop.f32.mrb[48].mxu0 }
 0x15a   : > { %v3064_v16 = vpop.f32.mrb[49].mxu1  ;;  %v3128_v7 = vpop.f32.mrb[49].mxu0 }
 0x15b   : > { %v3065_v37 = vadd.f32 %v3064_v16, %v3063_v15  ;;  %v3129_v17 = vadd.f32 %v3128_v7, %v3127_v6  ;;  %v3066_v18 = vpop.f32.mrb[50].mxu1  ;;  %v3130_v19 = vpop.f32.mrb[50].mxu0 }
 0x15c   : > { %v3067_v26 = vpop.f32.mrb[51].mxu1  ;;  %v3131_v22 = vpop.f32.mrb[51].mxu0 }
 0x15d   : > { %v4248_v23 = vadd.f32 %v3065_v37, %v1758_v8  ;;  %v4251_v5 = vadd.f32 %v3129_v17, %v4145_v11  ;;  %v3068_v29 = vadd.f32 %v3067_v26, %v3066_v18  ;;  %v3132_v31 = vadd.f32 %v3131_v22, %v3130_v19 }
 0x15e   : > { %v1769_v11 = vadd.f32 %v2962_v10, %v4133_v54  ;;  %v1774_v10 = vadd.f32 %v4223_v25, %v4133_v54 }
 0x15f   : > { %v4253_v39 = vadd.f32 %v3068_v29, %v1761_v27  ;;  %v4256_v32 = vadd.f32 %v3132_v31, %v4149_v62 }
 0x161   : > { %v3069_v42 = vpop.f32.mrb[52].mxu1  ;;  %v3133_v34 = vpop.f32.mrb[52].mxu0 }
 0x162   : > { %v3070_v40 = vpop.f32.mrb[53].mxu1  ;;  %v3134_v41 = vpop.f32.mrb[53].mxu0 }
 0x163   : > { %v3071_v50 = vadd.f32 %v3070_v40, %v3069_v42  ;;  %v3135_v43 = vadd.f32 %v3134_v41, %v3133_v34  ;;  %v3072_v45 = vpop.f32.mrb[54].mxu1  ;;  %v3136_v47 = vpop.f32.mrb[54].mxu0 }
 0x164   : > { %v3073_v21 = vpop.f32.mrb[55].mxu1  ;;  %v3137_v56 = vpop.f32.mrb[55].mxu0 }
 0x165   : > { %v4261_v0 = vadd.f32 %v3071_v50, %v1766_v51  ;;  %v4264_v62 = vadd.f32 %v3135_v43, %v4161_v35  ;;  %v3074_v2 = vadd.f32 %v3073_v21, %v3072_v45  ;;  %v3138_v57 = vadd.f32 %v3137_v56, %v3136_v47 }
 0x166   : > { %v1777_v35 = vadd.f32 %v4229_v38, %v4133_v54  ;;  %v1782_v38 = vadd.f32 %v4235_v49, %v4133_v54 }
 0x167   : > { %v4266_v59 = vadd.f32 %v3074_v2, %v1769_v11  ;;  %v4269_v15 = vadd.f32 %v3138_v57, %v4165_v14 }
 0x169   : > { %v3075_v3 = vpop.f32.mrb[56].mxu1  ;;  %v3139_v6 = vpop.f32.mrb[56].mxu0 }
 0x16a   : > { %v3076_v16 = vpop.f32.mrb[57].mxu1  ;;  %v3140_v7 = vpop.f32.mrb[57].mxu0 }
 0x16b   : > { %v3077_v8 = vadd.f32 %v3076_v16, %v3075_v3  ;;  %v3141_v37 = vadd.f32 %v3140_v7, %v3139_v6  ;;  %v3078_v17 = vpop.f32.mrb[58].mxu1  ;;  %v3142_v18 = vpop.f32.mrb[58].mxu0 }
 0x16c   : > { %v3079_v19 = vpop.f32.mrb[59].mxu1  ;;  %v3143_v27 = vpop.f32.mrb[59].mxu0 }
 0x16d   : > { %v4275_v26 = vadd.f32 %v3077_v8, %v1774_v10  ;;  %v4278_v14 = vadd.f32 %v3141_v37, %v4177_v61  ;;  %v3080_v22 = vadd.f32 %v3079_v19, %v3078_v17  ;;  %v3144_v29 = vadd.f32 %v3143_v27, %v3142_v18 }
 0x16e   : > { %v1785_v61 = vadd.f32 %v4241_v63, %v4133_v54  ;;  %v1790_v63 = vadd.f32 %v4084_v60, %v4133_v54 }
 0x16f   : > { %v4280_v31 = vadd.f32 %v3080_v22, %v1777_v35  ;;  %v4283_v25 = vadd.f32 %v3144_v29, %v4181_v30 }
 0x171   : > { %v3081_v42 = vpop.f32.mrb[60].mxu1  ;;  %v3145_v34 = vpop.f32.mrb[60].mxu0 }
 0x172   : > { %v3082_v40 = vpop.f32.mrb[61].mxu1  ;;  %v3146_v41 = vpop.f32.mrb[61].mxu0 }
 0x173   : > { %v3083_v51 = vadd.f32 %v3082_v40, %v3081_v42  ;;  %v3147_v50 = vadd.f32 %v3146_v41, %v3145_v34  ;;  %v3084_v43 = vpop.f32.mrb[62].mxu1  ;;  %v3148_v45 = vpop.f32.mrb[62].mxu0 }
 0x174   : > { %v3085_v47 = vpop.f32.mrb[63].mxu1  ;;  %v3149_v11 = vpop.f32.mrb[63].mxu0 }
 0x175   : > { %v4289_v21 = vadd.f32 %v3083_v51, %v1782_v38  ;;  %v4292_v30 = vadd.f32 %v3147_v50, %v4193_v24  ;;  %v3086_v56 = vadd.f32 %v3085_v47, %v3084_v43  ;;  %v3150_v2 = vadd.f32 %v3149_v11, %v3148_v45 }
 0x176   : > { %v1793_v24 = vadd.f32 %v4090_v4, %v4133_v54  ;;  %v1798_v4 = vadd.f32 %v4096_v12, %v4133_v54 }
 0x177   : > { %v4294_v57 = vadd.f32 %v3086_v56, %v1785_v61  ;;  %v4297_v49 = vadd.f32 %v3150_v2, %v4197_v46 }
 0x179   : > { %v3087_v3 = vpop.f32.mrb[64].mxu1  ;;  %v3151_v6 = vpop.f32.mrb[64].mxu0 }
 0x17a   : > { %v3088_v16 = vpop.f32.mrb[65].mxu1  ;;  %v3152_v7 = vpop.f32.mrb[65].mxu0 }
 0x17b   : > { %v3089_v10 = vadd.f32 %v3088_v16, %v3087_v3  ;;  %v3153_v8 = vadd.f32 %v3152_v7, %v3151_v6  ;;  %v3090_v37 = vpop.f32.mrb[66].mxu1  ;;  %v3154_v17 = vpop.f32.mrb[66].mxu0 }
 0x17c   : > { %v3091_v18 = vpop.f32.mrb[67].mxu1  ;;  %v3155_v35 = vpop.f32.mrb[67].mxu0 }
 0x17d   : > { %v4303_v19 = vadd.f32 %v3089_v10, %v1790_v63  ;;  %v4306_v46 = vadd.f32 %v3153_v8, %v4207_v48  ;;  %v3092_v27 = vadd.f32 %v3091_v18, %v3090_v37  ;;  %v3156_v22 = vadd.f32 %v3155_v35, %v3154_v17 }
 0x17e   : > { %v1801_v48 = vadd.f32 %v4102_v20, %v4133_v54  ;;  %v1806_v20 = vadd.f32 %v4108_v28, %v4133_v54 }
 0x17f   : > { %v4308_v29 = vadd.f32 %v3092_v27, %v1793_v24  ;;  %v4311_v60 = vadd.f32 %v3156_v22, %v4209_v55 }
 0x181   : > { %v3093_v42 = vpop.f32.mrb[68].mxu1  ;;  %v3157_v34 = vpop.f32.mrb[68].mxu0 }
 0x182   : > { %v3094_v40 = vpop.f32.mrb[69].mxu1  ;;  %v3158_v41 = vpop.f32.mrb[69].mxu0 }
 0x183   : > { %v3095_v38 = vadd.f32 %v3094_v40, %v3093_v42  ;;  %v3159_v51 = vadd.f32 %v3158_v41, %v3157_v34  ;;  %v3096_v50 = vpop.f32.mrb[70].mxu1  ;;  %v3160_v43 = vpop.f32.mrb[70].mxu0 }
 0x184   : > { %v3097_v45 = vpop.f32.mrb[71].mxu1  ;;  %v3161_v61 = vpop.f32.mrb[71].mxu0 }
 0x185   : > { %v4317_v47 = vadd.f32 %v3095_v38, %v1798_v4  ;;  %v4320_v55 = vadd.f32 %v3159_v51, %v4217_v9  ;;  %v3098_v11 = vadd.f32 %v3097_v45, %v3096_v50  ;;  %v3162_v56 = vadd.f32 %v3161_v61, %v3160_v43 }
 0x186   : > { %v1809_v9 = vadd.f32 %v4114_v36, %v4133_v54  ;;  %v1814_v36 = vadd.f32 %v4120_v44, %v4133_v54 }
 0x187   : > { %v4322_v2 = vadd.f32 %v3098_v11, %v1801_v48  ;;  %v4325_v12 = vadd.f32 %v3162_v56, %v4219_v13 }
 0x189   : > { %v3099_v3 = vpop.f32.mrb[72].mxu1  ;;  %v3163_v6 = vpop.f32.mrb[72].mxu0 }
 0x18a   : > { %v3100_v16 = vpop.f32.mrb[73].mxu1  ;;  %v3164_v7 = vpop.f32.mrb[73].mxu0 }
 0x18b   : > { %v3101_v63 = vadd.f32 %v3100_v16, %v3099_v3  ;;  %v3165_v10 = vadd.f32 %v3164_v7, %v3163_v6  ;;  %v3102_v8 = vpop.f32.mrb[74].mxu1  ;;  %v3166_v37 = vpop.f32.mrb[74].mxu0 }
 0x18c   : > { %v3103_v17 = vpop.f32.mrb[75].mxu1  ;;  %v3167_v24 = vpop.f32.mrb[75].mxu0 }
 0x18d   : > { %v4331_v18 = vadd.f32 %v3101_v63, %v1806_v20  ;;  %v4334_v13 = vadd.f32 %v3165_v10, %v4227_v33  ;;  %v3104_v35 = vadd.f32 %v3103_v17, %v3102_v8  ;;  %v3168_v27 = vadd.f32 %v3167_v24, %v3166_v37 }
 0x18e   : > { %v1817_v33 = vadd.f32 %v4126_v52, %v4133_v54 }
 0x18f   : > { %v4336_v22 = vadd.f32 %v3104_v35, %v1809_v9  ;;  %v4339_v28 = vadd.f32 %v3168_v27, %v4231_v53 }
 0x191   : > { %v3105_v42 = vpop.f32.mrb[76].mxu1  ;;  %v3169_v34 = vpop.f32.mrb[76].mxu0 }
 0x192   : > { %v3106_v40 = vpop.f32.mrb[77].mxu1  ;;  %v3170_v41 = vpop.f32.mrb[77].mxu0 }
 0x193   : > { %v3107_v4 = vadd.f32 %v3106_v40, %v3105_v42  ;;  %v3171_v38 = vadd.f32 %v3170_v41, %v3169_v34  ;;  %v3108_v51 = vpop.f32.mrb[78].mxu1  ;;  %v3172_v50 = vpop.f32.mrb[78].mxu0 }
 0x194   : > { %v3109_v43 = vpop.f32.mrb[79].mxu1  ;;  %v3173_v48 = vpop.f32.mrb[79].mxu0 }
 0x195   : > { %v4345_v45 = vadd.f32 %v3107_v4, %v1814_v36  ;;  %v4348_v53 = vadd.f32 %v3171_v38, %v4239_v58  ;;  %v3110_v61 = vadd.f32 %v3109_v43, %v3108_v51  ;;  %v3174_v11 = vadd.f32 %v3173_v48, %v3172_v50 }
 0x197   : > { %v4350_v56 = vadd.f32 %v3110_v61, %v1817_v33  ;;  %v4353_v44 = vadd.f32 %v3174_v11, %v4243_v1 }
 0x199   : > { %v3175_v3 = vpop.f32.mrb[80].mxu0  ;;  %v3239_v6 = vpop.f32.mrb[80].mxu1 }
 0x19a   : > { %v3176_v16 = vpop.f32.mrb[81].mxu0  ;;  %v3240_v7 = vpop.f32.mrb[81].mxu1 }
 0x19b   : > { %v3177_v20 = vadd.f32 %v3176_v16, %v3175_v3  ;;  %v3241_v52 = vadd.f32 %v3240_v7, %v3239_v6  ;;  %v3178_v54 = vpop.f32.mrb[82].mxu0  ;;  %v3242_v63 = vpop.f32.mrb[82].mxu1 }
 0x19c   : > { %v3179_v10 = vpop.f32.mrb[83].mxu0  ;;  %v3243_v8 = vpop.f32.mrb[83].mxu1 }
 0x19d   : > { %v4356_v58 = vadd.f32 %v3177_v20, %v4248_v23  ;;  %v3180_v37 = vadd.f32 %v3179_v10, %v3178_v54  ;;  %v3244_v9 = vadd.f32 %v3243_v8, %v3242_v63  ;;  %v4359_v17 = vadd.f32 %v3241_v52, %v4251_v5 }
 0x19f   : > { %v4362_v1 = vadd.f32 %v3180_v37, %v4253_v39  ;;  %v4365_v24 = vadd.f32 %v3244_v9, %v4256_v32 }
 0x1a1   : > { %v3181_v35 = vpop.f32.mrb[84].mxu0  ;;  %v3245_v27 = vpop.f32.mrb[84].mxu1 }
 0x1a2   : > { %v3182_v42 = vpop.f32.mrb[85].mxu0  ;;  %v3246_v34 = vpop.f32.mrb[85].mxu1 }
 0x1a3   : > { %v3183_v40 = vadd.f32 %v3182_v42, %v3181_v35  ;;  %v3247_v41 = vadd.f32 %v3246_v34, %v3245_v27  ;;  %v3184_v36 = vpop.f32.mrb[86].mxu0  ;;  %v3248_v23 = vpop.f32.mrb[86].mxu1 }
 0x1a4   : > { %v3185_v4 = vpop.f32.mrb[87].mxu0  ;;  %v3249_v38 = vpop.f32.mrb[87].mxu1 }
 0x1a5   : > { %v4368_v51 = vadd.f32 %v3183_v40, %v4261_v0  ;;  %v3186_v5 = vadd.f32 %v3185_v4, %v3184_v36  ;;  %v3250_v50 = vadd.f32 %v3249_v38, %v3248_v23  ;;  %v4371_v39 = vadd.f32 %v3247_v41, %v4264_v62 }
 0x1a7   : > { %v4374_v32 = vadd.f32 %v3186_v5, %v4266_v59  ;;  %v4377_v33 = vadd.f32 %v3250_v50, %v4269_v15 }
 0x1a9   : > { %v3187_v43 = vpop.f32.mrb[88].mxu0  ;;  %v3251_v48 = vpop.f32.mrb[88].mxu1 }
 0x1aa   : > { %v3188_v61 = vpop.f32.mrb[89].mxu0  ;;  %v3252_v11 = vpop.f32.mrb[89].mxu1 }
 0x1ab   : > { %v3189_v3 = vadd.f32 %v3188_v61, %v3187_v43  ;;  %v3253_v6 = vadd.f32 %v3252_v11, %v3251_v48  ;;  %v3190_v16 = vpop.f32.mrb[90].mxu0  ;;  %v3254_v0 = vpop.f32.mrb[90].mxu1 }
 0x1ac   : > { %v3191_v7 = vpop.f32.mrb[91].mxu0  ;;  %v3255_v20 = vpop.f32.mrb[91].mxu1 }
 0x1ad   : > { %v4380_v52 = vadd.f32 %v3189_v3, %v4275_v26  ;;  %v3192_v62 = vadd.f32 %v3191_v7, %v3190_v16  ;;  %v3256_v54 = vadd.f32 %v3255_v20, %v3254_v0  ;;  %v4383_v59 = vadd.f32 %v3253_v6, %v4278_v14 }
 0x1af   : > { %v4386_v15 = vadd.f32 %v3192_v62, %v4280_v31  ;;  %v4389_v63 = vadd.f32 %v3256_v54, %v4283_v25 }
 0x1b1   : > { %v3193_v10 = vpop.f32.mrb[92].mxu0  ;;  %v3257_v8 = vpop.f32.mrb[92].mxu1 }
 0x1b2   : > { %v3194_v37 = vpop.f32.mrb[93].mxu0  ;;  %v3258_v9 = vpop.f32.mrb[93].mxu1 }
 0x1b3   : > { %v3195_v35 = vadd.f32 %v3194_v37, %v3193_v10  ;;  %v3259_v27 = vadd.f32 %v3258_v9, %v3257_v8  ;;  %v3196_v42 = vpop.f32.mrb[94].mxu0  ;;  %v3260_v26 = vpop.f32.mrb[94].mxu1 }
 0x1b4   : > { %v3197_v34 = vpop.f32.mrb[95].mxu0  ;;  %v3261_v40 = vpop.f32.mrb[95].mxu1 }
 0x1b5   : > { %v4392_v41 = vadd.f32 %v3195_v35, %v4289_v21  ;;  %v3198_v14 = vadd.f32 %v3197_v34, %v3196_v42  ;;  %v3262_v36 = vadd.f32 %v3261_v40, %v3260_v26  ;;  %v4395_v31 = vadd.f32 %v3259_v27, %v4292_v30 }
 0x1b7   : > { %v4398_v25 = vadd.f32 %v3198_v14, %v4294_v57  ;;  %v4401_v23 = vadd.f32 %v3262_v36, %v4297_v49 }
 0x1b9   : > { %v3199_v4 = vpop.f32.mrb[96].mxu0  ;;  %v3263_v38 = vpop.f32.mrb[96].mxu1 }
 0x1ba   : > { %v3200_v5 = vpop.f32.mrb[97].mxu0  ;;  %v3264_v50 = vpop.f32.mrb[97].mxu1 }
 0x1bb   : > { %v3201_v43 = vadd.f32 %v3200_v5, %v3199_v4  ;;  %v3265_v48 = vadd.f32 %v3264_v50, %v3263_v38  ;;  %v3202_v61 = vpop.f32.mrb[98].mxu0  ;;  %v3266_v21 = vpop.f32.mrb[98].mxu1 }
 0x1bc   : > { %v3203_v11 = vpop.f32.mrb[99].mxu0  ;;  %v3267_v3 = vpop.f32.mrb[99].mxu1 }
 0x1bd   : > { %v4404_v6 = vadd.f32 %v3201_v43, %v4303_v19  ;;  %v3204_v30 = vadd.f32 %v3203_v11, %v3202_v61  ;;  %v3268_v16 = vadd.f32 %v3267_v3, %v3266_v21  ;;  %v4407_v57 = vadd.f32 %v3265_v48, %v4306_v46 }
 0x1bf   : > { %v4410_v49 = vadd.f32 %v3204_v30, %v4308_v29  ;;  %v4413_v0 = vadd.f32 %v3268_v16, %v4311_v60 }
 0x1c1   : > { %v3205_v7 = vpop.f32.mrb[100].mxu0  ;;  %v3269_v20 = vpop.f32.mrb[100].mxu1 }
 0x1c2   : > { %v3206_v62 = vpop.f32.mrb[101].mxu0  ;;  %v3270_v54 = vpop.f32.mrb[101].mxu1 }
 0x1c3   : > { %v3207_v10 = vadd.f32 %v3206_v62, %v3205_v7  ;;  %v3271_v8 = vadd.f32 %v3270_v54, %v3269_v20  ;;  %v3208_v37 = vpop.f32.mrb[102].mxu0  ;;  %v3272_v19 = vpop.f32.mrb[102].mxu1 }
 0x1c4   : > { %v3209_v9 = vpop.f32.mrb[103].mxu0  ;;  %v3273_v35 = vpop.f32.mrb[103].mxu1 }
 0x1c5   : > { %v4416_v27 = vadd.f32 %v3207_v10, %v4317_v47  ;;  %v3210_v46 = vadd.f32 %v3209_v9, %v3208_v37  ;;  %v3274_v42 = vadd.f32 %v3273_v35, %v3272_v19  ;;  %v4419_v29 = vadd.f32 %v3271_v8, %v4320_v55 }
 0x1c7   : > { %v4422_v60 = vadd.f32 %v3210_v46, %v4322_v2  ;;  %v4425_v26 = vadd.f32 %v3274_v42, %v4325_v12 }
 0x1c9   : > { %v3211_v34 = vpop.f32.mrb[104].mxu0  ;;  %v3275_v40 = vpop.f32.mrb[104].mxu1 }
 0x1ca   : > { %v3212_v14 = vpop.f32.mrb[105].mxu0  ;;  %v3276_v36 = vpop.f32.mrb[105].mxu1 }
 0x1cb   : > { %v3213_v4 = vadd.f32 %v3212_v14, %v3211_v34  ;;  %v3277_v38 = vadd.f32 %v3276_v36, %v3275_v40  ;;  %v3214_v5 = vpop.f32.mrb[106].mxu0  ;;  %v3278_v47 = vpop.f32.mrb[106].mxu1 }
 0x1cc   : > { %v3215_v50 = vpop.f32.mrb[107].mxu0  ;;  %v3279_v43 = vpop.f32.mrb[107].mxu1 }
 0x1cd   : > { %v4428_v48 = vadd.f32 %v3213_v4, %v4331_v18  ;;  %v3216_v55 = vadd.f32 %v3215_v50, %v3214_v5  ;;  %v3280_v61 = vadd.f32 %v3279_v43, %v3278_v47  ;;  %v4431_v2 = vadd.f32 %v3277_v38, %v4334_v13 }
 0x1cf   : > { %v4434_v12 = vadd.f32 %v3216_v55, %v4336_v22  ;;  %v4437_v21 = vadd.f32 %v3280_v61, %v4339_v28 }
 0x1d1   : > { %v3217_v11 = vpop.f32.mrb[108].mxu0  ;;  %v3281_v3 = vpop.f32.mrb[108].mxu1 }
 0x1d2   : > { %v3218_v30 = vpop.f32.mrb[109].mxu0  ;;  %v3282_v16 = vpop.f32.mrb[109].mxu1 }
 0x1d3   : > { %v3219_v7 = vadd.f32 %v3218_v30, %v3217_v11  ;;  %v3283_v20 = vadd.f32 %v3282_v16, %v3281_v3  ;;  %v3220_v62 = vpop.f32.mrb[110].mxu0  ;;  %v3284_v18 = vpop.f32.mrb[110].mxu1 }
 0x1d4   : > { %v3221_v54 = vpop.f32.mrb[111].mxu0  ;;  %v3285_v10 = vpop.f32.mrb[111].mxu1 }
 0x1d5   : > { %v4440_v8 = vadd.f32 %v3219_v7, %v4345_v45  ;;  %v3222_v13 = vadd.f32 %v3221_v54, %v3220_v62  ;;  %v3286_v37 = vadd.f32 %v3285_v10, %v3284_v18  ;;  %v4443_v22 = vadd.f32 %v3283_v20, %v4348_v53 }
 0x1d7   : > { %v4446_v28 = vadd.f32 %v3222_v13, %v4350_v56  ;;  %v4449_v19 = vadd.f32 %v3286_v37, %v4353_v44 }
 0x1d9   : > { %v3287_v9 = vpop.f32.mrb[112].mxu1  ;;  %v3377_v35 = vpop.f32.mrb[112].mxu0 }
 0x1da   : > { %v2346_v46 = vadd.f32 %v3377_v35, %v4371_v39  ;;  %v3288_v42 = vpop.f32.mrb[113].mxu1  ;;  %v2337_v34 = vpop.f32.mrb[113].mxu0 }
 0x1db   : > { %v3289_v40 = vadd.f32 %v3288_v42, %v3287_v9  ;;  %v2338_v45 = vadd.f32 %v2337_v34, %v4359_v17  ;;  %v3290_v14 = vpop.f32.mrb[114].mxu1  ;;  %v3378_v36 = vpop.f32.mrb[114].mxu0 }
 0x1dc   : > { %v2466_v4 = vmax.f32 %v2346_v46, 0.0  ;;  %v2349_v53 = vadd.f32 %v3378_v36, %v4377_v33  ;;  %v3291_v38 = vpop.f32.mrb[115].mxu1  ;;  %v2340_v56 = vpop.f32.mrb[115].mxu0 }
 0x1dd   : > { %v2464_v5 = vmax.f32 %v2338_v45, 0.0  ;;  %v3292_v47 = vadd.f32 %v3291_v38, %v3290_v14  ;;  %v2341_v44 = vadd.f32 %v2340_v56, %v4365_v24  ;;  %v4456_v50 = vadd.f32 %v3289_v40, %v4356_v58 }
 0x1de   : > { %v2467_v39 = vmax.f32 %v2349_v53, 0.0 }
 0x1df   : > { %v2496_v43 = vmax.f32 %v2464_v5, %v2466_v4  ;;  %v2465_v55 = vmax.f32 %v2341_v44, 0.0  ;;  %v4459_v61 = vadd.f32 %v3292_v47, %v4362_v1 }
 0x1e1   : > { %v2497_v17 = vmax.f32 %v2465_v55, %v2467_v39  ;;  %v3293_v11 = vpop.f32.mrb[116].mxu1  ;;  %v3381_v3 = vpop.f32.mrb[116].mxu0 }
 0x1e2   : > { %v2362_v33 = vadd.f32 %v3381_v3, %v4395_v31  ;;  %v3294_v30 = vpop.f32.mrb[117].mxu1  ;;  %v2353_v16 = vpop.f32.mrb[117].mxu0 }
 0x1e3   : > { %v3295_v7 = vadd.f32 %v3294_v30, %v3293_v11  ;;  %v2354_v20 = vadd.f32 %v2353_v16, %v4383_v59  ;;  %v3296_v24 = vpop.f32.mrb[118].mxu1  ;;  %v3382_v58 = vpop.f32.mrb[118].mxu0 }
 0x1e4   : > { %v2470_v62 = vmax.f32 %v2362_v33, 0.0  ;;  %v2365_v18 = vadd.f32 %v3382_v58, %v4401_v23  ;;  %v3297_v54 = vpop.f32.mrb[119].mxu1  ;;  %v2356_v10 = vpop.f32.mrb[119].mxu0 }
 0x1e5   : > { %v2468_v1 = vmax.f32 %v2354_v20, 0.0  ;;  %v3298_v13 = vadd.f32 %v3297_v54, %v3296_v24  ;;  %v2357_v37 = vadd.f32 %v2356_v10, %v4389_v63  ;;  %v2249_v9 = vadd.f32 %v3295_v7, %v4368_v51 }
 0x1e6   : > { %v2471_v31 = vmax.f32 %v2365_v18, 0.0 }
 0x1e7   : > { %v2504_v35 = vmax.f32 %v2468_v1, %v2470_v62  ;;  %v2469_v46 = vmax.f32 %v2357_v37, 0.0  ;;  %v4467_v42 = vadd.f32 %v3298_v13, %v4374_v32 }
 0x1e9   : > { %v2512_v59 = vmax.f32 %v2496_v43, %v2504_v35  ;;  %v2505_v34 = vmax.f32 %v2469_v46, %v2471_v31  ;;  %v3299_v40 = vpop.f32.mrb[120].mxu1  ;;  %v3385_v45 = vpop.f32.mrb[120].mxu0 }
 0x1ea   : > { %v2378_v23 = vadd.f32 %v3385_v45, %v4419_v29  ;;  %v3300_v14 = vpop.f32.mrb[121].mxu1  ;;  %v2369_v36 = vpop.f32.mrb[121].mxu0 }
 0x1eb   : > { %v2513_v4 = vmax.f32 %v2497_v17, %v2505_v34  ;;  %v3301_v53 = vadd.f32 %v3300_v14, %v3299_v40  ;;  %v2370_v63 = vadd.f32 %v2369_v36, %v4407_v57  ;;  %v3302_v51 = vpop.f32.mrb[122].mxu1  ;;  %v3386_v38 = vpop.f32.mrb[122].mxu0 }
 0x1ec   : > { %v2474_v32 = vmax.f32 %v2378_v23, 0.0  ;;  %v2381_v56 = vadd.f32 %v3386_v38, %v4425_v26  ;;  %v3303_v5 = vpop.f32.mrb[123].mxu1  ;;  %v2372_v47 = vpop.f32.mrb[123].mxu0 }
 0x1ed   : > { %v2867_v29 = vpack.c.bf16 %v2513_v4, %v2512_v59  ;;  %v2472_v44 = vmax.f32 %v2370_v63, 0.0  ;;  %v3304_v39 = vadd.f32 %v3303_v5, %v3302_v51  ;;  %v2373_v43 = vadd.f32 %v2372_v47, %v4413_v0 }
 0x1ee   : > { %v2475_v55 = vmax.f32 %v2381_v56, 0.0  ;;  %v2257_v57 = vadd.f32 %v3301_v53, %v4380_v52 }
 0x1ef   : > { %2868 = vst [vmem:[%s4475_s22] sm:$0xff] %v2867_v29   ;;  %v2498_v17 = vmax.f32 %v2472_v44, %v2474_v32  ;;  %v2473_v11 = vmax.f32 %v2373_v43, 0.0  ;;  %v4482_v3 = vadd.f32 %v3304_v39, %v4386_v15 }
 0x1f1   : > { %v2499_v33 = vmax.f32 %v2473_v11, %v2475_v55  ;;  %v3305_v30 = vpop.f32.mrb[124].mxu1  ;;  %v3389_v16 = vpop.f32.mrb[124].mxu0 }
 0x1f2   : > { %v2394_v26 = vadd.f32 %v3389_v16, %v4443_v22  ;;  %v3306_v7 = vpop.f32.mrb[125].mxu1  ;;  %v2385_v20 = vpop.f32.mrb[125].mxu0 }
 0x1f3   : > { %v3307_v24 = vadd.f32 %v3306_v7, %v3305_v30  ;;  %v2386_v58 = vadd.f32 %v2385_v20, %v4431_v2  ;;  %v3308_v0 = vpop.f32.mrb[126].mxu1  ;;  %v3390_v62 = vpop.f32.mrb[126].mxu0 }
 0x1f4   : > { %v2478_v18 = vmax.f32 %v2394_v26, 0.0  ;;  %v2397_v52 = vadd.f32 %v3390_v62, %v4449_v19  ;;  %v3309_v54 = vpop.f32.mrb[127].mxu1  ;;  %v2388_v10 = vpop.f32.mrb[127].mxu0 }
 0x1f5   : > { %v2476_v1 = vmax.f32 %v2386_v58, 0.0  ;;  %v3310_v15 = vadd.f32 %v3309_v54, %v3308_v0  ;;  %v2389_v13 = vadd.f32 %v2388_v10, %v4437_v21  ;;  %v2265_v37 = vadd.f32 %v3307_v24, %v4392_v41 }
 0x1f6   : > { %v2479_v31 = vmax.f32 %v2397_v52, 0.0 }
 0x1f7   : > { %v2506_v22 = vmax.f32 %v2476_v1, %v2478_v18  ;;  %v2477_v35 = vmax.f32 %v2389_v13, 0.0  ;;  %v2268_v46 = vadd.f32 %v3310_v15, %v4398_v25 }
 0x1f9   : > { %v2514_v59 = vmax.f32 %v2498_v17, %v2506_v22  ;;  %v2507_v2 = vmax.f32 %v2477_v35, %v2479_v31  ;;  %v3311_v34 = vpop.f32.mrb[128].mxu1  ;;  %v3393_v40 = vpop.f32.mrb[128].mxu0 }
 0x1fa   : > { %v2410_v45 = vadd.f32 %v3393_v40, %v2249_v9  ;;  %v3312_v23 = vpop.f32.mrb[129].mxu1  ;;  %v2401_v19 = vpop.f32.mrb[129].mxu0 }
 0x1fb   : > { %v2515_v14 = vmax.f32 %v2499_v33, %v2507_v2  ;;  %v3313_v36 = vadd.f32 %v3312_v23, %v3311_v34  ;;  %v2402_v4 = vadd.f32 %v2401_v19, %v4456_v50  ;;  %v3314_v21 = vpop.f32.mrb[130].mxu1  ;;  %v3394_v53 = vpop.f32.mrb[130].mxu0 }
 0x1fc   : > { %v2482_v41 = vmax.f32 %v2410_v45, 0.0  ;;  %v2413_v63 = vadd.f32 %v3394_v53, %v4467_v42  ;;  %v3315_v51 = vpop.f32.mrb[131].mxu1  ;;  %v2404_v38 = vpop.f32.mrb[131].mxu0 }
 0x1fd   : > { %v2872_v25 = vpack.c.bf16 %v2515_v14, %v2514_v59  ;;  %v2480_v32 = vmax.f32 %v2402_v4, 0.0  ;;  %v3316_v56 = vadd.f32 %v3315_v51, %v3314_v21  ;;  %v2405_v5 = vadd.f32 %v2404_v38, %v4459_v61 }
 0x1fe   : > { %v2483_v9 = vmax.f32 %v2413_v63, 0.0  ;;  %v2273_v47 = vadd.f32 %v3313_v36, %v4404_v6 }
 0x1ff   : > { %2884 = vst [vmem:[%s4475_s22 + $0x8] sm:$0xff] %v2872_v25   ;;  %v2500_v29 = vmax.f32 %v2480_v32, %v2482_v41  ;;  %v2481_v44 = vmax.f32 %v2405_v5, 0.0  ;;  %v2276_v50 = vadd.f32 %v3316_v56, %v4410_v49 }
 0x201   : > { %v2501_v39 = vmax.f32 %v2481_v44, %v2483_v9  ;;  %v3317_v43 = vpop.f32.mrb[132].mxu1  ;;  %v3397_v55 = vpop.f32.mrb[132].mxu0 }
 0x202   : > { %v2426_v17 = vadd.f32 %v3397_v55, %v2265_v37  ;;  %v3318_v42 = vpop.f32.mrb[133].mxu1  ;;  %v2417_v11 = vpop.f32.mrb[133].mxu0 }
 0x203   : > { %v3319_v33 = vadd.f32 %v3318_v42, %v3317_v43  ;;  %v2418_v30 = vadd.f32 %v2417_v11, %v2257_v57  ;;  %v3320_v16 = vpop.f32.mrb[134].mxu1  ;;  %v3398_v26 = vpop.f32.mrb[134].mxu0 }
 0x204   : > { %v2486_v7 = vmax.f32 %v2426_v17, 0.0  ;;  %v2429_v61 = vadd.f32 %v3398_v26, %v2268_v46  ;;  %v3321_v20 = vpop.f32.mrb[135].mxu1  ;;  %v2420_v24 = vpop.f32.mrb[135].mxu0 }
 0x205   : > { %v2484_v6 = vmax.f32 %v2418_v30, 0.0  ;;  %v3322_v58 = vadd.f32 %v3321_v20, %v3320_v16  ;;  %v2421_v0 = vadd.f32 %v2420_v24, %v4482_v3  ;;  %v2281_v49 = vadd.f32 %v3319_v33, %v4416_v27 }
 0x206   : > { %v2487_v62 = vmax.f32 %v2429_v61, 0.0 }
 0x207   : > { %v2508_v18 = vmax.f32 %v2484_v6, %v2486_v7  ;;  %v2485_v52 = vmax.f32 %v2421_v0, 0.0  ;;  %v2284_v54 = vadd.f32 %v3322_v58, %v4422_v60 }
 0x209   : > { %v2516_v10 = vmax.f32 %v2500_v29, %v2508_v18  ;;  %v2509_v1 = vmax.f32 %v2485_v52, %v2487_v62  ;;  %v3323_v57 = vpop.f32.mrb[136].mxu1  ;;  %v3401_v15 = vpop.f32.mrb[136].mxu0 }
 0x20a   : > { %v2442_v13 = vadd.f32 %v3401_v15, %v2281_v49  ;;  %v3324_v37 = vpop.f32.mrb[137].mxu1  ;;  %v2433_v31 = vpop.f32.mrb[137].mxu0 }
 0x20b   : > { %v2517_v22 = vmax.f32 %v2501_v39, %v2509_v1  ;;  %v3325_v35 = vadd.f32 %v3324_v37, %v3323_v57  ;;  %v2434_v46 = vadd.f32 %v2433_v31, %v2273_v47  ;;  %v3326_v59 = vpop.f32.mrb[138].mxu1  ;;  %v3402_v3 = vpop.f32.mrb[138].mxu0 }
 0x20c   : > { %v2490_v2 = vmax.f32 %v2442_v13, 0.0  ;;  %v2445_v27 = vadd.f32 %v3402_v3, %v2284_v54  ;;  %v3327_v34 = vpop.f32.mrb[139].mxu1  ;;  %v2436_v40 = vpop.f32.mrb[139].mxu0 }
 0x20d   : > { %v2877_v45 = vpack.c.bf16 %v2517_v22, %v2516_v10  ;;  %v2488_v23 = vmax.f32 %v2434_v46, 0.0  ;;  %v3328_v60 = vadd.f32 %v3327_v34, %v3326_v59  ;;  %v2437_v19 = vadd.f32 %v2436_v40, %v2276_v50 }
 0x20e   : > { %v2491_v14 = vmax.f32 %v2445_v27, 0.0  ;;  %v2289_v36 = vadd.f32 %v3325_v35, %v4428_v48 }
 0x20f   : > { %2885 = vst [vmem:[%s4475_s22 + $0x10] sm:$0xff] %v2877_v45   ;;  %v2502_v4 = vmax.f32 %v2488_v23, %v2490_v2  ;;  %v2489_v21 = vmax.f32 %v2437_v19, 0.0  ;;  %v2292_v53 = vadd.f32 %v3328_v60, %v4434_v12 }
 0x211   : > { %v2503_v41 = vmax.f32 %v2489_v21, %v2491_v14  ;;  %v3329_v63 = vpop.f32.mrb[140].mxu1  ;;  %v3405_v51 = vpop.f32.mrb[140].mxu0 }
 0x212   : > { %v3330_v38 = vpop.f32.mrb[141].mxu1  ;;  %v2449_v25 = vpop.f32.mrb[141].mxu0 }
 0x213   : > { %v3331_v32 = vadd.f32 %v3330_v38, %v3329_v63  ;;  %v2450_v56 = vadd.f32 %v2449_v25, %v2289_v36  ;;  %v3332_v5 = vpop.f32.mrb[142].mxu1  ;;  %v3406_v9 = vpop.f32.mrb[142].mxu0 }
 0x214   : > { %v3333_v47 = vpop.f32.mrb[143].mxu1  ;;  %v2452_v29 = vpop.f32.mrb[143].mxu0 }
 0x215   : > { %v2297_v44 = vadd.f32 %v3331_v32, %v4440_v8  ;;  %v3334_v48 = vadd.f32 %v3333_v47, %v3332_v5  ;;  %v2453_v50 = vadd.f32 %v2452_v29, %v2292_v53  ;;  %v2492_v12 = vmax.f32 %v2450_v56, 0.0 }
 0x217   : > { %v2458_v39 = vadd.f32 %v3405_v51, %v2297_v44  ;;  %v2300_v43 = vadd.f32 %v3334_v48, %v4446_v28  ;;  %v2493_v11 = vmax.f32 %v2453_v50, 0.0 }
 0x219   : > { %v2494_v55 = vmax.f32 %v2458_v39, 0.0  ;;  %v2461_v17 = vadd.f32 %v3406_v9, %v2300_v43 }
 0x21b   : > { %v2510_v42 = vmax.f32 %v2492_v12, %v2494_v55  ;;  %v2495_v33 = vmax.f32 %v2461_v17, 0.0 }
 0x21d   : > { %v2518_v30 = vmax.f32 %v2502_v4, %v2510_v42  ;;  %v2511_v16 = vmax.f32 %v2493_v11, %v2495_v33 }
 0x21f   : > { %v2519_v26 = vmax.f32 %v2503_v41, %v2511_v16 }
 0x221   : > { %v2882_v7 = vpack.c.bf16 %v2519_v26, %v2518_v30 }
 0x223   : > { %2886 = vst [vmem:[%s4475_s22 + $0x18] sm:$0xff] %v2882_v7  }
 0x224 PF: > { %s13_s12 = sadd.s32 1, %s3718_s12  }
 0x225   : > { %p10_p4 = scmp.ge.s32.totalorder %s13_s12, 4  }
 0x227   :  { %12 = sbr.rel (!%p10_p4) target bundleno = 1 (0x1), region = 62 }

// kernel: convnet_forward.5
= control target key start
LH: loop header
LB: loop body
LE: loop exit
PB: predicated region body
PF: predicated region fallthrough
CT: control target
= control target key end

     0   :  { %s2586_s0 = inlined_call_operand.vmem [shape: bf16[8,2048], index: 0, kind: input, shape index: {}]   ;;  %s2587_s1 = inlined_call_operand.vmem [shape: bf16[2048,128], index: 1, kind: input, shape index: {}]   ;;  %s2588_s2 = inlined_call_operand.vmem [shape: f32[1,128], index: 2, kind: input, shape index: {}]   ;;  %s2589_s3 = inlined_call_operand.vmem [shape: bf16[128,128], index: 3, kind: input, shape index: {}]   ;;  %s2590_s4 = inlined_call_operand.vmem [shape: f32[1,128], index: 4, kind: input, shape index: {}]   ;;  %s2591_s5 = inlined_call_operand.hbm [shape: f32[8,128], index: 5, kind: output, shape index: {}]  }
   0x1   :  { %v1927_v0 = vld [vmem:[%s2587_s1 + $0x40] sm:$0xff]   ;;  %v1931_v4 = vld [vmem:[%s2587_s1 + $0x48] sm:$0xff]   ;;  %v1935_v8 = vld [vmem:[%s2587_s1 + $0x50] sm:$0xff]  }
   0x2   :  { %v1928_v1 = vld [vmem:[%s2587_s1 + $0xc0] sm:$0xff]   ;;  %1719 = vmatprep.subr.bf16.mxu0 %v1927_v0  ;;  %v1932_v5 = vld [vmem:[%s2587_s1 + $0xc8] sm:$0xff]   ;;  %v1936_v9 = vld [vmem:[%s2587_s1 + $0xd0] sm:$0xff]  }
   0x3   :  { %v1929_v2 = vld [vmem:[%s2587_s1] sm:$0xff]   ;;  %1741 = vmatprep.subr.bf16.mxu1 %v1928_v1  ;;  %v1933_v6 = vld [vmem:[%s2587_s1 + $0x8] sm:$0xff]   ;;  %v1937_v10 = vld [vmem:[%s2587_s1 + $0x10] sm:$0xff]  }
   0x4   :  { %v1930_v3 = vld [vmem:[%s2587_s1 + $0x80] sm:$0xff]   ;;  %1720 = vmatpush3.bf16.msra.mxu0 %v1929_v2  ;;  %v1934_v7 = vld [vmem:[%s2587_s1 + $0x88] sm:$0xff]   ;;  %v1938_v11 = vld [vmem:[%s2587_s1 + $0x90] sm:$0xff]  }
   0x5   :  { %1742 = vmatpush3.bf16.msra.mxu1 %v1930_v3  ;;  %1721 = vmatprep.subr.bf16.mxu0 %v1931_v4  ;;  %v1939_v12 = vld [vmem:[%s2587_s1 + $0x58] sm:$0xff]   ;;  %v1943_v16 = vld [vmem:[%s2587_s1 + $0x60] sm:$0xff]   ;;  %v1947_v20 = vld [vmem:[%s2587_s1 + $0x68] sm:$0xff]  }
   0x6   :  { %1743 = vmatprep.subr.bf16.mxu1 %v1932_v5  ;;  %v1940_v13 = vld [vmem:[%s2587_s1 + $0xd8] sm:$0xff]   ;;  %v1944_v17 = vld [vmem:[%s2587_s1 + $0xe0] sm:$0xff]   ;;  %v1948_v21 = vld [vmem:[%s2587_s1 + $0xe8] sm:$0xff]  }
   0x7   :  { %v1941_v14 = vld [vmem:[%s2587_s1 + $0x18] sm:$0xff]   ;;  %v1945_v18 = vld [vmem:[%s2587_s1 + $0x20] sm:$0xff]   ;;  %v1949_v22 = vld [vmem:[%s2587_s1 + $0x28] sm:$0xff]  }
   0x8   :  { %1722 = vmatpush3.bf16.msra.mxu0 %v1933_v6  ;;  %v1942_v15 = vld [vmem:[%s2587_s1 + $0x98] sm:$0xff]   ;;  %v1946_v19 = vld [vmem:[%s2587_s1 + $0xa0] sm:$0xff]   ;;  %v1950_v23 = vld [vmem:[%s2587_s1 + $0xa8] sm:$0xff]  }
   0x9   :  { %1744 = vmatpush3.bf16.msra.mxu1 %v1934_v7  ;;  %1723 = vmatprep.subr.bf16.mxu0 %v1935_v8  ;;  %v1951_v24 = vld [vmem:[%s2587_s1 + $0x70] sm:$0xff]   ;;  %v1955_v28 = vld [vmem:[%s2587_s1 + $0x78] sm:$0xff]   ;;  %v22_v32 = vld [vmem:[%s2586_s0] sm:$0xff] }
   0xa   :  { %1745 = vmatprep.subr.bf16.mxu1 %v1936_v9  ;;  %v1952_v25 = vld [vmem:[%s2587_s1 + $0xf0] sm:$0xff]   ;;  %v1956_v29 = vld [vmem:[%s2587_s1 + $0xf8] sm:$0xff]   ;;  %v23_v33 = vld [vmem:[%s2586_s0 + $0x8] sm:$0xff]  ;;  %v1566_v34 = vcombine.low %v22_v32, %v22_v32  ;;  %v1567_v35 = vcombine.high %v22_v32, %v22_v32 }
   0xb   :  { %v1953_v26 = vld [vmem:[%s2587_s1 + $0x30] sm:$0xff]   ;;  %v1957_v30 = vld [vmem:[%s2587_s1 + $0x38] sm:$0xff]   ;;  %v1568_v36 = vcombine.low %v23_v33, %v23_v33  ;;  %v1569_v37 = vcombine.high %v23_v33, %v23_v33  ;;  %v1963_v38 = vld [vmem:[%s2587_s1 + $0x140] sm:$0xff]  }
   0xc   :  { %1724 = vmatpush3.bf16.msra.mxu0 %v1937_v10  ;;  %v1954_v27 = vld [vmem:[%s2587_s1 + $0xb0] sm:$0xff]   ;;  %v1958_v31 = vld [vmem:[%s2587_s1 + $0xb8] sm:$0xff]   ;;  %v1964_v39 = vld [vmem:[%s2587_s1 + $0x1c0] sm:$0xff]   ;;  %1149 = vmatprep.mubr.bf16.mxu0 %v1567_v35 }
   0xd   :  { %1746 = vmatpush3.bf16.msra.mxu1 %v1938_v11  ;;  %1725 = vmatprep.subr.bf16.mxu0 %v1939_v12  ;;  %v1965_v40 = vld [vmem:[%s2587_s1 + $0x100] sm:$0xff]   ;;  %v1967_v42 = vld [vmem:[%s2587_s1 + $0x148] sm:$0xff]   ;;  %v1971_v46 = vld [vmem:[%s2587_s1 + $0x150] sm:$0xff]  }
   0xe   :  { %1747 = vmatprep.subr.bf16.mxu1 %v1940_v13  ;;  %1189 = vmatprep.mubr.bf16.mxu1 %v1569_v37  ;;  %v1966_v41 = vld [vmem:[%s2587_s1 + $0x180] sm:$0xff]   ;;  %v1968_v43 = vld [vmem:[%s2587_s1 + $0x1c8] sm:$0xff]   ;;  %v1972_v47 = vld [vmem:[%s2587_s1 + $0x1d0] sm:$0xff]  }
   0xf   :  { %v1969_v44 = vld [vmem:[%s2587_s1 + $0x108] sm:$0xff]   ;;  %v1973_v48 = vld [vmem:[%s2587_s1 + $0x110] sm:$0xff]   ;;  %v1975_v50 = vld [vmem:[%s2587_s1 + $0x158] sm:$0xff]  }
  0x10   :  { %1726 = vmatpush3.bf16.msra.mxu0 %v1941_v14  ;;  %v1970_v45 = vld [vmem:[%s2587_s1 + $0x188] sm:$0xff]   ;;  %v1974_v49 = vld [vmem:[%s2587_s1 + $0x190] sm:$0xff]   ;;  %v1976_v51 = vld [vmem:[%s2587_s1 + $0x1d8] sm:$0xff]  }
  0x11   :  { %1748 = vmatpush3.bf16.msra.mxu1 %v1942_v15  ;;  %1727 = vmatprep.subr.bf16.mxu0 %v1943_v16  ;;  %v1977_v52 = vld [vmem:[%s2587_s1 + $0x118] sm:$0xff]   ;;  %v1979_v54 = vld [vmem:[%s2587_s1 + $0x160] sm:$0xff]   ;;  %v1983_v58 = vld [vmem:[%s2587_s1 + $0x168] sm:$0xff]  }
  0x12   :  { %1749 = vmatprep.subr.bf16.mxu1 %v1944_v17  ;;  %v1978_v53 = vld [vmem:[%s2587_s1 + $0x198] sm:$0xff]   ;;  %v1980_v55 = vld [vmem:[%s2587_s1 + $0x1e0] sm:$0xff]   ;;  %v1984_v59 = vld [vmem:[%s2587_s1 + $0x1e8] sm:$0xff]  }
  0x13   :  { %v1981_v56 = vld [vmem:[%s2587_s1 + $0x120] sm:$0xff]   ;;  %v1985_v60 = vld [vmem:[%s2587_s1 + $0x128] sm:$0xff]   ;;  %v1987_v62 = vld [vmem:[%s2587_s1 + $0x170] sm:$0xff]  }
  0x14   :  { %1728 = vmatpush3.bf16.msra.mxu0 %v1945_v18  ;;  %v1982_v57 = vld [vmem:[%s2587_s1 + $0x1a0] sm:$0xff]   ;;  %v1986_v61 = vld [vmem:[%s2587_s1 + $0x1a8] sm:$0xff]   ;;  %v1988_v63 = vld [vmem:[%s2587_s1 + $0x1f0] sm:$0xff]  }
  0x15   :  { %1750 = vmatpush3.bf16.msra.mxu1 %v1946_v19  ;;  %1729 = vmatprep.subr.bf16.mxu0 %v1947_v20  ;;  %v1989_v0 = vld [vmem:[%s2587_s1 + $0x130] sm:$0xff]   ;;  %v1991_v2 = vld [vmem:[%s2587_s1 + $0x178] sm:$0xff]   ;;  %v1999_v12 = vld [vmem:[%s2587_s1 + $0x240] sm:$0xff]  }
  0x16   :  { %1751 = vmatprep.subr.bf16.mxu1 %v1948_v21  ;;  %v1990_v1 = vld [vmem:[%s2587_s1 + $0x1b0] sm:$0xff]   ;;  %v1992_v3 = vld [vmem:[%s2587_s1 + $0x1f8] sm:$0xff]   ;;  %v2000_v13 = vld [vmem:[%s2587_s1 + $0x2c0] sm:$0xff]  }
  0x17   :  { %v1993_v4 = vld [vmem:[%s2587_s1 + $0x138] sm:$0xff]   ;;  %v24_v6 = vld [vmem:[%s2586_s0 + $0x10] sm:$0xff]  ;;  %v2001_v14 = vld [vmem:[%s2587_s1 + $0x200] sm:$0xff]  }
  0x18   :  { %1730 = vmatpush3.bf16.msra.mxu0 %v1949_v22  ;;  %v1994_v5 = vld [vmem:[%s2587_s1 + $0x1b8] sm:$0xff]   ;;  %v1570_v7 = vcombine.low %v24_v6, %v24_v6  ;;  %v1571_v8 = vcombine.high %v24_v6, %v24_v6  ;;  %v2002_v15 = vld [vmem:[%s2587_s1 + $0x280] sm:$0xff]   ;;  %v2003_v16 = vld [vmem:[%s2587_s1 + $0x248] sm:$0xff]  }
  0x19   :  { %1752 = vmatpush3.bf16.msra.mxu1 %v1950_v23  ;;  %1731 = vmatprep.subr.bf16.mxu0 %v1951_v24  ;;  %v25_v9 = vld [vmem:[%s2586_s0 + $0x18] sm:$0xff]  ;;  %v2004_v17 = vld [vmem:[%s2587_s1 + $0x2c8] sm:$0xff]   ;;  %v2007_v20 = vld [vmem:[%s2587_s1 + $0x250] sm:$0xff]  }
  0x1a   :  { %1753 = vmatprep.subr.bf16.mxu1 %v1952_v25  ;;  %v1572_v10 = vcombine.low %v25_v9, %v25_v9  ;;  %v1573_v11 = vcombine.high %v25_v9, %v25_v9  ;;  %v2005_v18 = vld [vmem:[%s2587_s1 + $0x208] sm:$0xff]   ;;  %v2008_v21 = vld [vmem:[%s2587_s1 + $0x2d0] sm:$0xff]   ;;  %v2011_v24 = vld [vmem:[%s2587_s1 + $0x258] sm:$0xff]  }
  0x1b   :  { %v2006_v19 = vld [vmem:[%s2587_s1 + $0x288] sm:$0xff]   ;;  %v2009_v22 = vld [vmem:[%s2587_s1 + $0x210] sm:$0xff]   ;;  %v2012_v25 = vld [vmem:[%s2587_s1 + $0x2d8] sm:$0xff]  }
  0x1c   :  { %1732 = vmatpush3.bf16.msra.mxu0 %v1953_v26  ;;  %v2010_v23 = vld [vmem:[%s2587_s1 + $0x290] sm:$0xff]   ;;  %v2013_v26 = vld [vmem:[%s2587_s1 + $0x218] sm:$0xff]   ;;  %v2019_v32 = vld [vmem:[%s2587_s1 + $0x268] sm:$0xff]  }
  0x1d   :  { %1754 = vmatpush3.bf16.msra.mxu1 %v1954_v27  ;;  %1733 = vmatprep.subr.bf16.mxu0 %v1955_v28  ;;  %v2014_v27 = vld [vmem:[%s2587_s1 + $0x298] sm:$0xff]   ;;  %v2015_v28 = vld [vmem:[%s2587_s1 + $0x260] sm:$0xff]   ;;  %v2020_v33 = vld [vmem:[%s2587_s1 + $0x2e8] sm:$0xff]  }
  0x1e   :  { %1755 = vmatprep.subr.bf16.mxu1 %v1956_v29  ;;  %v2016_v29 = vld [vmem:[%s2587_s1 + $0x2e0] sm:$0xff]   ;;  %v2022_v35 = vld [vmem:[%s2587_s1 + $0x2a8] sm:$0xff]   ;;  %v2024_v37 = vld [vmem:[%s2587_s1 + $0x2f0] sm:$0xff]  }
  0x1f   :  { %v2055_v6 = vld [vmem:[%s2587_s1 + $0x368] sm:$0xff]  }
  0x20   :  { %1734 = vmatpush3.bf16.msra.mxu0 %v1957_v30  ;;  %v2017_v30 = vld [vmem:[%s2587_s1 + $0x220] sm:$0xff]   ;;  %v2058_v9 = vld [vmem:[%s2587_s1 + $0x3a8] sm:$0xff]  }
  0x21   :  { %1756 = vmatpush3.bf16.msra.mxu1 %v1958_v31  ;;  %1763 = vmatprep.subr.bf16.mxu0 %v1963_v38  ;;  %v2018_v31 = vld [vmem:[%s2587_s1 + $0x2a0] sm:$0xff]   ;;  %v2025_v38 = vld [vmem:[%s2587_s1 + $0x230] sm:$0xff]  }
  0x22   :  { %1785 = vmatprep.subr.bf16.mxu1 %v1964_v39  ;;  %v2026_v39 = vld [vmem:[%s2587_s1 + $0x2b0] sm:$0xff]  }
  0x23   :  { %1150 = vmatmul.mubr.bf16.vlgmr.msra.gmra.mrb[0].mxu0 %v1566_v34  ;;  %v2021_v34 = vld [vmem:[%s2587_s1 + $0x228] sm:$0xff]  }
  0x24   :  { %1190 = vmatmul.mubr.bf16.vlgmr.msra.gmra.mrb[0].mxu1 %v1568_v36  ;;  %1764 = vmatpush3.bf16.msra.mxu0 %v1965_v40  ;;  %v2023_v36 = vld [vmem:[%s2587_s1 + $0x270] sm:$0xff]   ;;  %v2027_v40 = vld [vmem:[%s2587_s1 + $0x278] sm:$0xff]  }
  0x25   :  { %1786 = vmatpush3.bf16.msra.mxu1 %v1966_v41  ;;  %1765 = vmatprep.subr.bf16.mxu0 %v1967_v42  ;;  %v2028_v41 = vld [vmem:[%s2587_s1 + $0x2f8] sm:$0xff]  }
  0x26   :  { %1787 = vmatprep.subr.bf16.mxu1 %v1968_v43  ;;  %1229 = vmatprep.mubr.bf16.mxu0 %v1571_v8  ;;  %v2029_v42 = vld [vmem:[%s2587_s1 + $0x238] sm:$0xff]   ;;  %v2057_v8 = vld [vmem:[%s2587_s1 + $0x328] sm:$0xff]  }
  0x27   :  { %1269 = vmatprep.mubr.bf16.mxu1 %v1573_v11  ;;  %v2030_v43 = vld [vmem:[%s2587_s1 + $0x2b8] sm:$0xff]   ;;  %v2060_v11 = vld [vmem:[%s2587_s1 + $0x3f0] sm:$0xff]  }
  0x28   :  { %1766 = vmatpush3.bf16.msra.mxu0 %v1969_v44  ;;  %v26_v44 = vld [vmem:[%s2586_s0 + $0x20] sm:$0xff] }
  0x29   :  { %1788 = vmatpush3.bf16.msra.mxu1 %v1970_v45  ;;  %1767 = vmatprep.subr.bf16.mxu0 %v1971_v46  ;;  %v27_v45 = vld [vmem:[%s2586_s0 + $0x28] sm:$0xff]  ;;  %v1574_v46 = vcombine.low %v26_v44, %v26_v44 }
  0x2a   :  { %1789 = vmatprep.subr.bf16.mxu1 %v1972_v47  ;;  %v1575_v47 = vcombine.high %v26_v44, %v26_v44 }
  0x2c   :  { %1768 = vmatpush3.bf16.msra.mxu0 %v1973_v48  ;;  %v1576_v48 = vcombine.low %v27_v45, %v27_v45 }
  0x2d   :  { %1790 = vmatpush3.bf16.msra.mxu1 %v1974_v49  ;;  %1769 = vmatprep.subr.bf16.mxu0 %v1975_v50  ;;  %v1577_v49 = vcombine.high %v27_v45, %v27_v45  ;;  %v2035_v50 = vld [vmem:[%s2587_s1 + $0x340] sm:$0xff]  }
  0x2e   :  { %1791 = vmatprep.subr.bf16.mxu1 %v1976_v51  ;;  %v2036_v51 = vld [vmem:[%s2587_s1 + $0x3c0] sm:$0xff]  }
  0x30   :  { %1770 = vmatpush3.bf16.msra.mxu0 %v1977_v52  ;;  %v2037_v52 = vld [vmem:[%s2587_s1 + $0x300] sm:$0xff]  }
  0x31   :  { %1792 = vmatpush3.bf16.msra.mxu1 %v1978_v53  ;;  %1771 = vmatprep.subr.bf16.mxu0 %v1979_v54  ;;  %v2038_v53 = vld [vmem:[%s2587_s1 + $0x380] sm:$0xff]   ;;  %v2039_v54 = vld [vmem:[%s2587_s1 + $0x348] sm:$0xff]  }
  0x32   :  { %1793 = vmatprep.subr.bf16.mxu1 %v1980_v55  ;;  %v2040_v55 = vld [vmem:[%s2587_s1 + $0x3c8] sm:$0xff]  }
  0x34   :  { %1772 = vmatpush3.bf16.msra.mxu0 %v1981_v56  ;;  %v2041_v56 = vld [vmem:[%s2587_s1 + $0x308] sm:$0xff]  }
  0x35   :  { %1794 = vmatpush3.bf16.msra.mxu1 %v1982_v57  ;;  %1773 = vmatprep.subr.bf16.mxu0 %v1983_v58  ;;  %v2042_v57 = vld [vmem:[%s2587_s1 + $0x388] sm:$0xff]   ;;  %v2043_v58 = vld [vmem:[%s2587_s1 + $0x350] sm:$0xff]  }
  0x36   :  { %1795 = vmatprep.subr.bf16.mxu1 %v1984_v59  ;;  %v2044_v59 = vld [vmem:[%s2587_s1 + $0x3d0] sm:$0xff]  }
  0x38   :  { %1774 = vmatpush3.bf16.msra.mxu0 %v1985_v60  ;;  %v2045_v60 = vld [vmem:[%s2587_s1 + $0x310] sm:$0xff]  }
  0x39   :  { %1796 = vmatpush3.bf16.msra.mxu1 %v1986_v61  ;;  %1775 = vmatprep.subr.bf16.mxu0 %v1987_v62  ;;  %v2046_v61 = vld [vmem:[%s2587_s1 + $0x390] sm:$0xff]   ;;  %v2047_v62 = vld [vmem:[%s2587_s1 + $0x358] sm:$0xff]  }
  0x3a   :  { %1797 = vmatprep.subr.bf16.mxu1 %v1988_v63  ;;  %v2048_v63 = vld [vmem:[%s2587_s1 + $0x3d8] sm:$0xff]  }
  0x3c   :  { %1776 = vmatpush3.bf16.msra.mxu0 %v1989_v0  ;;  %v2049_v0 = vld [vmem:[%s2587_s1 + $0x318] sm:$0xff]  }
  0x3d   :  { %1798 = vmatpush3.bf16.msra.mxu1 %v1990_v1  ;;  %1777 = vmatprep.subr.bf16.mxu0 %v1991_v2  ;;  %v2050_v1 = vld [vmem:[%s2587_s1 + $0x398] sm:$0xff]   ;;  %v2051_v2 = vld [vmem:[%s2587_s1 + $0x360] sm:$0xff]  }
  0x3e   :  { %1799 = vmatprep.subr.bf16.mxu1 %v1992_v3  ;;  %v2052_v3 = vld [vmem:[%s2587_s1 + $0x3e0] sm:$0xff]  }
  0x40   :  { %1778 = vmatpush3.bf16.msra.mxu0 %v1993_v4  ;;  %v2053_v4 = vld [vmem:[%s2587_s1 + $0x320] sm:$0xff]  }
  0x41   :  { %1800 = vmatpush3.bf16.msra.mxu1 %v1994_v5  ;;  %1807 = vmatprep.subr.bf16.mxu0 %v1999_v12  ;;  %v2054_v5 = vld [vmem:[%s2587_s1 + $0x3a0] sm:$0xff]   ;;  %v2061_v12 = vld [vmem:[%s2587_s1 + $0x330] sm:$0xff]  }
  0x42   :  { %1829 = vmatprep.subr.bf16.mxu1 %v2000_v13  ;;  %v2062_v13 = vld [vmem:[%s2587_s1 + $0x3b0] sm:$0xff]  }
  0x43   :  { %1230 = vmatmul.mubr.bf16.vlgmr.msra.gmra.mrb[4].mxu0 %v1570_v7  ;;  %v2056_v7 = vld [vmem:[%s2587_s1 + $0x3e8] sm:$0xff]  }
  0x44   :  { %1270 = vmatmul.mubr.bf16.vlgmr.msra.gmra.mrb[4].mxu1 %v1572_v10  ;;  %1808 = vmatpush3.bf16.msra.mxu0 %v2001_v14  ;;  %v2059_v10 = vld [vmem:[%s2587_s1 + $0x370] sm:$0xff]   ;;  %v2063_v14 = vld [vmem:[%s2587_s1 + $0x378] sm:$0xff]  }
  0x45   :  { %1830 = vmatpush3.bf16.msra.mxu1 %v2002_v15  ;;  %1809 = vmatprep.subr.bf16.mxu0 %v2003_v16  ;;  %v2064_v15 = vld [vmem:[%s2587_s1 + $0x3f8] sm:$0xff]  }
  0x46   :  { %1831 = vmatprep.subr.bf16.mxu1 %v2004_v17  ;;  %1309 = vmatprep.mubr.bf16.mxu0 %v1575_v47  ;;  %v2065_v16 = vld [vmem:[%s2587_s1 + $0x338] sm:$0xff]  }
  0x47   :  { %1349 = vmatprep.mubr.bf16.mxu1 %v1577_v49  ;;  %v2066_v17 = vld [vmem:[%s2587_s1 + $0x3b8] sm:$0xff]  }
  0x48   :  { %1810 = vmatpush3.bf16.msra.mxu0 %v2005_v18  ;;  %v28_v18 = vld [vmem:[%s2586_s0 + $0x30] sm:$0xff] }
  0x49   :  { %1832 = vmatpush3.bf16.msra.mxu1 %v2006_v19  ;;  %1811 = vmatprep.subr.bf16.mxu0 %v2007_v20  ;;  %v29_v19 = vld [vmem:[%s2586_s0 + $0x38] sm:$0xff]  ;;  %v1578_v20 = vcombine.low %v28_v18, %v28_v18 }
  0x4a   :  { %1833 = vmatprep.subr.bf16.mxu1 %v2008_v21  ;;  %v1579_v21 = vcombine.high %v28_v18, %v28_v18 }
  0x4c   :  { %1812 = vmatpush3.bf16.msra.mxu0 %v2009_v22  ;;  %v1580_v22 = vcombine.low %v29_v19, %v29_v19 }
  0x4d   :  { %1834 = vmatpush3.bf16.msra.mxu1 %v2010_v23  ;;  %1813 = vmatprep.subr.bf16.mxu0 %v2011_v24  ;;  %v1581_v23 = vcombine.high %v29_v19, %v29_v19 }
  0x4e   :  { %1835 = vmatprep.subr.bf16.mxu1 %v2012_v25 }
  0x50   :  { %1814 = vmatpush3.bf16.msra.mxu0 %v2013_v26 }
  0x51   :  { %1836 = vmatpush3.bf16.msra.mxu1 %v2014_v27  ;;  %1815 = vmatprep.subr.bf16.mxu0 %v2015_v28 }
  0x52   :  { %1837 = vmatprep.subr.bf16.mxu1 %v2016_v29 }
  0x54   :  { %1816 = vmatpush3.bf16.msra.mxu0 %v2017_v30 }
  0x55   :  { %1838 = vmatpush3.bf16.msra.mxu1 %v2018_v31  ;;  %1817 = vmatprep.subr.bf16.mxu0 %v2019_v32 }
  0x56   :  { %1839 = vmatprep.subr.bf16.mxu1 %v2020_v33 }
  0x58   :  { %1818 = vmatpush3.bf16.msra.mxu0 %v2021_v34 }
  0x59   :  { %1840 = vmatpush3.bf16.msra.mxu1 %v2022_v35  ;;  %1819 = vmatprep.subr.bf16.mxu0 %v2023_v36 }
  0x5a   :  { %1841 = vmatprep.subr.bf16.mxu1 %v2024_v37 }
  0x5c   :  { %1820 = vmatpush3.bf16.msra.mxu0 %v2025_v38 }
  0x5d   :  { %1842 = vmatpush3.bf16.msra.mxu1 %v2026_v39  ;;  %1821 = vmatprep.subr.bf16.mxu0 %v2027_v40 }
  0x5e   :  { %1843 = vmatprep.subr.bf16.mxu1 %v2028_v41 }
  0x60   :  { %1822 = vmatpush3.bf16.msra.mxu0 %v2029_v42 }
  0x61   :  { %1844 = vmatpush3.bf16.msra.mxu1 %v2030_v43  ;;  %1851 = vmatprep.subr.bf16.mxu0 %v2035_v50 }
  0x62   :  { %1873 = vmatprep.subr.bf16.mxu1 %v2036_v51 }
  0x63   :  { %1310 = vmatmul.mubr.bf16.vlgmr.msra.gmra.mrb[8].mxu0 %v1574_v46 }
  0x64   :  { %1350 = vmatmul.mubr.bf16.vlgmr.msra.gmra.mrb[8].mxu1 %v1576_v48  ;;  %1852 = vmatpush3.bf16.msra.mxu0 %v2037_v52 }
  0x65   :  { %1874 = vmatpush3.bf16.msra.mxu1 %v2038_v53  ;;  %1853 = vmatprep.subr.bf16.mxu0 %v2039_v54 }
  0x66   :  { %1875 = vmatprep.subr.bf16.mxu1 %v2040_v55  ;;  %1389 = vmatprep.mubr.bf16.mxu0 %v1579_v21 }
  0x67   :  { %1429 = vmatprep.mubr.bf16.mxu1 %v1581_v23 }
  0x68   :  { %1854 = vmatpush3.bf16.msra.mxu0 %v2041_v56 }
  0x69   :  { %1876 = vmatpush3.bf16.msra.mxu1 %v2042_v57  ;;  %1855 = vmatprep.subr.bf16.mxu0 %v2043_v58 }
  0x6a   :  { %1877 = vmatprep.subr.bf16.mxu1 %v2044_v59 }
  0x6c   :  { %1856 = vmatpush3.bf16.msra.mxu0 %v2045_v60 }
  0x6d   :  { %1878 = vmatpush3.bf16.msra.mxu1 %v2046_v61  ;;  %1857 = vmatprep.subr.bf16.mxu0 %v2047_v62 }
  0x6e   :  { %1879 = vmatprep.subr.bf16.mxu1 %v2048_v63 }
  0x70   :  { %1858 = vmatpush3.bf16.msra.mxu0 %v2049_v0 }
  0x71   :  { %1880 = vmatpush3.bf16.msra.mxu1 %v2050_v1  ;;  %1859 = vmatprep.subr.bf16.mxu0 %v2051_v2 }
  0x72   :  { %1881 = vmatprep.subr.bf16.mxu1 %v2052_v3 }
  0x74   :  { %1860 = vmatpush3.bf16.msra.mxu0 %v2053_v4 }
  0x75   :  { %1882 = vmatpush3.bf16.msra.mxu1 %v2054_v5  ;;  %1861 = vmatprep.subr.bf16.mxu0 %v2055_v6 }
  0x76   :  { %1883 = vmatprep.subr.bf16.mxu1 %v2056_v7 }
  0x78   :  { %1862 = vmatpush3.bf16.msra.mxu0 %v2057_v8 }
  0x79   :  { %1884 = vmatpush3.bf16.msra.mxu1 %v2058_v9  ;;  %1863 = vmatprep.subr.bf16.mxu0 %v2059_v10 }
  0x7a   :  { %1885 = vmatprep.subr.bf16.mxu1 %v2060_v11 }
  0x7c   :  { %1864 = vmatpush3.bf16.msra.mxu0 %v2061_v12 }
  0x7d   :  { %1886 = vmatpush3.bf16.msra.mxu1 %v2062_v13  ;;  %1865 = vmatprep.subr.bf16.mxu0 %v2063_v14 }
  0x7e   :  { %1887 = vmatprep.subr.bf16.mxu1 %v2064_v15 }
  0x80   :  { %1866 = vmatpush3.bf16.msra.mxu0 %v2065_v16 }
  0x81   :  { %1888 = vmatpush3.bf16.msra.mxu1 %v2066_v17 }
  0x83   :  { %1390 = vmatmul.mubr.bf16.vlgmr.msra.gmra.mrb[12].mxu0 %v1578_v20 }
  0x84   :  { %1430 = vmatmul.mubr.bf16.vlgmr.msra.gmra.mrb[12].mxu1 %v1580_v22 }
  0x85   :  { %10 = vsyncpa [#allocation3], 0  ;;  %v2071_v24 = vld [vmem:[%s2589_s3] sm:$0xff]   ;;  %v2103_v25 = vmov 0.0   ;;  %v2072_v26 = vld [vmem:[%s2589_s3 + $0x8] sm:$0xff]   ;;  %vm2104_vm0 = vmmov 0  }
  0x86   :  { %1904 = vmatprep.subr.bf16.mxu0 %v2103_v25  ;;  %v2073_v27 = vld [vmem:[%s2589_s3 + $0x10] sm:$0xff]   ;;  %v2074_v28 = vld [vmem:[%s2589_s3 + $0x18] sm:$0xff]   ;;  %v2075_v29 = vld [vmem:[%s2589_s3 + $0x20] sm:$0xff]   ;;  %1920 = vmatprep.mubr.msk.bf16.mxu0 %vm2104_vm0, %v2103_v25  ;;  %s2105_s6 = smov [#allocation2]  }
  0x87   :  { %1905 = vmatpush3.bf16.msra.mxu0 %v2071_v24  ;;  %v2076_v30 = vld [vmem:[%s2589_s3 + $0x28] sm:$0xff]   ;;  %v2077_v31 = vld [vmem:[%s2589_s3 + $0x30] sm:$0xff]   ;;  %v2078_v32 = vld [vmem:[%s2589_s3 + $0x38] sm:$0xff]   ;;  %s1557_s7 = sshll.u32 %s2105_s6, 4  ;;  %s1558_s7 = int_to_ptr.vmem [resolvable:$true] %s1557_s7 }
  0x88   :  { %1906 = vmatprep.subr.bf16.mxu0 %v2103_v25  ;;  %v1565_v35 = vld [vmem:[%s2588_s2] ss:$0 sm:$0xff]  ;;  %s2079_s8 = scalar_lea.vmem %s1558_s7, 128  ;;  %p2084_p1 = scmp.lt.s32.totalorder %s1558_s7, %s1558_s7 }
  0x89   :  { %v1710_v20 = vld [vmem:[%s2590_s4] ss:$0 sm:$0xff]  ;;  %p2080_p0 = scmp.ne.s32.totalorder %s1558_s7, %s2079_s8  ;;  %p2085_p2 = scmp.lt.s32.totalorder %s2079_s8, %s2079_s8 }
  0x8b   :  { %1907 = vmatpush3.bf16.msra.mxu0 %v2072_v26  ;;  %p2086_p3 = por %p2085_p2, %p2084_p1 }
  0x8c   :  { %1908 = vmatprep.subr.bf16.mxu0 %v2103_v25 }
  0x8d   :  { %p2087_p4 = pnand %p2086_p3, %p2080_p0 }
  0x8f   :  { %1909 = vmatpush3.bf16.msra.mxu0 %v2073_v27 }
  0x90   :  { %1910 = vmatprep.subr.bf16.mxu0 %v2103_v25 }
  0x93   :  { %1911 = vmatpush3.bf16.msra.mxu0 %v2074_v28 }
  0x94   :  { %1912 = vmatprep.subr.bf16.mxu0 %v2103_v25 }
  0x97   :  { %1913 = vmatpush3.bf16.msra.mxu0 %v2075_v29 }
  0x98   :  { %1914 = vmatprep.subr.bf16.mxu0 %v2103_v25 }
  0x9b   :  { %1915 = vmatpush3.bf16.msra.mxu0 %v2076_v30 }
  0x9c   :  { %1916 = vmatprep.subr.bf16.mxu0 %v2103_v25 }
  0x9f   :  { %1917 = vmatpush3.bf16.msra.mxu0 %v2077_v31 }
  0xa0   :  { %1918 = vmatprep.subr.bf16.mxu0 %v2103_v25 }
  0xa3   :  { %1919 = vmatpush3.bf16.msra.mxu0 %v2078_v32 }
  0xf6   :  { %v1735_v33 = vpop.f32.mrb[0].mxu0 }
  0xf7   :  { %v1757_v34 = vpop.f32.mrb[0].mxu1  ;;  %v1736_v36 = vpop.f32.mrb[1].mxu0 }
  0xf8   :  { %v1758_v37 = vpop.f32.mrb[1].mxu1  ;;  %v1737_v38 = vadd.f32 %v1736_v36, %v1735_v33  ;;  %v1738_v40 = vpop.f32.mrb[2].mxu0 }
  0xf9   :  { %v1759_v39 = vadd.f32 %v1758_v37, %v1757_v34  ;;  %v1760_v41 = vpop.f32.mrb[2].mxu1  ;;  %v1739_v42 = vpop.f32.mrb[3].mxu0 }
  0xfa   :  { %v1761_v43 = vpop.f32.mrb[3].mxu1  ;;  %v1152_v44 = vadd.f32 %v1737_v38, %v1565_v35 }
  0xfc   :  { %v1192_v45 = vadd.f32 %v1759_v39, %v1152_v44 }
 0x116   :  { %v1779_v46 = vpop.f32.mrb[4].mxu0 }
 0x117   :  { %v1801_v47 = vpop.f32.mrb[4].mxu1  ;;  %v1780_v48 = vpop.f32.mrb[5].mxu0 }
 0x118   :  { %v1802_v49 = vpop.f32.mrb[5].mxu1  ;;  %v1781_v50 = vadd.f32 %v1780_v48, %v1779_v46  ;;  %v1782_v52 = vpop.f32.mrb[6].mxu0 }
 0x119   :  { %v1803_v51 = vadd.f32 %v1802_v49, %v1801_v47  ;;  %v1804_v53 = vpop.f32.mrb[6].mxu1  ;;  %v1783_v54 = vpop.f32.mrb[7].mxu0 }
 0x11a   :  { %v1805_v55 = vpop.f32.mrb[7].mxu1  ;;  %v1232_v56 = vadd.f32 %v1781_v50, %v1192_v45 }
 0x11c   :  { %v1272_v57 = vadd.f32 %v1803_v51, %v1232_v56 }
 0x136   :  { %v1823_v58 = vpop.f32.mrb[8].mxu0 }
 0x137   :  { %v1845_v59 = vpop.f32.mrb[8].mxu1  ;;  %v1824_v60 = vpop.f32.mrb[9].mxu0 }
 0x138   :  { %v1825_v61 = vadd.f32 %v1824_v60, %v1823_v58  ;;  %v1846_v62 = vpop.f32.mrb[9].mxu1  ;;  %v1826_v63 = vpop.f32.mrb[10].mxu0 }
 0x139   :  { %v1847_v0 = vadd.f32 %v1846_v62, %v1845_v59  ;;  %v1848_v1 = vpop.f32.mrb[10].mxu1  ;;  %v1827_v2 = vpop.f32.mrb[11].mxu0 }
 0x13a   :  { %v1312_v3 = vadd.f32 %v1825_v61, %v1272_v57  ;;  %v1849_v4 = vpop.f32.mrb[11].mxu1 }
 0x13c   :  { %v1352_v5 = vadd.f32 %v1847_v0, %v1312_v3 }
 0x156   :  { %v1867_v6 = vpop.f32.mrb[12].mxu0 }
 0x157   :  { %v1889_v7 = vpop.f32.mrb[12].mxu1  ;;  %v1868_v8 = vpop.f32.mrb[13].mxu0 }
 0x158   :  { %v1869_v9 = vadd.f32 %v1868_v8, %v1867_v6  ;;  %v1890_v10 = vpop.f32.mrb[13].mxu1  ;;  %v1870_v11 = vpop.f32.mrb[14].mxu0 }
 0x159   :  { %v1891_v12 = vadd.f32 %v1890_v10, %v1889_v7  ;;  %v1892_v13 = vpop.f32.mrb[14].mxu1  ;;  %v1871_v14 = vpop.f32.mrb[15].mxu0 }
 0x15a   :  { %v1392_v15 = vadd.f32 %v1869_v9, %v1352_v5  ;;  %v1893_v16 = vpop.f32.mrb[15].mxu1 }
 0x15c   :  { %v1432_v17 = vadd.f32 %v1891_v12, %v1392_v15 }
 0x15e   :  { %v1437_v18 = vmax.f32 %v1432_v17, 0.0 }
 0x160   :  { %v1438_v19 = vpack.c.bf16 %v1437_v18, %v1437_v18 }
 0x162   :  { %1921 = vmatmul.mubr.bf16.vlgmr.msra.gmra.mrb[16].mxu0 %v1438_v19 }
 0x235   :  { %v1544_v21 = vpop.f32.mrb[16].mxu0 }
 0x236   :  { %v1545_v22 = vadd.f32 %v1710_v20, %v1544_v21  ;;  %v1922_v23 = vpop.f32.mrb[17].mxu0 }
 0x237   :  { %v1547_v24 = vpop.f32.mrb[18].mxu0 }
 0x238   :  { %1550 = vst [vmem:[#allocation2] sm:$0xff] %v1545_v22  ;;  %v1923_v25 = vpop.f32.mrb[19].mxu0 }
 0x239   :  { %2090 = shalt.err (!%p2087_p4)
}
 0x23a   :  { %s2091_s4 = scalar_lea.hbm %s2591_s5, 128 }
 0x23b   :  { %p2092_p5 = scmp.ne.s32.totalorder %s2591_s5, %s2091_s4  ;;  %p2095_p6 = scmp.lt.u32.totalorder %s2091_s4, %s2591_s5 }
 0x23d   :  { %p2097_p7 = pnand %p2095_p6, %p2092_p5 }
 0x23f   :  { %2100 = shalt.err (!%p2097_p7)
}
 0x240   :  { %1560 = dma.vmem_to_hbm [thread:$0]  %s1558_s7, 128, %s2591_s5, [#allocation3]  }
 0x241   :  { %2101 = dma.done.wait [#allocation3], 128  }
 0x242   :  { %2102 = vsyncadd [#allocation3], 4294967168 }
 0x243   :  { %1564 = vsyncpa [#allocation3], 1 }

</bundles_post_ra>
